<compile_context>
chip_gen: v6e
topology: v6e:2x2x1
jax: 0.10.0
libtpu: 0.0.40
codegen_flags: <defaults>
</compile_context>

<pallas_src>
import functools

import jax
import jax.numpy as jnp
import numpy as np
from jax.experimental import pallas as pl
from jax.experimental.pallas import tpu as pltpu


# ---------------------------------------------------------------------------
# Pallas kernels
# ---------------------------------------------------------------------------
def _make_conv_kernel(wp: int):
    """Fused 27-tap Conv3d(k=3, p=1) over one padded depth slice + BN partials."""

    def kernel(x0_ref, x1_ref, x2_ref, w_ref, mask_ref, y_ref, stats_ref):
        # x{k}_ref : (1, 1, C_in, L)   padded depth slice (d + k), L = Hp*Wp
        # w_ref    : (27, C_out, C_in) per-tap transposed conv weights
        # mask_ref : (1, L)            1.0 on valid (non-halo) H/W positions
        # y_ref    : (1, 1, C_out, L)  conv output for depth slice d
        # stats_ref: (1, 1, C_out, 2)  masked [sum, sum_of_squares] for BN
        c_out = w_ref.shape[1]
        L = x0_ref.shape[-1]
        w = w_ref[...]                                     # (27, C_out, C_in)
        xs = (x0_ref[...][0, 0], x1_ref[...][0, 0], x2_ref[...][0, 0])

        acc = jnp.zeros((c_out, L), jnp.float32)
        for kd in range(3):
            x = xs[kd]
            for kh in range(3):
                for kw in range(3):
                    off = (kh - 1) * wp + (kw - 1)         # lane offset of this tap
                    s = off % L
                    if s == 0:
                        xt = x
                    else:
                        # circular lane shift: xt[:, j] = x[:, (j + off) % L].
                        # Wrapped values only land in padded columns, which are
                        # masked out of the stats and cropped before output.
                        xt = jnp.concatenate([x[:, s:], x[:, :s]], axis=1)
                    t = kd * 9 + kh * 3 + kw
                    acc = acc + jnp.dot(
                        w[t], xt,
                        preferred_element_type=jnp.float32,
                        precision=jax.lax.Precision.HIGHEST)

        # lane-dense (C_out, L) store of the conv result
        y_ref[...] = acc[None, None].astype(y_ref.dtype)

        # masked per-channel partial sums for training-mode BatchNorm
        m = mask_ref[...]                                  # (1, L)
        am = acc * m
        s1 = jnp.sum(am, axis=1, keepdims=True)            # (C_out, 1)
        s2 = jnp.sum(am * acc, axis=1, keepdims=True)      # (C_out, 1)
        stats_ref[...] = jnp.concatenate([s1, s2], axis=1)[None, None]

    return kernel


def _make_bn_relu_kernel(ho: int, wo: int):
    """Crop the padded halo, apply folded-BN affine + ReLU, emit NCDHW block."""

    def kernel(y_ref, scale_ref, shift_ref, o_ref):
        # y_ref    : (1, 1, C_out, Hp, Wp)
        # scale_ref: (C_out, 1), shift_ref: (C_out, 1)
        # o_ref    : (1, C_out, 1, Ho, Wo)
        y = y_ref[...][0, 0, :, 1:1 + ho, 1:1 + wo]        # (C_out, Ho, Wo) valid
        s = scale_ref[...][:, :, None]                     # (C_out, 1, 1)
        b = shift_ref[...][:, :, None]
        o_ref[...] = jnp.maximum(y * s + b, 0.0)[None, :, None]

    return kernel


# ---------------------------------------------------------------------------
# Trilinear x2 upsample helpers (align_corners=True)
# ---------------------------------------------------------------------------
def _interp_matrix(l_in, l_out):
    if l_in == 1:
        return jnp.ones((l_out, 1), jnp.float32)
    pos = jnp.arange(l_out, dtype=jnp.float32) * (l_in - 1) / (l_out - 1)
    i0 = jnp.clip(jnp.floor(pos).astype(jnp.int32), 0, l_in - 1)
    i1 = jnp.clip(i0 + 1, 0, l_in - 1)
    w1 = pos - i0.astype(jnp.float32)
    w0 = 1.0 - w1
    rows = jnp.arange(l_out)
    m = jnp.zeros((l_out, l_in), jnp.float32)
    m = m.at[rows, i0].add(w0)
    m = m.at[rows, i1].add(w1)
    return m


def _interp_matrix_padded(l_in, l_out):
    # one zero row prepended/appended: the upsample einsums emit the conv's
    # zero padding for free (no separate jnp.pad pass over the 8x tensor).
    return jnp.pad(_interp_matrix(l_in, l_out), ((1, 1), (0, 0)))


def _upsample_padded_x2(x):
    """NCDHW -> (N, 2D+2, C, 2H+2, 2W+2): upsampled, zero-padded, channels-middle."""
    _, _, d, h, w = x.shape
    md = _interp_matrix_padded(d, 2 * d)
    mh = _interp_matrix_padded(h, 2 * h)
    mw = _interp_matrix_padded(w, 2 * w)
    hi = jax.lax.Precision.HIGHEST
    y = jnp.einsum("pd,ncdhw->npchw", md, x, precision=hi)
    y = jnp.einsum("qh,npchw->npcqw", mh, y, precision=hi)
    y = jnp.einsum("rw,npcqw->npcqr", mw, y, precision=hi)
    return y


def trilinear_upsample_x2(x):  # reference path, NCDHW -> NCDHW
    _, _, d, h, w = x.shape
    md = _interp_matrix(d, 2 * d)
    mh = _interp_matrix(h, 2 * h)
    mw = _interp_matrix(w, 2 * w)
    hi = jax.lax.Precision.HIGHEST
    y = jnp.einsum("od,ncdhw->ncohw", md, x, precision=hi)
    y = jnp.einsum("ph,ncohw->ncopw", mh, y, precision=hi)
    y = jnp.einsum("qw,ncopw->ncopq", mw, y, precision=hi)
    return y


# ---------------------------------------------------------------------------
# up_conv forward
# ---------------------------------------------------------------------------
def up_conv_forward(x, conv_w, conv_b, gamma, beta, eps=1e-5,
                    compute_dtype=jnp.float32):
    # conv_b is accepted for signature parity but unused: training-mode
    # BatchNorm subtracts the batch mean, which cancels a per-channel constant
    # bias exactly (verified against the biased reference below).
    del conv_b
    n, c_in, d, h, w = x.shape
    c_out = conv_w.shape[0]
    do, ho, wo = 2 * d, 2 * h, 2 * w
    dp, hp, wp = do + 2, ho + 2, wo + 2
    L = hp * wp
    vmem_limit = 64 * 1024 * 1024

    # 1) trilinear x2 upsample emitted directly into the padded conv layout
    xp = _upsample_padded_x2(x).astype(compute_dtype)      # (N, Dp, C_in, Hp, Wp)
    xp = xp.reshape(n, dp, c_in, L)                        # flatten H*W onto lanes

    # 2) per-tap transposed weights: w_taps[kd*9+kh*3+kw] = conv_w[:, :, kd, kh, kw]
    w_taps = jnp.transpose(conv_w, (2, 3, 4, 0, 1)).reshape(27, c_out, c_in)
    w_taps = w_taps.astype(compute_dtype)

    # 3) validity mask over the flattened padded H*W plane (for BN statistics)
    hv = (jnp.arange(hp) >= 1) & (jnp.arange(hp) <= hp - 2)
    wv = (jnp.arange(wp) >= 1) & (jnp.arange(wp) <= wp - 2)
    mask = (hv[:, None] & wv[None, :]).astype(jnp.float32).reshape(1, L)

    # 4) fused conv (27 shifted matmuls) + masked BN partial stats
    y, stats = pl.pallas_call(
        _make_conv_kernel(wp),
        out_shape=(
            jax.ShapeDtypeStruct((n, do, c_out, L), jnp.float32),
            jax.ShapeDtypeStruct((n, do, c_out, 2), jnp.float32),
        ),
        grid=(n, do),
        in_specs=[
            pl.BlockSpec((1, 1, c_in, L), lambda i, j: (i, j, 0, 0)),
            pl.BlockSpec((1, 1, c_in, L), lambda i, j: (i, j + 1, 0, 0)),
            pl.BlockSpec((1, 1, c_in, L), lambda i, j: (i, j + 2, 0, 0)),
            pl.BlockSpec((27, c_out, c_in), lambda i, j: (0, 0, 0)),
            pl.BlockSpec((1, L), lambda i, j: (0, 0)),
        ],
        out_specs=(
            pl.BlockSpec((1, 1, c_out, L), lambda i, j: (i, j, 0, 0)),
            pl.BlockSpec((1, 1, c_out, 2), lambda i, j: (i, j, 0, 0)),
        ),
        compiler_params=pltpu.CompilerParams(
            dimension_semantics=("parallel", "parallel"),
            vmem_limit_bytes=vmem_limit),
    )(xp, xp, xp, w_taps, mask)

    # 5) finish the (tiny) BN reduction: biased batch stats over valid positions
    count = jnp.asarray(n * do * ho * wo, jnp.float32)
    s1 = jnp.sum(stats[..., 0], axis=(0, 1))               # (C_out,)
    s2 = jnp.sum(stats[..., 1], axis=(0, 1))               # (C_out,)
    mean = s1 / count
    var = jnp.maximum(s2 / count - mean * mean, 0.0)
    scale = gamma / jnp.sqrt(var + eps)
    shift = beta - mean * scale

    # 6) fused "crop halo + BN affine + ReLU + NCDHW layout" kernel
    y5 = y.reshape(n, do, c_out, hp, wp)                   # free reshape
    out = pl.pallas_call(
        _make_bn_relu_kernel(ho, wo),
        out_shape=jax.ShapeDtypeStruct((n, c_out, do, ho, wo), jnp.float32),
        grid=(n, do),
        in_specs=[
            pl.BlockSpec((1, 1, c_out, hp, wp), lambda i, j: (i, j, 0, 0, 0)),
            pl.BlockSpec((c_out, 1), lambda i, j: (0, 0)),
            pl.BlockSpec((c_out, 1), lambda i, j: (0, 0)),
        ],
        out_specs=pl.BlockSpec((1, c_out, 1, ho, wo), lambda i, j: (i, 0, j, 0, 0)),
        compiler_params=pltpu.CompilerParams(
            dimension_semantics=("parallel", "parallel"),
            vmem_limit_bytes=vmem_limit),
    )(y5, scale.reshape(c_out, 1), shift.reshape(c_out, 1))
    return out


# ---------------------------------------------------------------------------
# Pure-JAX reference (with conv bias, for a correctness spot-check)
# ---------------------------------------------------------------------------
def up_conv_reference(x, conv_w, conv_b, gamma, beta, eps=1e-5):
    up = trilinear_upsample_x2(x)
    y = jax.lax.conv_general_dilated(
        up, conv_w, window_strides=(1, 1, 1),
        padding=((1, 1), (1, 1), (1, 1)),
        dimension_numbers=("NCDHW", "OIDHW", "NCDHW"),
        precision=jax.lax.Precision.HIGHEST,
    ) + conv_b[None, :, None, None, None]
    mean = jnp.mean(y, axis=(0, 2, 3, 4), keepdims=True)
    var = jnp.mean((y - mean) ** 2, axis=(0, 2, 3, 4), keepdims=True)
    yn = (y - mean) / jnp.sqrt(var + eps)
    yn = yn * gamma[None, :, None, None, None] + beta[None, :, None, None, None]
    return jnp.maximum(yn, 0.0)


if __name__ == "__main__":
    # small shapes consistent with the module: NCDHW input
    N, C_IN, C_OUT = 2, 4, 8
    D = H = W = 8

    key = jax.random.PRNGKey(0)
    kx, kw, kb = jax.random.split(key, 3)
    x = jax.random.normal(kx, (N, C_IN, D, H, W), dtype=jnp.float32)
    conv_w = jax.random.normal(kw, (C_OUT, C_IN, 3, 3, 3), dtype=jnp.float32) * 0.1
    conv_b = jax.random.normal(kb, (C_OUT,), dtype=jnp.float32) * 0.1
    gamma = jnp.ones((C_OUT,), jnp.float32)   # PyTorch BatchNorm3d default weight
    beta = jnp.zeros((C_OUT,), jnp.float32)   # PyTorch BatchNorm3d default bias

    fwd = jax.jit(functools.partial(up_conv_forward, eps=1e-5))
    out = jax.block_until_ready(fwd(x, conv_w, conv_b, gamma, beta))
    assert out.shape == (N, C_OUT, 2 * D, 2 * H, 2 * W), out.shape

    ref = jax.block_until_ready(up_conv_reference(x, conv_w, conv_b, gamma, beta))
    np.testing.assert_allclose(np.asarray(out), np.asarray(ref), rtol=2e-3, atol=2e-3)

    print("KERNEL_OK")
</pallas_src>

<mosaic_0001>
module attributes {stable_mosaic.version = 11 : i64} {
  func.func private @main(%arg0: i32) attributes {dimension_semantics = [#tpu.dimension_semantics<core_parallel>], iteration_bounds = array<i64: 2>, tpu.core_type = #tpu.core_type<sc_scalar_subcore>, window_params = []} {
    return
  }
}

module attributes {stable_mosaic.version = 11 : i64} {
  func.func private @main(%arg0: i32) attributes {dimension_semantics = [#tpu.dimension_semantics<core_parallel>], iteration_bounds = array<i64: 2>, tpu.core_type = #tpu.core_type<sc_scalar_subcore>, window_params = []} {
    return
  }
}

module attributes {stable_mosaic.version = 11 : i64} {
  func.func @kernel(%arg0: i32, %arg1: i32, %arg2: memref<1x1x4x324xf32, #tpu.memory_space<vmem>>, %arg3: memref<1x1x4x324xf32, #tpu.memory_space<vmem>>, %arg4: memref<1x1x4x324xf32, #tpu.memory_space<vmem>>, %arg5: memref<27x8x4xf32, #tpu.memory_space<vmem>>, %arg6: memref<1x324xf32, #tpu.memory_space<vmem>>, %arg7: memref<1x1x8x324xf32, #tpu.memory_space<vmem>>, %arg8: memref<1x1x8x2xf32, #tpu.memory_space<vmem>>) attributes {dimension_semantics = [#tpu.dimension_semantics<parallel>, #tpu.dimension_semantics<parallel>], iteration_bounds = array<i64: 2, 16>, scalar_prefetch = 0 : i64, scratch_operands = 0 : i64, tpu.core_type = #tpu.core_type<tc>, window_params = [{transform_indices = @transform_0, window_bounds = array<i64: 1, 1, 4, 324>}, {transform_indices = @transform_1, window_bounds = array<i64: 1, 1, 4, 324>}, {transform_indices = @transform_2, window_bounds = array<i64: 1, 1, 4, 324>}, {pipeline_mode = #tpu.pipeline_mode<synchronous>, transform_indices = @transform_3, window_bounds = array<i64: 27, 8, 4>}, {pipeline_mode = #tpu.pipeline_mode<synchronous>, transform_indices = @transform_4, window_bounds = array<i64: 1, 324>}, {transform_indices = @transform_5, window_bounds = array<i64: 1, 1, 8, 324>}, {transform_indices = @transform_6, window_bounds = array<i64: 1, 1, 8, 2>}]} {
    %c0 = arith.constant 0 : index
    %c0_0 = arith.constant 0 : index
    %c0_1 = arith.constant 0 : index
    %0 = vector.load %arg5[%c0, %c0_0, %c0_1] : memref<27x8x4xf32, #tpu.memory_space<vmem>>, vector<27x8x4xf32>
    %c0_2 = arith.constant 0 : index
    %c0_3 = arith.constant 0 : index
    %c0_4 = arith.constant 0 : index
    %c0_5 = arith.constant 0 : index
    %1 = vector.load %arg2[%c0_2, %c0_3, %c0_4, %c0_5] : memref<1x1x4x324xf32, #tpu.memory_space<vmem>>, vector<1x1x4x324xf32>
    %2 = vector.shape_cast %1 : vector<1x1x4x324xf32> to vector<4x324xf32>
    %c0_6 = arith.constant 0 : index
    %c0_7 = arith.constant 0 : index
    %c0_8 = arith.constant 0 : index
    %c0_9 = arith.constant 0 : index
    %3 = vector.load %arg3[%c0_6, %c0_7, %c0_8, %c0_9] : memref<1x1x4x324xf32, #tpu.memory_space<vmem>>, vector<1x1x4x324xf32>
    %4 = vector.shape_cast %3 : vector<1x1x4x324xf32> to vector<4x324xf32>
    %c0_10 = arith.constant 0 : index
    %c0_11 = arith.constant 0 : index
    %c0_12 = arith.constant 0 : index
    %c0_13 = arith.constant 0 : index
    %5 = vector.load %arg4[%c0_10, %c0_11, %c0_12, %c0_13] : memref<1x1x4x324xf32, #tpu.memory_space<vmem>>, vector<1x1x4x324xf32>
    %6 = vector.shape_cast %5 : vector<1x1x4x324xf32> to vector<4x324xf32>
    %cst = arith.constant 0.000000e+00 : f32
    %7 = vector.broadcast %cst : f32 to vector<8x324xf32>
    %8 = vector.extract_strided_slice %2 {offsets = [0, 305], sizes = [4, 19], strides = [1, 1]} : vector<4x324xf32> to vector<4x19xf32>
    %9 = vector.extract_strided_slice %2 {offsets = [0, 0], sizes = [4, 305], strides = [1, 1]} : vector<4x324xf32> to vector<4x305xf32>
    %10 = tpu.concatenate %8, %9 in 1 : vector<4x19xf32>, vector<4x305xf32> -> vector<4x324xf32>
    %11 = vector.extract_strided_slice %0 {offsets = [0, 0, 0], sizes = [1, 8, 4], strides = [1, 1, 1]} : vector<27x8x4xf32> to vector<1x8x4xf32>
    %12 = vector.shape_cast %11 : vector<1x8x4xf32> to vector<8x4xf32>
    %cst_14 = arith.constant dense<0.000000e+00> : vector<8x324xf32>
    %13 = tpu.matmul %12, %10, %cst_14 {dimension_numbers = #tpu.dot_dimension_numbers<[1], [0], [0], [1], [0, 0, 1, 1], [], []>, precision = #tpu.contract_precision<fp32>} : vector<8x4xf32>, vector<4x324xf32>, vector<8x324xf32> -> vector<8x324xf32>
    %14 = arith.addf %7, %13 : vector<8x324xf32>
    %15 = vector.extract_strided_slice %2 {offsets = [0, 306], sizes = [4, 18], strides = [1, 1]} : vector<4x324xf32> to vector<4x18xf32>
    %16 = vector.extract_strided_slice %2 {offsets = [0, 0], sizes = [4, 306], strides = [1, 1]} : vector<4x324xf32> to vector<4x306xf32>
    %17 = tpu.concatenate %15, %16 in 1 : vector<4x18xf32>, vector<4x306xf32> -> vector<4x324xf32>
    %18 = vector.extract_strided_slice %0 {offsets = [1, 0, 0], sizes = [1, 8, 4], strides = [1, 1, 1]} : vector<27x8x4xf32> to vector<1x8x4xf32>
    %19 = vector.shape_cast %18 : vector<1x8x4xf32> to vector<8x4xf32>
    %cst_15 = arith.constant dense<0.000000e+00> : vector<8x324xf32>
    %20 = tpu.matmul %19, %17, %cst_15 {dimension_numbers = #tpu.dot_dimension_numbers<[1], [0], [0], [1], [0, 0, 1, 1], [], []>, precision = #tpu.contract_precision<fp32>} : vector<8x4xf32>, vector<4x324xf32>, vector<8x324xf32> -> vector<8x324xf32>
    %21 = arith.addf %14, %20 : vector<8x324xf32>
    %22 = vector.extract_strided_slice %2 {offsets = [0, 307], sizes = [4, 17], strides = [1, 1]} : vector<4x324xf32> to vector<4x17xf32>
    %23 = vector.extract_strided_slice %2 {offsets = [0, 0], sizes = [4, 307], strides = [1, 1]} : vector<4x324xf32> to vector<4x307xf32>
    %24 = tpu.concatenate %22, %23 in 1 : vector<4x17xf32>, vector<4x307xf32> -> vector<4x324xf32>
    %25 = vector.extract_strided_slice %0 {offsets = [2, 0, 0], sizes = [1, 8, 4], strides = [1, 1, 1]} : vector<27x8x4xf32> to vector<1x8x4xf32>
    %26 = vector.shape_cast %25 : vector<1x8x4xf32> to vector<8x4xf32>
    %cst_16 = arith.constant dense<0.000000e+00> : vector<8x324xf32>
    %27 = tpu.matmul %26, %24, %cst_16 {dimension_numbers = #tpu.dot_dimension_numbers<[1], [0], [0], [1], [0, 0, 1, 1], [], []>, precision = #tpu.contract_precision<fp32>} : vector<8x4xf32>, vector<4x324xf32>, vector<8x324xf32> -> vector<8x324xf32>
    %28 = arith.addf %21, %27 : vector<8x324xf32>
    %29 = vector.extract_strided_slice %2 {offsets = [0, 323], sizes = [4, 1], strides = [1, 1]} : vector<4x324xf32> to vector<4x1xf32>
    %30 = vector.extract_strided_slice %2 {offsets = [0, 0], sizes = [4, 323], strides = [1, 1]} : vector<4x324xf32> to vector<4x323xf32>
    %31 = tpu.concatenate %29, %30 in 1 : vector<4x1xf32>, vector<4x323xf32> -> vector<4x324xf32>
    %32 = vector.extract_strided_slice %0 {offsets = [3, 0, 0], sizes = [1, 8, 4], strides = [1, 1, 1]} : vector<27x8x4xf32> to vector<1x8x4xf32>
    %33 = vector.shape_cast %32 : vector<1x8x4xf32> to vector<8x4xf32>
    %cst_17 = arith.constant dense<0.000000e+00> : vector<8x324xf32>
    %34 = tpu.matmul %33, %31, %cst_17 {dimension_numbers = #tpu.dot_dimension_numbers<[1], [0], [0], [1], [0, 0, 1, 1], [], []>, precision = #tpu.contract_precision<fp32>} : vector<8x4xf32>, vector<4x324xf32>, vector<8x324xf32> -> vector<8x324xf32>
    %35 = arith.addf %28, %34 : vector<8x324xf32>
    %36 = vector.extract_strided_slice %0 {offsets = [4, 0, 0], sizes = [1, 8, 4], strides = [1, 1, 1]} : vector<27x8x4xf32> to vector<1x8x4xf32>
    %37 = vector.shape_cast %36 : vector<1x8x4xf32> to vector<8x4xf32>
    %cst_18 = arith.constant dense<0.000000e+00> : vector<8x324xf32>
    %38 = tpu.matmul %37, %2, %cst_18 {dimension_numbers = #tpu.dot_dimension_numbers<[1], [0], [0], [1], [0, 0, 1, 1], [], []>, precision = #tpu.contract_precision<fp32>} : vector<8x4xf32>, vector<4x324xf32>, vector<8x324xf32> -> vector<8x324xf32>
    %39 = arith.addf %35, %38 : vector<8x324xf32>
    %40 = vector.extract_strided_slice %2 {offsets = [0, 1], sizes = [4, 323], strides = [1, 1]} : vector<4x324xf32> to vector<4x323xf32>
    %41 = vector.extract_strided_slice %2 {offsets = [0, 0], sizes = [4, 1], strides = [1, 1]} : vector<4x324xf32> to vector<4x1xf32>
    %42 = tpu.concatenate %40, %41 in 1 : vector<4x323xf32>, vector<4x1xf32> -> vector<4x324xf32>
    %43 = vector.extract_strided_slice %0 {offsets = [5, 0, 0], sizes = [1, 8, 4], strides = [1, 1, 1]} : vector<27x8x4xf32> to vector<1x8x4xf32>
    %44 = vector.shape_cast %43 : vector<1x8x4xf32> to vector<8x4xf32>
    %cst_19 = arith.constant dense<0.000000e+00> : vector<8x324xf32>
    %45 = tpu.matmul %44, %42, %cst_19 {dimension_numbers = #tpu.dot_dimension_numbers<[1], [0], [0], [1], [0, 0, 1, 1], [], []>, precision = #tpu.contract_precision<fp32>} : vector<8x4xf32>, vector<4x324xf32>, vector<8x324xf32> -> vector<8x324xf32>
    %46 = arith.addf %39, %45 : vector<8x324xf32>
    %47 = vector.extract_strided_slice %2 {offsets = [0, 17], sizes = [4, 307], strides = [1, 1]} : vector<4x324xf32> to vector<4x307xf32>
    %48 = vector.extract_strided_slice %2 {offsets = [0, 0], sizes = [4, 17], strides = [1, 1]} : vector<4x324xf32> to vector<4x17xf32>
    %49 = tpu.concatenate %47, %48 in 1 : vector<4x307xf32>, vector<4x17xf32> -> vector<4x324xf32>
    %50 = vector.extract_strided_slice %0 {offsets = [6, 0, 0], sizes = [1, 8, 4], strides = [1, 1, 1]} : vector<27x8x4xf32> to vector<1x8x4xf32>
    %51 = vector.shape_cast %50 : vector<1x8x4xf32> to vector<8x4xf32>
    %cst_20 = arith.constant dense<0.000000e+00> : vector<8x324xf32>
    %52 = tpu.matmul %51, %49, %cst_20 {dimension_numbers = #tpu.dot_dimension_numbers<[1], [0], [0], [1], [0, 0, 1, 1], [], []>, precision = #tpu.contract_precision<fp32>} : vector<8x4xf32>, vector<4x324xf32>, vector<8x324xf32> -> vector<8x324xf32>
    %53 = arith.addf %46, %52 : vector<8x324xf32>
    %54 = vector.extract_strided_slice %2 {offsets = [0, 18], sizes = [4, 306], strides = [1, 1]} : vector<4x324xf32> to vector<4x306xf32>
    %55 = vector.extract_strided_slice %2 {offsets = [0, 0], sizes = [4, 18], strides = [1, 1]} : vector<4x324xf32> to vector<4x18xf32>
    %56 = tpu.concatenate %54, %55 in 1 : vector<4x306xf32>, vector<4x18xf32> -> vector<4x324xf32>
    %57 = vector.extract_strided_slice %0 {offsets = [7, 0, 0], sizes = [1, 8, 4], strides = [1, 1, 1]} : vector<27x8x4xf32> to vector<1x8x4xf32>
    %58 = vector.shape_cast %57 : vector<1x8x4xf32> to vector<8x4xf32>
    %cst_21 = arith.constant dense<0.000000e+00> : vector<8x324xf32>
    %59 = tpu.matmul %58, %56, %cst_21 {dimension_numbers = #tpu.dot_dimension_numbers<[1], [0], [0], [1], [0, 0, 1, 1], [], []>, precision = #tpu.contract_precision<fp32>} : vector<8x4xf32>, vector<4x324xf32>, vector<8x324xf32> -> vector<8x324xf32>
    %60 = arith.addf %53, %59 : vector<8x324xf32>
    %61 = vector.extract_strided_slice %2 {offsets = [0, 19], sizes = [4, 305], strides = [1, 1]} : vector<4x324xf32> to vector<4x305xf32>
    %62 = vector.extract_strided_slice %2 {offsets = [0, 0], sizes = [4, 19], strides = [1, 1]} : vector<4x324xf32> to vector<4x19xf32>
    %63 = tpu.concatenate %61, %62 in 1 : vector<4x305xf32>, vector<4x19xf32> -> vector<4x324xf32>
    %64 = vector.extract_strided_slice %0 {offsets = [8, 0, 0], sizes = [1, 8, 4], strides = [1, 1, 1]} : vector<27x8x4xf32> to vector<1x8x4xf32>
    %65 = vector.shape_cast %64 : vector<1x8x4xf32> to vector<8x4xf32>
    %cst_22 = arith.constant dense<0.000000e+00> : vector<8x324xf32>
    %66 = tpu.matmul %65, %63, %cst_22 {dimension_numbers = #tpu.dot_dimension_numbers<[1], [0], [0], [1], [0, 0, 1, 1], [], []>, precision = #tpu.contract_precision<fp32>} : vector<8x4xf32>, vector<4x324xf32>, vector<8x324xf32> -> vector<8x324xf32>
    %67 = arith.addf %60, %66 : vector<8x324xf32>
    %68 = vector.extract_strided_slice %4 {offsets = [0, 305], sizes = [4, 19], strides = [1, 1]} : vector<4x324xf32> to vector<4x19xf32>
    %69 = vector.extract_strided_slice %4 {offsets = [0, 0], sizes = [4, 305], strides = [1, 1]} : vector<4x324xf32> to vector<4x305xf32>
    %70 = tpu.concatenate %68, %69 in 1 : vector<4x19xf32>, vector<4x305xf32> -> vector<4x324xf32>
    %71 = vector.extract_strided_slice %0 {offsets = [9, 0, 0], sizes = [1, 8, 4], strides = [1, 1, 1]} : vector<27x8x4xf32> to vector<1x8x4xf32>
    %72 = vector.shape_cast %71 : vector<1x8x4xf32> to vector<8x4xf32>
    %cst_23 = arith.constant dense<0.000000e+00> : vector<8x324xf32>
    %73 = tpu.matmul %72, %70, %cst_23 {dimension_numbers = #tpu.dot_dimension_numbers<[1], [0], [0], [1], [0, 0, 1, 1], [], []>, precision = #tpu.contract_precision<fp32>} : vector<8x4xf32>, vector<4x324xf32>, vector<8x324xf32> -> vector<8x324xf32>
    %74 = arith.addf %67, %73 : vector<8x324xf32>
    %75 = vector.extract_strided_slice %4 {offsets = [0, 306], sizes = [4, 18], strides = [1, 1]} : vector<4x324xf32> to vector<4x18xf32>
    %76 = vector.extract_strided_slice %4 {offsets = [0, 0], sizes = [4, 306], strides = [1, 1]} : vector<4x324xf32> to vector<4x306xf32>
    %77 = tpu.concatenate %75, %76 in 1 : vector<4x18xf32>, vector<4x306xf32> -> vector<4x324xf32>
    %78 = vector.extract_strided_slice %0 {offsets = [10, 0, 0], sizes = [1, 8, 4], strides = [1, 1, 1]} : vector<27x8x4xf32> to vector<1x8x4xf32>
    %79 = vector.shape_cast %78 : vector<1x8x4xf32> to vector<8x4xf32>
    %cst_24 = arith.constant dense<0.000000e+00> : vector<8x324xf32>
    %80 = tpu.matmul %79, %77, %cst_24 {dimension_numbers = #tpu.dot_dimension_numbers<[1], [0], [0], [1], [0, 0, 1, 1], [], []>, precision = #tpu.contract_precision<fp32>} : vector<8x4xf32>, vector<4x324xf32>, vector<8x324xf32> -> vector<8x324xf32>
    %81 = arith.addf %74, %80 : vector<8x324xf32>
    %82 = vector.extract_strided_slice %4 {offsets = [0, 307], sizes = [4, 17], strides = [1, 1]} : vector<4x324xf32> to vector<4x17xf32>
    %83 = vector.extract_strided_slice %4 {offsets = [0, 0], sizes = [4, 307], strides = [1, 1]} : vector<4x324xf32> to vector<4x307xf32>
    %84 = tpu.concatenate %82, %83 in 1 : vector<4x17xf32>, vector<4x307xf32> -> vector<4x324xf32>
    %85 = vector.extract_strided_slice %0 {offsets = [11, 0, 0], sizes = [1, 8, 4], strides = [1, 1, 1]} : vector<27x8x4xf32> to vector<1x8x4xf32>
    %86 = vector.shape_cast %85 : vector<1x8x4xf32> to vector<8x4xf32>
    %cst_25 = arith.constant dense<0.000000e+00> : vector<8x324xf32>
    %87 = tpu.matmul %86, %84, %cst_25 {dimension_numbers = #tpu.dot_dimension_numbers<[1], [0], [0], [1], [0, 0, 1, 1], [], []>, precision = #tpu.contract_precision<fp32>} : vector<8x4xf32>, vector<4x324xf32>, vector<8x324xf32> -> vector<8x324xf32>
    %88 = arith.addf %81, %87 : vector<8x324xf32>
    %89 = vector.extract_strided_slice %4 {offsets = [0, 323], sizes = [4, 1], strides = [1, 1]} : vector<4x324xf32> to vector<4x1xf32>
    %90 = vector.extract_strided_slice %4 {offsets = [0, 0], sizes = [4, 323], strides = [1, 1]} : vector<4x324xf32> to vector<4x323xf32>
    %91 = tpu.concatenate %89, %90 in 1 : vector<4x1xf32>, vector<4x323xf32> -> vector<4x324xf32>
    %92 = vector.extract_strided_slice %0 {offsets = [12, 0, 0], sizes = [1, 8, 4], strides = [1, 1, 1]} : vector<27x8x4xf32> to vector<1x8x4xf32>
    %93 = vector.shape_cast %92 : vector<1x8x4xf32> to vector<8x4xf32>
    %cst_26 = arith.constant dense<0.000000e+00> : vector<8x324xf32>
    %94 = tpu.matmul %93, %91, %cst_26 {dimension_numbers = #tpu.dot_dimension_numbers<[1], [0], [0], [1], [0, 0, 1, 1], [], []>, precision = #tpu.contract_precision<fp32>} : vector<8x4xf32>, vector<4x324xf32>, vector<8x324xf32> -> vector<8x324xf32>
    %95 = arith.addf %88, %94 : vector<8x324xf32>
    %96 = vector.extract_strided_slice %0 {offsets = [13, 0, 0], sizes = [1, 8, 4], strides = [1, 1, 1]} : vector<27x8x4xf32> to vector<1x8x4xf32>
    %97 = vector.shape_cast %96 : vector<1x8x4xf32> to vector<8x4xf32>
    %cst_27 = arith.constant dense<0.000000e+00> : vector<8x324xf32>
    %98 = tpu.matmul %97, %4, %cst_27 {dimension_numbers = #tpu.dot_dimension_numbers<[1], [0], [0], [1], [0, 0, 1, 1], [], []>, precision = #tpu.contract_precision<fp32>} : vector<8x4xf32>, vector<4x324xf32>, vector<8x324xf32> -> vector<8x324xf32>
    %99 = arith.addf %95, %98 : vector<8x324xf32>
    %100 = vector.extract_strided_slice %4 {offsets = [0, 1], sizes = [4, 323], strides = [1, 1]} : vector<4x324xf32> to vector<4x323xf32>
    %101 = vector.extract_strided_slice %4 {offsets = [0, 0], sizes = [4, 1], strides = [1, 1]} : vector<4x324xf32> to vector<4x1xf32>
    %102 = tpu.concatenate %100, %101 in 1 : vector<4x323xf32>, vector<4x1xf32> -> vector<4x324xf32>
    %103 = vector.extract_strided_slice %0 {offsets = [14, 0, 0], sizes = [1, 8, 4], strides = [1, 1, 1]} : vector<27x8x4xf32> to vector<1x8x4xf32>
    %104 = vector.shape_cast %103 : vector<1x8x4xf32> to vector<8x4xf32>
    %cst_28 = arith.constant dense<0.000000e+00> : vector<8x324xf32>
    %105 = tpu.matmul %104, %102, %cst_28 {dimension_numbers = #tpu.dot_dimension_numbers<[1], [0], [0], [1], [0, 0, 1, 1], [], []>, precision = #tpu.contract_precision<fp32>} : vector<8x4xf32>, vector<4x324xf32>, vector<8x324xf32> -> vector<8x324xf32>
    %106 = arith.addf %99, %105 : vector<8x324xf32>
    %107 = vector.extract_strided_slice %4 {offsets = [0, 17], sizes = [4, 307], strides = [1, 1]} : vector<4x324xf32> to vector<4x307xf32>
    %108 = vector.extract_strided_slice %4 {offsets = [0, 0], sizes = [4, 17], strides = [1, 1]} : vector<4x324xf32> to vector<4x17xf32>
    %109 = tpu.concatenate %107, %108 in 1 : vector<4x307xf32>, vector<4x17xf32> -> vector<4x324xf32>
    %110 = vector.extract_strided_slice %0 {offsets = [15, 0, 0], sizes = [1, 8, 4], strides = [1, 1, 1]} : vector<27x8x4xf32> to vector<1x8x4xf32>
    %111 = vector.shape_cast %110 : vector<1x8x4xf32> to vector<8x4xf32>
    %cst_29 = arith.constant dense<0.000000e+00> : vector<8x324xf32>
    %112 = tpu.matmul %111, %109, %cst_29 {dimension_numbers = #tpu.dot_dimension_numbers<[1], [0], [0], [1], [0, 0, 1, 1], [], []>, precision = #tpu.contract_precision<fp32>} : vector<8x4xf32>, vector<4x324xf32>, vector<8x324xf32> -> vector<8x324xf32>
    %113 = arith.addf %106, %112 : vector<8x324xf32>
    %114 = vector.extract_strided_slice %4 {offsets = [0, 18], sizes = [4, 306], strides = [1, 1]} : vector<4x324xf32> to vector<4x306xf32>
    %115 = vector.extract_strided_slice %4 {offsets = [0, 0], sizes = [4, 18], strides = [1, 1]} : vector<4x324xf32> to vector<4x18xf32>
    %116 = tpu.concatenate %114, %115 in 1 : vector<4x306xf32>, vector<4x18xf32> -> vector<4x324xf32>
    %117 = vector.extract_strided_slice %0 {offsets = [16, 0, 0], sizes = [1, 8, 4], strides = [1, 1, 1]} : vector<27x8x4xf32> to vector<1x8x4xf32>
    %118 = vector.shape_cast %117 : vector<1x8x4xf32> to vector<8x4xf32>
    %cst_30 = arith.constant dense<0.000000e+00> : vector<8x324xf32>
    %119 = tpu.matmul %118, %116, %cst_30 {dimension_numbers = #tpu.dot_dimension_numbers<[1], [0], [0], [1], [0, 0, 1, 1], [], []>, precision = #tpu.contract_precision<fp32>} : vector<8x4xf32>, vector<4x324xf32>, vector<8x324xf32> -> vector<8x324xf32>
    %120 = arith.addf %113, %119 : vector<8x324xf32>
    %121 = vector.extract_strided_slice %4 {offsets = [0, 19], sizes = [4, 305], strides = [1, 1]} : vector<4x324xf32> to vector<4x305xf32>
    %122 = vector.extract_strided_slice %4 {offsets = [0, 0], sizes = [4, 19], strides = [1, 1]} : vector<4x324xf32> to vector<4x19xf32>
    %123 = tpu.concatenate %121, %122 in 1 : vector<4x305xf32>, vector<4x19xf32> -> vector<4x324xf32>
    %124 = vector.extract_strided_slice %0 {offsets = [17, 0, 0], sizes = [1, 8, 4], strides = [1, 1, 1]} : vector<27x8x4xf32> to vector<1x8x4xf32>
    %125 = vector.shape_cast %124 : vector<1x8x4xf32> to vector<8x4xf32>
    %cst_31 = arith.constant dense<0.000000e+00> : vector<8x324xf32>
    %126 = tpu.matmul %125, %123, %cst_31 {dimension_numbers = #tpu.dot_dimension_numbers<[1], [0], [0], [1], [0, 0, 1, 1], [], []>, precision = #tpu.contract_precision<fp32>} : vector<8x4xf32>, vector<4x324xf32>, vector<8x324xf32> -> vector<8x324xf32>
    %127 = arith.addf %120, %126 : vector<8x324xf32>
    %128 = vector.extract_strided_slice %6 {offsets = [0, 305], sizes = [4, 19], strides = [1, 1]} : vector<4x324xf32> to vector<4x19xf32>
    %129 = vector.extract_strided_slice %6 {offsets = [0, 0], sizes = [4, 305], strides = [1, 1]} : vector<4x324xf32> to vector<4x305xf32>
    %130 = tpu.concatenate %128, %129 in 1 : vector<4x19xf32>, vector<4x305xf32> -> vector<4x324xf32>
    %131 = vector.extract_strided_slice %0 {offsets = [18, 0, 0], sizes = [1, 8, 4], strides = [1, 1, 1]} : vector<27x8x4xf32> to vector<1x8x4xf32>
    %132 = vector.shape_cast %131 : vector<1x8x4xf32> to vector<8x4xf32>
    %cst_32 = arith.constant dense<0.000000e+00> : vector<8x324xf32>
    %133 = tpu.matmul %132, %130, %cst_32 {dimension_numbers = #tpu.dot_dimension_numbers<[1], [0], [0], [1], [0, 0, 1, 1], [], []>, precision = #tpu.contract_precision<fp32>} : vector<8x4xf32>, vector<4x324xf32>, vector<8x324xf32> -> vector<8x324xf32>
    %134 = arith.addf %127, %133 : vector<8x324xf32>
    %135 = vector.extract_strided_slice %6 {offsets = [0, 306], sizes = [4, 18], strides = [1, 1]} : vector<4x324xf32> to vector<4x18xf32>
    %136 = vector.extract_strided_slice %6 {offsets = [0, 0], sizes = [4, 306], strides = [1, 1]} : vector<4x324xf32> to vector<4x306xf32>
    %137 = tpu.concatenate %135, %136 in 1 : vector<4x18xf32>, vector<4x306xf32> -> vector<4x324xf32>
    %138 = vector.extract_strided_slice %0 {offsets = [19, 0, 0], sizes = [1, 8, 4], strides = [1, 1, 1]} : vector<27x8x4xf32> to vector<1x8x4xf32>
    %139 = vector.shape_cast %138 : vector<1x8x4xf32> to vector<8x4xf32>
    %cst_33 = arith.constant dense<0.000000e+00> : vector<8x324xf32>
    %140 = tpu.matmul %139, %137, %cst_33 {dimension_numbers = #tpu.dot_dimension_numbers<[1], [0], [0], [1], [0, 0, 1, 1], [], []>, precision = #tpu.contract_precision<fp32>} : vector<8x4xf32>, vector<4x324xf32>, vector<8x324xf32> -> vector<8x324xf32>
    %141 = arith.addf %134, %140 : vector<8x324xf32>
    %142 = vector.extract_strided_slice %6 {offsets = [0, 307], sizes = [4, 17], strides = [1, 1]} : vector<4x324xf32> to vector<4x17xf32>
    %143 = vector.extract_strided_slice %6 {offsets = [0, 0], sizes = [4, 307], strides = [1, 1]} : vector<4x324xf32> to vector<4x307xf32>
    %144 = tpu.concatenate %142, %143 in 1 : vector<4x17xf32>, vector<4x307xf32> -> vector<4x324xf32>
    %145 = vector.extract_strided_slice %0 {offsets = [20, 0, 0], sizes = [1, 8, 4], strides = [1, 1, 1]} : vector<27x8x4xf32> to vector<1x8x4xf32>
    %146 = vector.shape_cast %145 : vector<1x8x4xf32> to vector<8x4xf32>
    %cst_34 = arith.constant dense<0.000000e+00> : vector<8x324xf32>
    %147 = tpu.matmul %146, %144, %cst_34 {dimension_numbers = #tpu.dot_dimension_numbers<[1], [0], [0], [1], [0, 0, 1, 1], [], []>, precision = #tpu.contract_precision<fp32>} : vector<8x4xf32>, vector<4x324xf32>, vector<8x324xf32> -> vector<8x324xf32>
    %148 = arith.addf %141, %147 : vector<8x324xf32>
    %149 = vector.extract_strided_slice %6 {offsets = [0, 323], sizes = [4, 1], strides = [1, 1]} : vector<4x324xf32> to vector<4x1xf32>
    %150 = vector.extract_strided_slice %6 {offsets = [0, 0], sizes = [4, 323], strides = [1, 1]} : vector<4x324xf32> to vector<4x323xf32>
    %151 = tpu.concatenate %149, %150 in 1 : vector<4x1xf32>, vector<4x323xf32> -> vector<4x324xf32>
    %152 = vector.extract_strided_slice %0 {offsets = [21, 0, 0], sizes = [1, 8, 4], strides = [1, 1, 1]} : vector<27x8x4xf32> to vector<1x8x4xf32>
    %153 = vector.shape_cast %152 : vector<1x8x4xf32> to vector<8x4xf32>
    %cst_35 = arith.constant dense<0.000000e+00> : vector<8x324xf32>
    %154 = tpu.matmul %153, %151, %cst_35 {dimension_numbers = #tpu.dot_dimension_numbers<[1], [0], [0], [1], [0, 0, 1, 1], [], []>, precision = #tpu.contract_precision<fp32>} : vector<8x4xf32>, vector<4x324xf32>, vector<8x324xf32> -> vector<8x324xf32>
    %155 = arith.addf %148, %154 : vector<8x324xf32>
    %156 = vector.extract_strided_slice %0 {offsets = [22, 0, 0], sizes = [1, 8, 4], strides = [1, 1, 1]} : vector<27x8x4xf32> to vector<1x8x4xf32>
    %157 = vector.shape_cast %156 : vector<1x8x4xf32> to vector<8x4xf32>
    %cst_36 = arith.constant dense<0.000000e+00> : vector<8x324xf32>
    %158 = tpu.matmul %157, %6, %cst_36 {dimension_numbers = #tpu.dot_dimension_numbers<[1], [0], [0], [1], [0, 0, 1, 1], [], []>, precision = #tpu.contract_precision<fp32>} : vector<8x4xf32>, vector<4x324xf32>, vector<8x324xf32> -> vector<8x324xf32>
    %159 = arith.addf %155, %158 : vector<8x324xf32>
    %160 = vector.extract_strided_slice %6 {offsets = [0, 1], sizes = [4, 323], strides = [1, 1]} : vector<4x324xf32> to vector<4x323xf32>
    %161 = vector.extract_strided_slice %6 {offsets = [0, 0], sizes = [4, 1], strides = [1, 1]} : vector<4x324xf32> to vector<4x1xf32>
    %162 = tpu.concatenate %160, %161 in 1 : vector<4x323xf32>, vector<4x1xf32> -> vector<4x324xf32>
    %163 = vector.extract_strided_slice %0 {offsets = [23, 0, 0], sizes = [1, 8, 4], strides = [1, 1, 1]} : vector<27x8x4xf32> to vector<1x8x4xf32>
    %164 = vector.shape_cast %163 : vector<1x8x4xf32> to vector<8x4xf32>
    %cst_37 = arith.constant dense<0.000000e+00> : vector<8x324xf32>
    %165 = tpu.matmul %164, %162, %cst_37 {dimension_numbers = #tpu.dot_dimension_numbers<[1], [0], [0], [1], [0, 0, 1, 1], [], []>, precision = #tpu.contract_precision<fp32>} : vector<8x4xf32>, vector<4x324xf32>, vector<8x324xf32> -> vector<8x324xf32>
    %166 = arith.addf %159, %165 : vector<8x324xf32>
    %167 = vector.extract_strided_slice %6 {offsets = [0, 17], sizes = [4, 307], strides = [1, 1]} : vector<4x324xf32> to vector<4x307xf32>
    %168 = vector.extract_strided_slice %6 {offsets = [0, 0], sizes = [4, 17], strides = [1, 1]} : vector<4x324xf32> to vector<4x17xf32>
    %169 = tpu.concatenate %167, %168 in 1 : vector<4x307xf32>, vector<4x17xf32> -> vector<4x324xf32>
    %170 = vector.extract_strided_slice %0 {offsets = [24, 0, 0], sizes = [1, 8, 4], strides = [1, 1, 1]} : vector<27x8x4xf32> to vector<1x8x4xf32>
    %171 = vector.shape_cast %170 : vector<1x8x4xf32> to vector<8x4xf32>
    %cst_38 = arith.constant dense<0.000000e+00> : vector<8x324xf32>
    %172 = tpu.matmul %171, %169, %cst_38 {dimension_numbers = #tpu.dot_dimension_numbers<[1], [0], [0], [1], [0, 0, 1, 1], [], []>, precision = #tpu.contract_precision<fp32>} : vector<8x4xf32>, vector<4x324xf32>, vector<8x324xf32> -> vector<8x324xf32>
    %173 = arith.addf %166, %172 : vector<8x324xf32>
    %174 = vector.extract_strided_slice %6 {offsets = [0, 18], sizes = [4, 306], strides = [1, 1]} : vector<4x324xf32> to vector<4x306xf32>
    %175 = vector.extract_strided_slice %6 {offsets = [0, 0], sizes = [4, 18], strides = [1, 1]} : vector<4x324xf32> to vector<4x18xf32>
    %176 = tpu.concatenate %174, %175 in 1 : vector<4x306xf32>, vector<4x18xf32> -> vector<4x324xf32>
    %177 = vector.extract_strided_slice %0 {offsets = [25, 0, 0], sizes = [1, 8, 4], strides = [1, 1, 1]} : vector<27x8x4xf32> to vector<1x8x4xf32>
    %178 = vector.shape_cast %177 : vector<1x8x4xf32> to vector<8x4xf32>
    %cst_39 = arith.constant dense<0.000000e+00> : vector<8x324xf32>
    %179 = tpu.matmul %178, %176, %cst_39 {dimension_numbers = #tpu.dot_dimension_numbers<[1], [0], [0], [1], [0, 0, 1, 1], [], []>, precision = #tpu.contract_precision<fp32>} : vector<8x4xf32>, vector<4x324xf32>, vector<8x324xf32> -> vector<8x324xf32>
    %180 = arith.addf %173, %179 : vector<8x324xf32>
    %181 = vector.extract_strided_slice %6 {offsets = [0, 19], sizes = [4, 305], strides = [1, 1]} : vector<4x324xf32> to vector<4x305xf32>
    %182 = vector.extract_strided_slice %6 {offsets = [0, 0], sizes = [4, 19], strides = [1, 1]} : vector<4x324xf32> to vector<4x19xf32>
    %183 = tpu.concatenate %181, %182 in 1 : vector<4x305xf32>, vector<4x19xf32> -> vector<4x324xf32>
    %184 = vector.extract_strided_slice %0 {offsets = [26, 0, 0], sizes = [1, 8, 4], strides = [1, 1, 1]} : vector<27x8x4xf32> to vector<1x8x4xf32>
    %185 = vector.shape_cast %184 : vector<1x8x4xf32> to vector<8x4xf32>
    %cst_40 = arith.constant dense<0.000000e+00> : vector<8x324xf32>
    %186 = tpu.matmul %185, %183, %cst_40 {dimension_numbers = #tpu.dot_dimension_numbers<[1], [0], [0], [1], [0, 0, 1, 1], [], []>, precision = #tpu.contract_precision<fp32>} : vector<8x4xf32>, vector<4x324xf32>, vector<8x324xf32> -> vector<8x324xf32>
    %187 = arith.addf %180, %186 : vector<8x324xf32>
    %188 = vector.shape_cast %187 : vector<8x324xf32> to vector<1x1x8x324xf32>
    %c0_41 = arith.constant 0 : index
    %c0_42 = arith.constant 0 : index
    %c0_43 = arith.constant 0 : index
    %c0_44 = arith.constant 0 : index
    %189 = vector.load %arg7[%c0_41, %c0_42, %c0_43, %c0_44] : memref<1x1x8x324xf32, #tpu.memory_space<vmem>>, vector<1x1x8x324xf32>
    tpu.vector_store %arg7[%c0_41, %c0_42, %c0_43, %c0_44], %188 {strides = array<i32>} : memref<1x1x8x324xf32, #tpu.memory_space<vmem>>, vector<1x1x8x324xf32>,
    %c0_45 = arith.constant 0 : index
    %c0_46 = arith.constant 0 : index
    %190 = vector.load %arg6[%c0_45, %c0_46] : memref<1x324xf32, #tpu.memory_space<vmem>>, vector<1x324xf32>
    %191 = vector.broadcast %190 : vector<1x324xf32> to vector<8x324xf32>
    %192 = arith.mulf %187, %191 : vector<8x324xf32>
    %cst_47 = arith.constant dense<0.000000e+00> : vector<8xf32>
    %193 = vector.multi_reduction <add>, %192, %cst_47 [1] : vector<8x324xf32> to vector<8xf32>
    %194 = vector.shape_cast %193 : vector<8xf32> to vector<8x1xf32>
    %195 = arith.mulf %192, %187 : vector<8x324xf32>
    %cst_48 = arith.constant dense<0.000000e+00> : vector<8xf32>
    %196 = vector.multi_reduction <add>, %195, %cst_48 [1] : vector<8x324xf32> to vector<8xf32>
    %197 = vector.shape_cast %196 : vector<8xf32> to vector<8x1xf32>
    %198 = tpu.concatenate %194, %197 in 1 : vector<8x1xf32>, vector<8x1xf32> -> vector<8x2xf32>
    %199 = vector.shape_cast %198 : vector<8x2xf32> to vector<1x1x8x2xf32>
    %c0_49 = arith.constant 0 : index
    %c0_50 = arith.constant 0 : index
    %c0_51 = arith.constant 0 : index
    %c0_52 = arith.constant 0 : index
    %200 = vector.load %arg8[%c0_49, %c0_50, %c0_51, %c0_52] : memref<1x1x8x2xf32, #tpu.memory_space<vmem>>, vector<1x1x8x2xf32>
    tpu.vector_store %arg8[%c0_49, %c0_50, %c0_51, %c0_52], %199 {strides = array<i32>} : memref<1x1x8x2xf32, #tpu.memory_space<vmem>>, vector<1x1x8x2xf32>,
    return
  }
  func.func @transform_0(%arg0: i32, %arg1: i32) -> (i32, i32, i32, i32) {
    %c0_i32 = arith.constant 0 : i32
    %c0_i32_0 = arith.constant 0 : i32
    %c0_i32_1 = arith.constant 0 : i32
    return %arg0, %arg1, %c0_i32, %c0_i32_0 : i32, i32, i32, i32
  }
  func.func @transform_1(%arg0: i32, %arg1: i32) -> (i32, i32, i32, i32) {
    %c1_i32 = arith.constant 1 : i32
    %0 = arith.addi %arg1, %c1_i32 : i32
    %c0_i32 = arith.constant 0 : i32
    %c0_i32_0 = arith.constant 0 : i32
    %c0_i32_1 = arith.constant 0 : i32
    return %arg0, %0, %c0_i32, %c0_i32_0 : i32, i32, i32, i32
  }
  func.func @transform_2(%arg0: i32, %arg1: i32) -> (i32, i32, i32, i32) {
    %c2_i32 = arith.constant 2 : i32
    %0 = arith.addi %arg1, %c2_i32 : i32
    %c0_i32 = arith.constant 0 : i32
    %c0_i32_0 = arith.constant 0 : i32
    %c0_i32_1 = arith.constant 0 : i32
    return %arg0, %0, %c0_i32, %c0_i32_0 : i32, i32, i32, i32
  }
  func.func @transform_3(%arg0: i32, %arg1: i32) -> (i32, i32, i32) {
    %c0_i32 = arith.constant 0 : i32
    %c0_i32_0 = arith.constant 0 : i32
    %c0_i32_1 = arith.constant 0 : i32
    %c0_i32_2 = arith.constant 0 : i32
    return %c0_i32, %c0_i32_0, %c0_i32_1 : i32, i32, i32
  }
  func.func @transform_4(%arg0: i32, %arg1: i32) -> (i32, i32) {
    %c0_i32 = arith.constant 0 : i32
    %c0_i32_0 = arith.constant 0 : i32
    %c0_i32_1 = arith.constant 0 : i32
    return %c0_i32, %c0_i32_0 : i32, i32
  }
  func.func @transform_5(%arg0: i32, %arg1: i32) -> (i32, i32, i32, i32) {
    %c0_i32 = arith.constant 0 : i32
    %c0_i32_0 = arith.constant 0 : i32
    %c0_i32_1 = arith.constant 0 : i32
    return %arg0, %arg1, %c0_i32, %c0_i32_0 : i32, i32, i32, i32
  }
  func.func @transform_6(%arg0: i32, %arg1: i32) -> (i32, i32, i32, i32) {
    %c0_i32 = arith.constant 0 : i32
    %c0_i32_0 = arith.constant 0 : i32
    %c0_i32_1 = arith.constant 0 : i32
    return %arg0, %arg1, %c0_i32, %c0_i32_0 : i32, i32, i32, i32
  }
}

module attributes {stable_mosaic.version = 11 : i64} {
  func.func @kernel(%arg0: i32, %arg1: i32, %arg2: memref<1x1x8x18x18xf32, #tpu.memory_space<vmem>>, %arg3: memref<8x1xf32, #tpu.memory_space<vmem>>, %arg4: memref<8x1xf32, #tpu.memory_space<vmem>>, %arg5: memref<1x8x1x16x16xf32, #tpu.memory_space<vmem>>) attributes {dimension_semantics = [#tpu.dimension_semantics<parallel>, #tpu.dimension_semantics<parallel>], iteration_bounds = array<i64: 2, 16>, scalar_prefetch = 0 : i64, scratch_operands = 0 : i64, tpu.core_type = #tpu.core_type<tc>, window_params = [{transform_indices = @transform_0, window_bounds = array<i64: 1, 1, 8, 18, 18>}, {pipeline_mode = #tpu.pipeline_mode<synchronous>, transform_indices = @transform_1, window_bounds = array<i64: 8, 1>}, {pipeline_mode = #tpu.pipeline_mode<synchronous>, transform_indices = @transform_2, window_bounds = array<i64: 8, 1>}, {transform_indices = @transform_3, window_bounds = array<i64: 1, 8, 1, 16, 16>}]} {
    %c0 = arith.constant 0 : index
    %c0_0 = arith.constant 0 : index
    %c0_1 = arith.constant 0 : index
    %c0_2 = arith.constant 0 : index
    %c0_3 = arith.constant 0 : index
    %0 = vector.load %arg2[%c0, %c0_0, %c0_1, %c0_2, %c0_3] : memref<1x1x8x18x18xf32, #tpu.memory_space<vmem>>, vector<1x1x8x18x18xf32>
    %1 = vector.extract_strided_slice %0 {offsets = [0, 0, 0, 1, 1], sizes = [1, 1, 8, 16, 16], strides = [1, 1, 1, 1, 1]} : vector<1x1x8x18x18xf32> to vector<1x1x8x16x16xf32>
    %2 = vector.shape_cast %1 : vector<1x1x8x16x16xf32> to vector<8x16x16xf32>
    %c0_4 = arith.constant 0 : index
    %c0_5 = arith.constant 0 : index
    %3 = vector.load %arg3[%c0_4, %c0_5] : memref<8x1xf32, #tpu.memory_space<vmem>>, vector<8x1xf32>
    %4 = vector.shape_cast %3 : vector<8x1xf32> to vector<8x1x1xf32>
    %c0_6 = arith.constant 0 : index
    %c0_7 = arith.constant 0 : index
    %5 = vector.load %arg4[%c0_6, %c0_7] : memref<8x1xf32, #tpu.memory_space<vmem>>, vector<8x1xf32>
    %6 = vector.shape_cast %5 : vector<8x1xf32> to vector<8x1x1xf32>
    %7 = vector.broadcast %4 : vector<8x1x1xf32> to vector<8x16x16xf32>
    %8 = arith.mulf %2, %7 : vector<8x16x16xf32>
    %9 = vector.broadcast %6 : vector<8x1x1xf32> to vector<8x16x16xf32>
    %10 = arith.addf %8, %9 : vector<8x16x16xf32>
    %cst = arith.constant 0.000000e+00 : f32
    %11 = vector.broadcast %cst : f32 to vector<8x16x16xf32>
    %12 = arith.maximumf %10, %11 : vector<8x16x16xf32>
    %13 = vector.shape_cast %12 : vector<8x16x16xf32> to vector<1x8x1x16x16xf32>
    %c0_8 = arith.constant 0 : index
    %c0_9 = arith.constant 0 : index
    %c0_10 = arith.constant 0 : index
    %c0_11 = arith.constant 0 : index
    %c0_12 = arith.constant 0 : index
    %14 = vector.load %arg5[%c0_8, %c0_9, %c0_10, %c0_11, %c0_12] : memref<1x8x1x16x16xf32, #tpu.memory_space<vmem>>, vector<1x8x1x16x16xf32>
    tpu.vector_store %arg5[%c0_8, %c0_9, %c0_10, %c0_11, %c0_12], %13 {strides = array<i32>} : memref<1x8x1x16x16xf32, #tpu.memory_space<vmem>>, vector<1x8x1x16x16xf32>,
    return
  }
  func.func @transform_0(%arg0: i32, %arg1: i32) -> (i32, i32, i32, i32, i32) {
    %c0_i32 = arith.constant 0 : i32
    %c0_i32_0 = arith.constant 0 : i32
    %c0_i32_1 = arith.constant 0 : i32
    %c0_i32_2 = arith.constant 0 : i32
    return %arg0, %arg1, %c0_i32, %c0_i32_0, %c0_i32_1 : i32, i32, i32, i32, i32
  }
  func.func @transform_1(%arg0: i32, %arg1: i32) -> (i32, i32) {
    %c0_i32 = arith.constant 0 : i32
    %c0_i32_0 = arith.constant 0 : i32
    %c0_i32_1 = arith.constant 0 : i32
    return %c0_i32, %c0_i32_0 : i32, i32
  }
  func.func @transform_2(%arg0: i32, %arg1: i32) -> (i32, i32) {
    %c0_i32 = arith.constant 0 : i32
    %c0_i32_0 = arith.constant 0 : i32
    %c0_i32_1 = arith.constant 0 : i32
    return %c0_i32, %c0_i32_0 : i32, i32
  }
  func.func @transform_3(%arg0: i32, %arg1: i32) -> (i32, i32, i32, i32, i32) {
    %c0_i32 = arith.constant 0 : i32
    %c0_i32_0 = arith.constant 0 : i32
    %c0_i32_1 = arith.constant 0 : i32
    %c0_i32_2 = arith.constant 0 : i32
    return %arg0, %c0_i32, %arg1, %c0_i32_0, %c0_i32_1 : i32, i32, i32, i32, i32
  }
}

</mosaic_0001>

<bundles_post_ra>
// kernel: up_conv_forward.3
= control target key start
LH: loop header
LB: loop body
LE: loop exit
PB: predicated region body
PF: predicated region fallthrough
CT: control target
= control target key end

     0   :  { %8 = vsyncpa [#allocation3], 0  ;;  %s1241_s0 = inlined_call_operand.vmem [shape: f32[2,16,8,18,18], index: 0, kind: input, shape index: {}]   ;;  %s1242_s1 = inlined_call_operand.vmem [shape: f32[8,1], index: 1, kind: input, shape index: {}]   ;;  %s1243_s2 = inlined_call_operand.vmem [shape: f32[8,1], index: 2, kind: input, shape index: {}]   ;;  %s1244_s3 = inlined_call_operand.hbm [shape: f32[2,8,16,16,16], index: 3, kind: output, shape index: {}]  }
   0x1   :  { %10 = vsyncpa [#allocation3 + $0x1], 0  ;;  %s974_s12 = smov 0   ;;  %s976_s13 = smov 0  }
   0x2   :  { %s978_s14 = smov 0   ;;  %s980_s15 = smov 0  }
   0x3   :  { %s982_s16 = smov 0   ;;  %s984_s17 = smov 0  }
   0x4   :  { %s986_s18 = smov 0   ;;  %s988_s19 = smov 0  }
   0x5 LB: > { %s770_s20 = sadd.s32 4294967295, %s942_s19   ;;  %s771_s21 = sadd.s32 4294967294, %s942_s19   ;;  %s942_s19 = sphi %s988_s19, %s16_s19   ;;  %s938_s18 = sphi %s986_s18, %s1253_s18   ;;  %s934_s17 = sphi %s984_s17, %s1252_s17   ;;  %s930_s16 = sphi %s982_s16, %s1251_s16   ;;  %s926_s15 = sphi %s980_s15, %s1250_s15   ;;  %s922_s14 = sphi %s978_s14, %s1249_s14   ;;  %s918_s13 = sphi %s976_s13, %s1248_s13   ;;  %s914_s12 = sphi %s974_s12, %s1247_s12  }
   0x6   : > { %s25_s22 = sadd.s32 1, %s934_s17  ;;  %s28_s23 = sadd.s32 1, %s938_s18 }
   0x7   : > { %p26_p0 = scmp.ge.s32.totalorder %s25_s22, 16  ;;  %p117_p1 = scmp.ne.s32.totalorder %s922_s14, %s918_s13 }
   0x8   : > { %p118_p2 = scmp.eq.s32.totalorder %s770_s20, 31  ;;  %p123_p5 = scmp.ne.s32.totalorder %s918_s13, %s914_s12 }
   0x9   : > { %s1255_s22 = smov (%p26_p0, %s25_s22), 0  ;;  %s1257_s23 = smov (!%p26_p0, %s28_s23), %s938_s18 }
   0xa   : > { %s103_s24 = ssub.s32 %s934_s17, %s1255_s22  ;;  %p1025_p3 = por %p118_p2, %p117_p1 }
   0xb   : > { %p30_p4 = scmp.ge.s32.totalorder %s1257_s23, 2  ;;  %p124_p6 = scmp.eq.s32.totalorder %s771_s21, 31 }
   0xc   : > { %p774_p7 = scmp.ge.s32.totalorder %s942_s19, 1  ;;  %p160_p9 = scmp.lt.s32.totalorder %s942_s19, 33 }
   0xd   : > { %s1259_s23 = smov (%p30_p4, %s1257_s23), 0  ;;  %p1034_p8 = por %p124_p6, %p123_p5 }
   0xe   : > { %s102_s27 = ssub.s32 %s938_s18, %s1259_s23  ;;  %s107_s28 = sadd.s32 1, %s922_s14 }
   0xf   : > { %s104_s29 = sor.u32 %s103_s24, %s102_s27  ;;  %p161_p10 = pnand %p774_p7, %p160_p9 }
  0x10   : > { %p105_p11 = scmp.eq.s32.totalorder %s104_s29, 0  ;;  %p188_p12 = scmp.lt.s32.totalorder (!%p161_p10), %s930_s16, 1 }
  0x11   : > { %164 = sbr.rel (%p161_p10) target bundleno = 354 (0x162), region = 32  ;;  %p190_p13 = scmp.lt.s32.totalorder (!%p161_p10), %s926_s15, 15 }
  0x12   : > { %s1043_s30 = scalar_select %p105_p11, %s922_s14, %s107_s28  }
  0x13   : > { %s185_s24 = sand.u32 (!%p161_p10), 1, %s918_s13   ;;  %s946_s4 = smov (!%p161_p10), 127  }
  0x14   : > { %s775_s5 = sshll.u32 (!%p161_p10), %s185_s24, 7  ;;  %s647_s7 = scalar_lea.sflag (!%p161_p10), [#allocation3], %s185_s24 }
  0x15   : > { %s1141_s6 = scalar_lea.vmem (!%p161_p10), [#allocation2], %s775_s5 }
  0x16   : > { %v227_v0 = vlaneseq  ;;  %v944_v1 = vmov 0   ;;  %v945_v2 = vmov 1966171168   ;;  %v221_v4 = vld [vmem:[%s1242_s1] sm:$0xff]  ;;  %s189_s8 = scalar_select %p188_p12, %s930_s16, 1  ;;  %vm621_vm0 = vcmask 130048  }
  0x17   : > { %872 = vset.pattern.permute.xlu0 %v944_v1  ;;  %v225_v3 = vunpack.c.l.s4 %v945_v2  ;;  %873 = vset.pattern.permute.xlu1 %v944_v1  ;;  %v223_v7 = vcombine.high %v221_v4, %v221_v4  ;;  %v272_v8 = vld [vmem:[%s1243_s2] sm:$0xff]  ;;  %s191_s9 = scalar_select %p190_p13, %s926_s15, 15  ;;  %vm619_vm1 = vcmask 130049   ;;  %vm623_vm2 = vcmask 122880  }
  0x18   : > { %v228_v5 = vshrl.u32 %v227_v0, 7  ;;  %v274_v31 = vcombine.high %v272_v8, %v272_v8  ;;  %s784_s10 = smul.u32 384, %s189_s8 }
  0x19   : > { %v226_v6 = vunpack.c.0.s8 %v225_v3  ;;  %s783_s11 = smul.u32 24, %s191_s9 }
  0x1a   : > { %v325_v11 = vsub.s32 0, %v228_v5 }
  0x1b   : > { %v229_v9 = vsub.s32 %v226_v6, %v228_v5  ;;  %s194_s20 = sadd.s32 %s784_s10, %s783_s11 }
  0x1c   : > { %s776_s21 = sshll.u32 %s194_s20, 3 }
  0x1d   : > { %v230_v10 = vrot.slane %v221_v4, %v229_v9  ;;  %v237_v12 = vrot.slane %v223_v7, %v229_v9  ;;  %v281_v13 = vrot.slane %v272_v8, %v229_v9  ;;  %v288_v36 = vrot.slane %v274_v31, %v229_v9  ;;  %s1063_s29 = scalar_lea.vmem %s1241_s0, %s776_s21 }
  0x1e   : > { %v197_v57 = vld [vmem:[%s1063_s29] sm:$0xff]  ;;  %v198_v58 = vld [vmem:[%s1063_s29 + $0x8] sm:$0xff]  ;;  %v199_v61 = vld [vmem:[%s1063_s29 + $0x10] sm:$0x3] }
  0x1f   : > { %v246_v14 = vrot.slane %v230_v10, %v229_v9  ;;  %v238_v15 = vcombine.high %v230_v10, %v230_v10  ;;  %v253_v16 = vrot.slane %v237_v12, %v229_v9  ;;  %v239_v17 = vcombine.high %v237_v12, %v237_v12  ;;  %v209_v6 = vld [vmem:[%s1063_s29 + $0x60] sm:$0xff]  ;;  %v210_v7 = vld [vmem:[%s1063_s29 + $0x68] sm:$0xff]  ;;  %v200_v8 = vld [vmem:[%s1063_s29 + $0x18] sm:$0xff] }
  0x20   : > { %v289_v21 = vcombine.high %v281_v13, %v281_v13  ;;  %v297_v33 = vrot.slane %v281_v13, %v229_v9  ;;  %v290_v41 = vcombine.high %v288_v36, %v288_v36  ;;  %v304_v43 = vrot.slane %v288_v36, %v229_v9  ;;  %v211_v12 = vld [vmem:[%s1063_s29 + $0x70] sm:$0x3] }
  0x21   : > { %v326_v18 = vrot.slane %v246_v14, %v325_v11  ;;  %v268_v19 = vcombine.high %v246_v14, %v246_v14  ;;  %v267_v20 = vrot.slane %v239_v17, %v229_v9  ;;  %v342_v23 = vrot.slane %v253_v16, %v325_v11 }
  0x22   : > { %v260_v24 = vrot.slane %v238_v15, %v229_v9  ;;  %v311_v26 = vrot.slane %v289_v21, %v229_v9  ;;  %v269_v28 = vcombine.high %v253_v16, %v253_v16  ;;  %v414_v37 = vrot.slane %v297_v33, %v325_v11  ;;  %v202_v16 = vld [vmem:[%s1063_s29 + $0x28] sm:$0x3] }
  0x23   : > { %356 = vperm.xlu0 %872, %v326_v18   ;;  %v334_v22 = vrot.slane %v268_v19, %v325_v11  ;;  %v346_v25 = vrot.slane %v267_v20, %v325_v11  ;;  %v271_v35 = vcombine.high %v267_v20, %v267_v20  ;;  %v319_v38 = vcombine.high %v297_v33, %v297_v33  ;;  %v201_v20 = vld [vmem:[%s1063_s29 + $0x20] sm:$0xff] }
  0x24   : > { %v330_v27 = vrot.slane %v260_v24, %v325_v11  ;;  %v418_v29 = vrot.slane %v311_v26, %v325_v11  ;;  %v270_v30 = vcombine.high %v260_v24, %v260_v24  ;;  %v350_v32 = vrot.slane %v269_v28, %v325_v11 }
  0x25   : > { %364 = vperm.xlu1 %873, %v334_v22   ;;  %v354_v39 = vrot.slane %v271_v35, %v325_v11  ;;  %v321_v40 = vcombine.high %v311_v26, %v311_v26  ;;  %v422_v42 = vrot.slane %v319_v38, %v325_v11  ;;  %v318_v45 = vrot.slane %v290_v41, %v229_v9 }
  0x26   : > { %v338_v34 = vrot.slane %v270_v30, %v325_v11  ;;  %v430_v46 = vrot.slane %v304_v43, %v325_v11  ;;  %v320_v47 = vcombine.high %v304_v43, %v304_v43  ;;  %v204_v30 = vld [vmem:[%s1063_s29 + $0x38] sm:$0xff] }
  0x27   : > { %372 = vperm.xlu0 %872, %v342_v23   ;;  %v426_v44 = vrot.slane %v321_v40, %v325_v11  ;;  %v434_v48 = vrot.slane %v318_v45, %v325_v11  ;;  %v322_v49 = vcombine.high %v318_v45, %v318_v45  ;;  %v205_v40 = vld [vmem:[%s1063_s29 + $0x40] sm:$0x3] }
  0x28   : > { %v438_v50 = vrot.slane %v320_v47, %v325_v11 }
  0x29   : > { %376 = vperm.xlu1 %873, %v346_v25   ;;  %v442_v51 = vrot.slane %v322_v49, %v325_v11  ;;  %v213_v49 = vld [vmem:[%s1063_s29 + $0x80] sm:$0xff] }
  0x2b   : > { %360 = vperm.xlu0 %872, %v330_v27  }
  0x2d   : > { %448 = vperm.xlu1 %873, %v418_v29  }
  0x2f   : > { %380 = vperm.xlu0 %872, %v350_v32   ;;  %v203_v32 = vld [vmem:[%s1063_s29 + $0x30] sm:$0xff] }
  0x31   : > { %368 = vperm.xlu1 %873, %v338_v34  }
  0x33   : > { %444 = vperm.xlu0 %872, %v414_v37  }
  0x35   : > { %384 = vperm.xlu1 %873, %v354_v39   ;;  %v212_v39 = vld [vmem:[%s1063_s29 + $0x78] sm:$0xff] }
  0x37   : > { %452 = vperm.xlu0 %872, %v422_v42  }
  0x39   : > { %456 = vperm.xlu1 %873, %v426_v44  }
  0x3b   : > { %460 = vperm.xlu0 %872, %v430_v46  }
  0x3d   : > { %464 = vperm.xlu1 %873, %v434_v48   ;;  %v214_v48 = vld [vmem:[%s1063_s29 + $0x88] sm:$0x3] }
  0x3f   : > { %468 = vperm.xlu0 %872, %v438_v50  }
  0x41   : > { %472 = vperm.xlu1 %873, %v442_v51  }
  0x9e   : > { %v357_v52 = vpop.permute.xlu0 %356 }
  0x9f   : > { %v387_v62 = vmul.f32 %v357_v52, %v197_v57  ;;  %v388_v63 = vmul.f32 %v357_v52, %v198_v58  ;;  %v389_v3 = vmul.f32 %v357_v52, %v199_v61  ;;  %v216_v58 = vld [vmem:[%s1063_s29 + $0x98] sm:$0xff] }
  0xa0   : > { %v1055_v53 = vpop.permute.xlu1 %364 }
  0xa1   : > { %v394_v37 = vmul.f32 %v1055_v53, %v204_v30  ;;  %v393_v38 = vmul.f32 %v1055_v53, %v203_v32  ;;  %v395_v47 = vmul.f32 %v1055_v53, %v205_v40  ;;  %v215_v53 = vld [vmem:[%s1063_s29 + $0x90] sm:$0xff] }
  0xa2   : > { %v373_v54 = vpop.permute.xlu0 %372 }
  0xa3   : > { %v399_v13 = vmul.f32 %v373_v54, %v209_v6  ;;  %v400_v14 = vmul.f32 %v373_v54, %v210_v7  ;;  %v401_v23 = vmul.f32 %v373_v54, %v211_v12  ;;  %v207_v12 = vld [vmem:[%s1063_s29 + $0x50] sm:$0xff] }
  0xa4   : > { %v1057_v55 = vpop.permute.xlu1 %376 }
  0xa5   : > { %v402_v46 = vmul.f32 %v1057_v55, %v212_v39  ;;  %v403_v57 = vmul.f32 %v1057_v55, %v213_v49 }
  0xa6   : > { %v361_v56 = vpop.permute.xlu0 %360 }
  0xa7   : > { %v390_v15 = vmul.f32 %v361_v56, %v200_v8  ;;  %v392_v24 = vmul.f32 %v361_v56, %v202_v16  ;;  %v391_v27 = vmul.f32 %v361_v56, %v201_v20  ;;  %v404_v56 = vmul.f32 %v1057_v55, %v214_v48  ;;  %v217_v55 = vld [vmem:[%s1063_s29 + $0xa0] sm:$0x3]  ;;  %v218_v20 = vld [vmem:[%s1063_s29 + $0xa8] sm:$0xff] }
  0xa8   : > { %v449_v59 = vpop.permute.xlu1 %448 }
  0xa9   : > { %v478_v25 = vadd.f32 %v449_v59, %v390_v15  ;;  %v480_v33 = vadd.f32 %v449_v59, %v392_v24  ;;  %v479_v35 = vadd.f32 %v449_v59, %v391_v27  ;;  %v220_v27 = vld [vmem:[%s1063_s29 + $0xb8] sm:$0x3] }
  0xaa   : > { %v1067_v60 = vpop.permute.xlu0 %380 }
  0xab   : > { %v502_v34 = vmax.f32 %v478_v25, 0.0  ;;  %v504_v42 = vmax.f32 %v480_v33, 0.0  ;;  %v503_v45 = vmax.f32 %v479_v35, 0.0 }
  0xac   : > { %v1070_v4 = vpop.permute.xlu1 %368 }
  0xae   : > { %v445_v0 = vpop.permute.xlu0 %444 }
  0xaf   : > { %v475_v1 = vadd.f32 %v445_v0, %v387_v62  ;;  %v476_v2 = vadd.f32 %v445_v0, %v388_v63  ;;  %v477_v9 = vadd.f32 %v445_v0, %v389_v3  ;;  %v206_v3 = vld [vmem:[%s1063_s29 + $0x48] sm:$0xff] }
  0xb0   : > { %v1079_v17 = vpop.permute.xlu1 %384 }
  0xb1   : > { %v500_v5 = vmax.f32 %v476_v2, 0.0  ;;  %v499_v11 = vmax.f32 %v475_v1, 0.0  ;;  %v501_v19 = vmax.f32 %v477_v9, 0.0  ;;  %v406_v1 = vmul.f32 %v1067_v60, %v216_v58 }
  0xb2   : > { %v453_v10 = vpop.permute.xlu0 %452  ;;  %v405_v2 = vmul.f32 %v1067_v60, %v215_v53  ;;  %v396_v9 = vmul.f32 %v1070_v4, %v206_v3  ;;  %v410_v33 = vmul.f32 %v1079_v17, %v220_v27 }
  0xb3   : > { %549 = vrot.lane.b32.xlu1 %v500_v5, %s946_s4  ;;  %547 = vrot.lane.b32.xlu0 %v499_v11, %s946_s4  ;;  %v482_v41 = vadd.f32 %v453_v10, %v394_v37  ;;  %v481_v43 = vadd.f32 %v453_v10, %v393_v38  ;;  %v483_v52 = vadd.f32 %v453_v10, %v395_v47  ;;  %v208_v11 = vld [vmem:[%s1063_s29 + $0x58] sm:$0x3] }
  0xb4   : > { %v1085_v31 = vpop.permute.xlu1 %456  ;;  %v407_v10 = vmul.f32 %v1067_v60, %v217_v55  ;;  %v219_v60 = vld [vmem:[%s1063_s29 + $0xb0] sm:$0xff] }
  0xb5   : > { %v506_v51 = vmax.f32 %v482_v41, 0.0  ;;  %v505_v54 = vmax.f32 %v481_v43, 0.0  ;;  %v507_v0 = vmax.f32 %v483_v52, 0.0 }
  0xb6   : > { %v461_v18 = vpop.permute.xlu0 %460 }
  0xb7   : > { %v487_v21 = vadd.f32 %v461_v18, %v399_v13  ;;  %v488_v22 = vadd.f32 %v461_v18, %v400_v14  ;;  %551 = vrot.lane.b32.xlu0 %v501_v19, %s946_s4  ;;  %v489_v28 = vadd.f32 %v461_v18, %v401_v23  ;;  %v484_v13 = vadd.f32 %v1085_v31, %v396_v9 }
  0xb8   : > { %v465_v44 = vpop.permute.xlu1 %464  ;;  %v398_v18 = vmul.f32 %v1070_v4, %v208_v11  ;;  %v397_v19 = vmul.f32 %v1070_v4, %v207_v12 }
  0xb9   : > { %v512_v26 = vmax.f32 %v488_v22, 0.0  ;;  %v511_v29 = vmax.f32 %v487_v21, 0.0  ;;  %v513_v36 = vmax.f32 %v489_v28, 0.0  ;;  %v490_v50 = vadd.f32 %v465_v44, %v402_v46 }
  0xba   : > { %v492_v59 = vadd.f32 %v465_v44, %v404_v56  ;;  %v491_v62 = vadd.f32 %v465_v44, %v403_v57  ;;  %v469_v63 = vpop.permute.xlu0 %468  ;;  %v486_v21 = vadd.f32 %v1085_v31, %v398_v18  ;;  %v508_v22 = vmax.f32 %v484_v13, 0.0 }
  0xbb   : > { %573 = vrot.lane.b32.xlu1 %v512_v26, %s946_s4  ;;  %571 = vrot.lane.b32.xlu0 %v511_v29, %s946_s4  ;;  %v514_v61 = vmax.f32 %v490_v50, 0.0  ;;  %v494_v5 = vadd.f32 %v469_v63, %v406_v1  ;;  %v493_v7 = vadd.f32 %v469_v63, %v405_v2  ;;  %v495_v15 = vadd.f32 %v469_v63, %v407_v10 }
  0xbc   : > { %v516_v6 = vmax.f32 %v492_v59, 0.0  ;;  %v515_v8 = vmax.f32 %v491_v62, 0.0  ;;  %v485_v23 = vadd.f32 %v1085_v31, %v397_v19  ;;  %v473_v24 = vpop.permute.xlu1 %472  ;;  %v408_v26 = vmul.f32 %v1079_v17, %v218_v20 }
  0xbd   : > { %v518_v14 = vmax.f32 %v494_v5, 0.0  ;;  %v517_v16 = vmax.f32 %v493_v7, 0.0  ;;  %v519_v25 = vmax.f32 %v495_v15, 0.0  ;;  %v409_v28 = vmul.f32 %v1079_v17, %v219_v60 }
  0xbe   : > { %v496_v4 = vadd.f32 %v473_v24, %v408_v26  ;;  %v510_v29 = vmax.f32 %v486_v21, 0.0  ;;  %v509_v32 = vmax.f32 %v485_v23, 0.0  ;;  %v498_v31 = vadd.f32 %v473_v24, %v410_v33 }
  0xbf   : > { %553 = vrot.lane.b32.xlu1 %v502_v34, %s946_s4  ;;  %575 = vrot.lane.b32.xlu0 %v513_v36, %s946_s4  ;;  %v497_v30 = vadd.f32 %v473_v24, %v409_v28 }
  0xc0   : > { %v520_v34 = vmax.f32 %v496_v4, 0.0  ;;  %v522_v36 = vmax.f32 %v498_v31, 0.0 }
  0xc1   : > { %v521_v35 = vmax.f32 %v497_v30, 0.0 }
  0xc3   : > { %557 = vrot.lane.b32.xlu1 %v504_v42, %s946_s4  ;;  %555 = vrot.lane.b32.xlu0 %v503_v45, %s946_s4 }
  0xc7   : > { %561 = vrot.lane.b32.xlu1 %v506_v51, %s946_s4  ;;  %559 = vrot.lane.b32.xlu0 %v505_v54, %s946_s4 }
  0xcb   : > { %577 = vrot.lane.b32.xlu1 %v514_v61, %s946_s4  ;;  %563 = vrot.lane.b32.xlu0 %v507_v0, %s946_s4 }
  0xcf   : > { %581 = vrot.lane.b32.xlu1 %v516_v6, %s946_s4  ;;  %579 = vrot.lane.b32.xlu0 %v515_v8, %s946_s4 }
  0xd3   : > { %585 = vrot.lane.b32.xlu1 %v518_v14, %s946_s4  ;;  %583 = vrot.lane.b32.xlu0 %v517_v16, %s946_s4 }
  0xd7   : > { %565 = vrot.lane.b32.xlu1 %v508_v22, %s946_s4  ;;  %587 = vrot.lane.b32.xlu0 %v519_v25, %s946_s4 }
  0xdb   : > { %569 = vrot.lane.b32.xlu1 %v510_v29, %s946_s4  ;;  %567 = vrot.lane.b32.xlu0 %v509_v32, %s946_s4 }
  0xdf   : > { %589 = vrot.lane.b32.xlu1 %v520_v34, %s946_s4  ;;  %591 = vrot.lane.b32.xlu0 %v521_v35, %s946_s4 }
  0xe3   : > { %593 = vrot.lane.b32.xlu1 %v522_v36, %s946_s4 }
 0x125   : > { %v550_v37 = vpop.permute.xlu1 %549  ;;  %v548_v17 = vpop.permute.xlu0 %547 }
 0x126   : > { %622 = vst.msk [vmem:[%s1141_s6 + $0x7] sm:$0xff] %vm621_vm0, %v550_v37 }
 0x127   : > { %620 = vst.msk [vmem:[%s1141_s6 - $0x1] sm:$0xfe] %vm619_vm1, %v548_v17 }
 0x129   : > { %v552_v38 = vpop.permute.xlu0 %551 }
 0x12a   : > { %624 = vst.msk [vmem:[%s1141_s6 + $0xf] sm:$0x1] %vm623_vm2, %v552_v38 }
 0x12d   : > { %v574_v39 = vpop.permute.xlu1 %573  ;;  %v572_v40 = vpop.permute.xlu0 %571 }
 0x12e   : > { %635 = vst.msk [vmem:[%s1141_s6 + $0x47] sm:$0xff] %vm621_vm0, %v574_v39 }
 0x12f   : > { %634 = vst.msk [vmem:[%s1141_s6 + $0x3f] sm:$0xfe] %vm619_vm1, %v572_v40 }
 0x131   : > { %v554_v41 = vpop.permute.xlu1 %553  ;;  %v576_v42 = vpop.permute.xlu0 %575 }
 0x132   : > { %625 = vst.msk [vmem:[%s1141_s6 + $0xf] sm:$0xfe] %vm619_vm1, %v554_v41 }
 0x133   : > { %636 = vst.msk [vmem:[%s1141_s6 + $0x4f] sm:$0x1] %vm623_vm2, %v576_v42 }
 0x135   : > { %v558_v43 = vpop.permute.xlu1 %557  ;;  %v556_v44 = vpop.permute.xlu0 %555 }
 0x136   : > { %627 = vst.msk [vmem:[%s1141_s6 + $0x1f] sm:$0x1] %vm623_vm2, %v558_v43 }
 0x137   : > { %626 = vst.msk [vmem:[%s1141_s6 + $0x17] sm:$0xff] %vm621_vm0, %v556_v44 }
 0x139   : > { %v562_v45 = vpop.permute.xlu1 %561  ;;  %v560_v46 = vpop.permute.xlu0 %559 }
 0x13a   : > { %629 = vst.msk [vmem:[%s1141_s6 + $0x27] sm:$0xff] %vm621_vm0, %v562_v45 }
 0x13b   : > { %628 = vst.msk [vmem:[%s1141_s6 + $0x1f] sm:$0xfe] %vm619_vm1, %v560_v46 }
 0x13d   : > { %v578_v47 = vpop.permute.xlu1 %577  ;;  %v564_v48 = vpop.permute.xlu0 %563 }
 0x13e   : > { %637 = vst.msk [vmem:[%s1141_s6 + $0x4f] sm:$0xfe] %vm619_vm1, %v578_v47 }
 0x13f   : > { %630 = vst.msk [vmem:[%s1141_s6 + $0x2f] sm:$0x1] %vm623_vm2, %v564_v48 }
 0x141   : > { %v582_v49 = vpop.permute.xlu1 %581  ;;  %v580_v50 = vpop.permute.xlu0 %579 }
 0x142   : > { %639 = vst.msk [vmem:[%s1141_s6 + $0x5f] sm:$0x1] %vm623_vm2, %v582_v49 }
 0x143   : > { %638 = vst.msk [vmem:[%s1141_s6 + $0x57] sm:$0xff] %vm621_vm0, %v580_v50 }
 0x145   : > { %v586_v51 = vpop.permute.xlu1 %585  ;;  %v584_v52 = vpop.permute.xlu0 %583 }
 0x146   : > { %641 = vst.msk [vmem:[%s1141_s6 + $0x67] sm:$0xff] %vm621_vm0, %v586_v51 }
 0x147   : > { %640 = vst.msk [vmem:[%s1141_s6 + $0x5f] sm:$0xfe] %vm619_vm1, %v584_v52 }
 0x149   : > { %v566_v54 = vpop.permute.xlu1 %565  ;;  %v588_v56 = vpop.permute.xlu0 %587 }
 0x14a   : > { %631 = vst.msk [vmem:[%s1141_s6 + $0x2f] sm:$0xfe] %vm619_vm1, %v566_v54 }
 0x14b   : > { %642 = vst.msk [vmem:[%s1141_s6 + $0x6f] sm:$0x1] %vm623_vm2, %v588_v56 }
 0x14d   : > { %v570_v57 = vpop.permute.xlu1 %569  ;;  %v568_v58 = vpop.permute.xlu0 %567 }
 0x14e   : > { %633 = vst.msk [vmem:[%s1141_s6 + $0x3f] sm:$0x1] %vm623_vm2, %v570_v57 }
 0x14f   : > { %632 = vst.msk [vmem:[%s1141_s6 + $0x37] sm:$0xff] %vm621_vm0, %v568_v58 }
 0x151   : > { %v590_v53 = vpop.permute.xlu1 %589  ;;  %v592_v59 = vpop.permute.xlu0 %591 }
 0x152   : > { %643 = vst.msk [vmem:[%s1141_s6 + $0x6f] sm:$0xfe] %vm619_vm1, %v590_v53 }
 0x153   : > { %644 = vst.msk [vmem:[%s1141_s6 + $0x77] sm:$0xff] %vm621_vm0, %v592_v59 }
 0x155   : > { %v594_v61 = vpop.permute.xlu1 %593 }
 0x156   : > { %645 = vst.msk [vmem:[%s1141_s6 + $0x7f] sm:$0x1] %vm623_vm2, %v594_v61 }
 0x157   : > { %s778_s8 = sshll.u32 %s926_s15, 1  ;;  %s779_s9 = sshll.u32 %s930_s16, 8 }
 0x158   : > { %s659_s10 = sadd.s32 %s779_s9, %s778_s8  ;;  %s672_s11 = sshll.u32 %s1141_s6, 4  ;;  %s673_s11 = int_to_ptr.vmem [resolvable:$true] %s672_s11 }
 0x159   : > { %s780_s20 = sshll.u32 %s659_s10, 7  ;;  %s947_s28 = smov 256  }
 0x15a   : > { %s661_s24 = scalar_lea.hbm %s1244_s3, %s780_s20  ;;  %785 = sst [smem:[#allocation5]] (%p1025_p3), %s947_s28 }
 0x15b   : > { %s948_s29 = smov 4096   ;;  %s949_s4 = smov 2  }
 0x15c   : > { %786 = sst [smem:[#allocation5 + $0x1]] (%p1025_p3), %s948_s29  ;;  %s950_s15 = smov 128  }
 0x15d   : > { %787 = sst [smem:[#allocation5 + $0x2]] (%p1025_p3), %s949_s4  ;;  %s951_s16 = smov 8  }
 0x15e   : > { %788 = sst [smem:[#allocation5 + $0x3]] (%p1025_p3), %s950_s15  ;;  %s952_s5 = smov 131072  }
 0x15f   : > { %789 = sst [smem:[#allocation5 + $0x4]] (%p1025_p3), %s950_s15  ;;  %s953_s6 = smov 0  }
 0x160   : > { %790 = sst [smem:[#allocation5 + $0x5]] (%p1025_p3), %s951_s16 }
 0x161   : > { %791 = dma.general (%p1025_p3), %s673_s11, 2048, %s661_s24, %s647_s7, %s952_s5, [#allocation5], %s953_s6, 0  }
 0x162 PF: > { %p797_p0 = scmp.ge.s32.totalorder %s942_s19, 2  ;;  %s700_s8 = sand.u32 1, %s914_s12  }
 0x163   : > { %s701_s9 = scalar_lea.sflag [#allocation3], %s700_s8 }
 0x164   : > { %p794_p1 = pnand %p797_p0, %p1034_p8 }
 0x166   : > { %p795_p2 = pneg %p794_p1 }
 0x168   : > { %909 = dma.done.wait (%p795_p2), %s701_s9, 2048  }
 0x169   : > { %911 = vsyncadd (%p795_p2), %s701_s9, 4294965248  ;;  %s16_s19 = sadd.s32 1, %s942_s19   ;;  %s1247_s12 = smov %s918_s13 }
 0x16a   : > { %p13_p4 = scmp.ge.s32.totalorder %s16_s19, 34   ;;  %s1248_s13 = smov %s922_s14 }
 0x16b   : > { %s1249_s14 = smov %s1043_s30  ;;  %s1250_s15 = smov %s934_s17 }
 0x16c   : > { %s1251_s16 = smov %s938_s18  ;;  %s1252_s17 = smov %s1255_s22 }
 0x16d   : > { %s1253_s18 = smov %s1259_s23  ;;  %15 = sbr.rel (!%p13_p4) target bundleno = 5 (0x5), region = 72 }
 0x172   :  { %706 = vsyncpa [#allocation3], 1 }
 0x173   :  { %708 = vsyncpa [#allocation3 + $0x1], 1 }

// kernel: up_conv_forward.2
= control target key start
LH: loop header
LB: loop body
LE: loop exit
PB: predicated region body
PF: predicated region fallthrough
CT: control target
= control target key end

     0   :  { %s27234_s21 = smov 0   ;;  %s27236_s22 = smov 0   ;;  %s30123_s0 = inlined_call_operand.vmem [shape: f32[2,18,4,324], index: 0, kind: input, shape index: {}, may-alias: {0,1,2}]   ;;  %s30124_s1 = inlined_call_operand.vmem [shape: f32[2,18,4,324], index: 1, kind: input, shape index: {}, may-alias: {0,1,2}]   ;;  %s30125_s2 = inlined_call_operand.vmem [shape: f32[2,18,4,324], index: 2, kind: input, shape index: {}, may-alias: {0,1,2}]   ;;  %s30126_s3 = inlined_call_operand.vmem [shape: f32[27,8,4], index: 3, kind: input, shape index: {}]   ;;  %s30127_s4 = inlined_call_operand.vmem [shape: f32[1,324], index: 4, kind: input, shape index: {}]   ;;  %s30128_s5 = inlined_call_operand.vmem [shape: f32[2,16,8,324], index: 5, kind: output, shape index: {0}]   ;;  %s30129_s6 = inlined_call_operand.vmem [shape: f32[2,16,8,2], index: 6, kind: output, shape index: {1}]  }
   0x1   :  { %s27238_s23 = smov 0   ;;  %s27240_s24 = smov 0  }
   0x2   :  { %s27242_s25 = smov 0  }
   0x3 LB: > { %s26_s26 = sadd.s32 1, %s27171_s23  ;;  %s29_s27 = sadd.s32 1, %s27175_s24  ;;  %s27179_s25 = sphi %s27242_s25, %s17_s25   ;;  %s27175_s24 = sphi %s27240_s24, %s30165_s24   ;;  %s27171_s23 = sphi %s27238_s23, %s30164_s23   ;;  %s27167_s22 = sphi %s27236_s22, %s30163_s22   ;;  %s27163_s21 = sphi %s27234_s21, %s30162_s21  }
   0x4   : > { %p27_p0 = scmp.ge.s32.totalorder %s26_s26, 16  ;;  %p25926_p1 = scmp.ge.s32.totalorder %s27179_s25, 1 }
   0x5   : > { %p277_p2 = scmp.lt.s32.totalorder %s27179_s25, 33 }
   0x6   : > { %s30167_s26 = smov (%p27_p0, %s26_s26), 0  ;;  %s30169_s27 = smov (!%p27_p0, %s29_s27), %s27175_s24 }
   0x7   : > { %p278_p3 = pnand %p25926_p1, %p277_p2  ;;  %p31_p4 = scmp.ge.s32.totalorder %s30169_s27, 2 }
   0x8   : > { %p343_p5 = scmp.lt.s32.totalorder (!%p278_p3), %s27167_s22, 1  ;;  %p345_p6 = scmp.lt.s32.totalorder (!%p278_p3), %s27163_s21, 17 }
   0x9   : > { %s30171_s27 = smov (%p31_p4, %s30169_s27), 0  ;;  %281 = sbr.rel (%p278_p3) target bundleno = 1164 (0x48c), region = 40 }
   0xa   : > { %s27182_s12 = smov (!%p278_p3), 78   ;;  %s27183_s13 = smov (!%p278_p3), 18  }
   0xb   : > { %s27184_s14 = smov (!%p278_p3), 19   ;;  %s27185_s15 = smov (!%p278_p3), 79  }
   0xc   : > { %s27186_s16 = smov (!%p278_p3), 17   ;;  %s30146_s17 = smov (!%p278_p3), 77  }
   0xd   : > { %s30144_s18 = smov (!%p278_p3), 1   ;;  %s30142_s19 = smov (!%p278_p3), 61  }
   0xe   : > { %s30173_s22 = smov (!%p343_p5, %s27167_s22), 1  ;;  %v27181_v0 = vmov 0.0   ;;  %s30140_s20 = smov 127   ;;  %v392_v7 = vld [vmem:[%s30126_s3 + $0x8] sm:$0xff]  ;;  %vm455_vm0 = vcmask 31744   ;;  %vm450_vm1 = vcmask 146432  }
   0xf   : > { %s346_s28 = scalar_select %p345_p6, %s27163_s21, 17  ;;  %533 = vmatprep.mubr.f32.mxu0 %v27181_v0  ;;  %619 = vmatprep.mubr.f32.mxu1 %v27181_v0  ;;  %v457_v8 = vsel %vm455_vm0, %v392_v7, 0  ;;  %vm459_vm2 = vcmask 1043456   ;;  %vm436_vm3 = vcmask 154624   ;;  %v391_v32 = vld [vmem:[%s30126_s3] sm:$0xff]  ;;  %vm27198_vm4 = vmmov 0  }
  0x10   : > { %s27271_s29 = smul.u32 54, %s30173_s22  ;;  %s30136_s9 = smov 50   ;;  %v27394_v9 = vand.u32 4294901760, %v457_v8  ;;  %v1379_v38 = vsel %vm455_vm0, %v391_v32, 0  ;;  %vm2308_vm5 = vcmask 138240   ;;  %vm3246_vm6 = vcmask 7168  }
  0x11   : > { %s27069_s30 = smul.u32 3, %s346_s28  ;;  %s30138_s28 = smov 67   ;;  %v27451_v44 = vand.u32 4294901760, %v1379_v38  ;;  %vm5104_vm7 = vcmask 1039360   ;;  %vm5111_vm8 = vcmask 547840   ;;  %vm6043_vm9 = vcmask 908288  }
  0x12   : > { %s30148_s10 = smov 109   ;;  %v27401_v10 = vsub.f32 %v457_v8, %v27394_v9  ;;  %v393_v8 = vld [vmem:[%s30126_s3 + $0x10] sm:$0xff]  ;;  %vm6050_vm10 = vcmask 416768   ;;  %vm6982_vm11 = vcmask 900096   ;;  %vm6989_vm12 = vcmask 408576   ;;  %p376_p9 = scmp.lt.s32.totalorder %s27163_s21, 15 }
  0x13   : > { %s349_s7 = sadd.s32 %s27271_s29, %s27069_s30  ;;  %s30134_s30 = smov 111   ;;  %v27463_v48 = vsub.f32 %v1379_v38, %v27451_v44  ;;  %vm7921_vm13 = vcmask 891904   ;;  %vm7928_vm14 = vcmask 400384   ;;  %vm25700_vm15 = vcmask 556032  }
  0x14   : > { %s25927_s8 = sshll.u32 %s349_s7, 2  ;;  %s30130_s7 = smov 51   ;;  %v27408_v11 = vand.u32 4294901760, %v27401_v10 }
  0x15   : > { %s351_s11 = scalar_lea.vmem %s30123_s0, %s25927_s8  ;;  %s30132_s8 = smov 110   ;;  %v27476_v52 = vand.u32 4294901760, %v27463_v48 }
  0x16   : > { %v27279_v1 = vld [vmem:[%s351_s11 + $0x8] sm:$0xf]  ;;  %v27281_v2 = vld [vmem:[%s351_s11] sm:$0xff]  ;;  %s30147_s11 = smov 49   ;;  %v537_v17 = vsub.f32 %v27401_v10, %v27408_v11 }
  0x17   : > { %441 = vrot.lane.b32.xlu1 %v27279_v1, %s27182_s12  ;;  %444 = vrot.lane.b32.xlu0 %v27281_v2, %s27183_s13  ;;  %v27289_v3 = vcombine.high %v27281_v2, %v27281_v2  ;;  %v1458_v58 = vsub.f32 %v27463_v48, %v27476_v52 }
  0x18   : > { %v538_v26 = vand.u32 4294901760, %v537_v17 }
  0x19   : > { %v1459_v63 = vand.u32 4294901760, %v1458_v58 }
  0x1b   : > { %448 = vrot.lane.b32.xlu1 %v27279_v1, %s27183_s13  ;;  %446 = vrot.lane.b32.xlu0 %v27289_v3, %s27183_s13 }
  0x1f   : > { %430 = vrot.lane.b32.xlu0 %v27281_v2, %s27184_s14  ;;  %432 = vrot.lane.b32.xlu1 %v27289_v3, %s27184_s14 }
  0x23   : > { %425 = vrot.lane.b32.xlu0 %v27279_v1, %s27185_s15  ;;  %434 = vrot.lane.b32.xlu1 %v27279_v1, %s27184_s14 }
  0x27   : > { %2302 = vrot.lane.b32.xlu0 %v27281_v2, %s27186_s16  ;;  %2304 = vrot.lane.b32.xlu1 %v27289_v3, %s27186_s16 }
  0x2b   : > { %2299 = vrot.lane.b32.xlu0 %v27279_v1, %s30146_s17  ;;  %2306 = vrot.lane.b32.xlu1 %v27279_v1, %s27186_s16 }
  0x2f   : > { %3240 = vrot.lane.b32.xlu0 %v27281_v2, %s30144_s18  ;;  %3242 = vrot.lane.b32.xlu1 %v27289_v3, %s30144_s18 }
  0x33   : > { %3237 = vrot.lane.b32.xlu0 %v27279_v1, %s30142_s19  ;;  %3244 = vrot.lane.b32.xlu1 %v27279_v1, %s30144_s18 }
  0x37   : > { %5100 = vrot.lane.b32.xlu0 %v27289_v3, %s30140_s20  ;;  %5102 = vrot.lane.b32.xlu1 %v27279_v1, %s30140_s20 }
  0x3b   : > { %5098 = vrot.lane.b32.xlu0 %v27281_v2, %s30140_s20  ;;  %5108 = vrot.lane.b32.xlu1 %v27281_v2, %s30138_s28  ;;  %s30153_s28 = smov 111  }
  0x3f   : > { %6039 = vrot.lane.b32.xlu0 %v27289_v3, %s30134_s30  ;;  %6041 = vrot.lane.b32.xlu1 %v27279_v1, %s30134_s30 }
  0x43   : > { %6037 = vrot.lane.b32.xlu0 %v27281_v2, %s30134_s30  ;;  %6047 = vrot.lane.b32.xlu1 %v27281_v2, %s30130_s7  ;;  %s352_s7 = sadd.s32 1, %s27163_s21 }
  0x44   : > { %p355_p7 = scmp.lt.s32.totalorder %s352_s7, 17 }
  0x46   : > { %s30175_s7 = smov (!%p355_p7, %s352_s7), 17 }
  0x47   : > { %6978 = vrot.lane.b32.xlu0 %v27289_v3, %s30132_s8  ;;  %6980 = vrot.lane.b32.xlu1 %v27279_v1, %s30132_s8 }
  0x4b   : > { %6976 = vrot.lane.b32.xlu0 %v27281_v2, %s30132_s8  ;;  %6986 = vrot.lane.b32.xlu1 %v27281_v2, %s30136_s9  ;;  %s27071_s8 = smul.u32 3, %s30175_s7  ;;  %s30151_s7 = smov 127  }
  0x4d   : > { %s359_s30 = sadd.s32 %s27071_s8, %s27271_s29  ;;  %s30152_s8 = smov 67  }
  0x4e   : > { %s25928_s9 = sshll.u32 %s359_s30, 2  ;;  %s30150_s30 = smov 61  }
  0x4f   : > { %7917 = vrot.lane.b32.xlu0 %v27289_v3, %s30148_s10  ;;  %7919 = vrot.lane.b32.xlu1 %v27279_v1, %s30148_s10  ;;  %s27356_s19 = scalar_lea.vmem %s30124_s1, %s25928_s9  ;;  %s30154_s9 = smov 51  }
  0x50   : > { %v27359_v4 = vld [vmem:[%s27356_s19] sm:$0xff]  ;;  %v27368_v6 = vld [vmem:[%s27356_s19 + $0x8] sm:$0xf] }
  0x51   : > { %v27365_v5 = vcombine.high %v27359_v4, %v27359_v4 }
  0x53   : > { %7915 = vrot.lane.b32.xlu0 %v27281_v2, %s30148_s10  ;;  %7925 = vrot.lane.b32.xlu1 %v27281_v2, %s30147_s11 }
  0x57   : > { %8860 = vrot.lane.b32.xlu0 %v27359_v4, %s27184_s14  ;;  %8862 = vrot.lane.b32.xlu1 %v27365_v5, %s27184_s14 }
  0x5b   : > { %8855 = vrot.lane.b32.xlu0 %v27368_v6, %s27185_s15  ;;  %8864 = vrot.lane.b32.xlu1 %v27368_v6, %s27184_s14 }
  0x5f   : > { %9797 = vrot.lane.b32.xlu0 %v27359_v4, %s27183_s13  ;;  %9799 = vrot.lane.b32.xlu1 %v27365_v5, %s27183_s13 }
  0x63   : > { %9794 = vrot.lane.b32.xlu0 %v27368_v6, %s27182_s12  ;;  %9801 = vrot.lane.b32.xlu1 %v27368_v6, %s27183_s13 }
  0x67   : > { %10734 = vrot.lane.b32.xlu0 %v27359_v4, %s27186_s16  ;;  %10736 = vrot.lane.b32.xlu1 %v27365_v5, %s27186_s16 }
  0x6b   : > { %10731 = vrot.lane.b32.xlu0 %v27368_v6, %s30146_s17  ;;  %10738 = vrot.lane.b32.xlu1 %v27368_v6, %s27186_s16  ;;  %s363_s17 = sadd.s32 2, %s27163_s21  ;;  %s30179_s21 = smov (!%p376_p9, %s27163_s21), 15 }
  0x6c   : > { %p28379_p8 = scmp.lt.s32.totalorder %s363_s17, 17 }
  0x6e   : > { %s30177_s17 = smov (!%p28379_p8, %s363_s17), 17 }
  0x6f   : > { %11671 = vrot.lane.b32.xlu0 %v27359_v4, %s30144_s18  ;;  %11673 = vrot.lane.b32.xlu1 %v27365_v5, %s30144_s18  ;;  %s27072_s20 = smul.u32 3, %s30177_s17 }
  0x71   : > { %s28446_s17 = sadd.s32 %s27072_s20, %s27271_s29 }
  0x72   : > { %s25929_s29 = sshll.u32 %s28446_s17, 2  ;;  %s30158_s17 = smov 77  }
  0x73   : > { %11668 = vrot.lane.b32.xlu0 %v27368_v6, %s30150_s30  ;;  %11675 = vrot.lane.b32.xlu1 %v27368_v6, %s30144_s18  ;;  %s30155_s18 = smov 110   ;;  %s28474_s20 = scalar_lea.vmem %s30125_s2, %s25929_s29 }
  0x77   : > { %13530 = vrot.lane.b32.xlu0 %v27365_v5, %s30151_s7  ;;  %13532 = vrot.lane.b32.xlu1 %v27368_v6, %s30151_s7 }
  0x7b   : > { %13528 = vrot.lane.b32.xlu0 %v27359_v4, %s30151_s7  ;;  %13537 = vrot.lane.b32.xlu1 %v27359_v4, %s30152_s8 }
  0x7f   : > { %14467 = vrot.lane.b32.xlu0 %v27365_v5, %s30153_s28  ;;  %14469 = vrot.lane.b32.xlu1 %v27368_v6, %s30153_s28 }
  0x83   : > { %14465 = vrot.lane.b32.xlu0 %v27359_v4, %s30153_s28  ;;  %14474 = vrot.lane.b32.xlu1 %v27359_v4, %s30154_s9 }
  0x87   : > { %15404 = vrot.lane.b32.xlu0 %v27365_v5, %s30155_s18 }
  0x89   : > { %v442_v12 = vpop.permute.xlu1 %441  ;;  %v445_v13 = vpop.permute.xlu0 %444 }
  0x8a   : > { %v454_v14 = vsel %vm450_vm1, %v442_v12, %v445_v13 }
  0x8b   : > { %v461_v15 = vsel %vm459_vm2, %v454_v14, 0  ;;  %v2314_v14 = vsel %vm455_vm0, %v393_v8, 0 }
  0x8c   : > { %v27416_v16 = vand.u32 4294901760, %v461_v15 }
  0x8d   : > { %v449_v18 = vpop.permute.xlu1 %448  ;;  %v447_v19 = vpop.permute.xlu0 %446 }
  0x8e   : > { %v582_v20 = vsub.f32 %v461_v15, %v27416_v16  ;;  %v451_v21 = vsel %vm450_vm1, %v445_v13, %v447_v19  ;;  %v452_v22 = vsel %vm450_vm1, %v447_v19, %v449_v18  ;;  %v27521_v18 = vand.u32 4294901760, %v2314_v14 }
  0x8f   : > { %v463_v23 = vsel %vm459_vm2, %v451_v21, 0  ;;  %v465_v24 = vsel %vm459_vm2, %v452_v22, 0 }
  0x90   : > { %v497_v25 = vand.u32 4294901760, %v463_v23  ;;  %v583_v27 = vand.u32 4294901760, %v582_v20  ;;  %v27431_v30 = vand.u32 4294901760, %v465_v24  ;;  %v27534_v21 = vsub.f32 %v2314_v14, %v27521_v18 }
  0x91   : > { %v431_v28 = vpop.permute.xlu0 %430  ;;  %v433_v31 = vpop.permute.xlu1 %432 }
  0x92   : > { %v576_v29 = vsub.f32 %v463_v23, %v497_v25  ;;  %498 = vmatprep.subr.mxu0 %v497_v25  ;;  %v584_v34 = vsub.f32 %v582_v20, %v583_v27  ;;  %v437_v36 = vsel %vm436_vm3, %v431_v28, %v433_v31  ;;  %v1040_v39 = vsub.f32 %v465_v24, %v27431_v30 }
  0x93   : > { %500 = vmatpush1.msra.mxu0 %v27416_v16  ;;  %v1384_v41 = vsel %vm459_vm2, %v437_v36, 0 }
  0x94   : > { %539 = vmatmul.mubr.f32.vlgmr.msra.gmra.mxu0 %v538_v26  ;;  %659 = vmatprep.subr.mxu0 %v576_v29  ;;  %v577_v33 = vand.u32 4294901760, %v576_v29  ;;  %v585_v42 = vand.u32 4294901760, %v584_v34  ;;  %v1041_v45 = vand.u32 4294901760, %v1040_v39  ;;  %v27456_v46 = vand.u32 4294901760, %v1384_v41 }
  0x95   : > { %662 = vmatpush1.msra.mxu0 %v582_v20  ;;  %695 = vmatprep.mubr.f32.mxu0 %v27181_v0  ;;  %v426_v37 = vpop.permute.xlu0 %425  ;;  %v435_v53 = vpop.permute.xlu1 %434 }
  0x96   : > { %813 = vmatprep.subr.mxu0 %v577_v33  ;;  %v578_v35 = vsub.f32 %v576_v29, %v577_v33  ;;  %v440_v43 = vsel %vm436_vm3, %v426_v37, %v431_v28  ;;  %v1042_v50 = vsub.f32 %v1040_v39, %v1041_v45  ;;  %v1497_v51 = vsub.f32 %v1384_v41, %v27456_v46 }
  0x97   : > { %v1382_v47 = vsel %vm459_vm2, %v440_v43, 0  ;;  %v438_v57 = vsel %vm436_vm3, %v433_v31, %v435_v53 }
  0x98   : > { %698 = vmatmul.mubr.f32.vlgmr.msra.gmra.mxu0 %v27401_v10  ;;  %v579_v40 = vand.u32 4294901760, %v578_v35  ;;  %v27466_v49 = vand.u32 4294901760, %v1382_v47  ;;  %v1043_v55 = vand.u32 4294901760, %v1042_v50  ;;  %v1498_v56 = vand.u32 4294901760, %v1497_v51 }
  0x99   : > { %817 = vmatpush1.msra.mxu0 %v583_v27  ;;  %850 = vmatprep.mubr.f32.mxu0 %v27181_v0  ;;  %v1386_v60 = vsel %vm459_vm2, %v438_v57, 0  ;;  %v2303_v62 = vpop.permute.xlu0 %2302  ;;  %v2305_v7 = vpop.permute.xlu1 %2304 }
  0x9a   : > { %580 = vmatprep.subr.mxu1 %v579_v40  ;;  %26259 = vmatprep.subr.mxu0 %v27181_v0  ;;  %v1503_v54 = vsub.f32 %v1382_v47, %v27466_v49  ;;  %v1499_v61 = vsub.f32 %v1497_v51, %v1498_v56  ;;  %v27502_v4 = vand.u32 4294901760, %v1386_v60  ;;  %v2309_v12 = vsel %vm2308_vm5, %v2303_v62, %v2305_v7  ;;  %v394_v40 = vld [vmem:[%s30126_s3 + $0x18] sm:$0xff] }
  0x9b   : > { %586 = vmatpush1.msra.mxu1 %v585_v42 }
  0x9c   : > { %621 = vmatmul.mubr.f32.vlgmr.msra.gmra.mxu1 %v27394_v9  ;;  %735 = vmatprep.subr.mxu1 %v497_v25  ;;  %v1504_v59 = vand.u32 4294901760, %v1503_v54  ;;  %v1961_v15 = vsub.f32 %v1386_v60, %v27502_v4 }
  0x9d   : > { %852 = vmatmul.mubr.f32.vlgmr.msra.gmra.mxu0 %v27394_v9  ;;  %737 = vmatpush1.msra.mxu1 %v27416_v16  ;;  %v2300_v13 = vpop.permute.xlu0 %2299 }
  0x9e   : > { %26260 = vmatpush3.msra.mxu0 %v27431_v30  ;;  %889 = vmatprep.subr.mxu1 %v497_v25  ;;  %v1505_v6 = vsub.f32 %v1503_v54, %v1504_v59  ;;  %v2312_v17 = vsel %vm2308_vm5, %v2300_v13, %v2303_v62  ;;  %v1962_v19 = vand.u32 4294901760, %v1961_v15  ;;  %v27548_v25 = vand.u32 4294901760, %v27534_v21  ;;  %v395_v13 = vld [vmem:[%s30126_s3 + $0x20] sm:$0xff] }
  0x9f   : > { %770 = vmatprep.mubr.f32.mxu1 %v27181_v0  ;;  %26261 = vmatprep.mubr.msk.f32.mxu0 %vm27198_vm4, %v27181_v0 }
  0xa0   : > { %26269 = vmatprep.subr.mxu0 %v27181_v0  ;;  %774 = vmatmul.mubr.f32.vlgmr.msra.gmra.mxu1 %v27408_v11  ;;  %v1963_v23 = vsub.f32 %v1961_v15, %v1962_v19  ;;  %v2393_v31 = vsub.f32 %v27534_v21, %v27548_v25 }
  0xa1   : > { %891 = vmatpush1.msra.mxu1 %v27416_v16  ;;  %26262 = vmatmul.mubr.f32.vlgmr.msra.gmra.mxu0 %v538_v26  ;;  %v1506_v16 = vand.u32 4294901760, %v1505_v6  ;;  %v2307_v26 = vpop.permute.xlu1 %2306  ;;  %v3241_v35 = vpop.permute.xlu0 %3240 }
  0xa2   : > { %26270 = vmatpush3.msra.mxu0 %v1040_v39  ;;  %924 = vmatprep.mubr.f32.mxu1 %v27181_v0  ;;  %v1964_v28 = vand.u32 4294901760, %v1963_v23  ;;  %v2394_v36 = vand.u32 4294901760, %v2393_v31 }
  0xa3   : > { %26264 = vmatprep.subr.mxu1 %v27181_v0  ;;  %26271 = vmatprep.mubr.msk.f32.mxu0 %vm27198_vm4, %v27181_v0 }
  0xa4   : > { %26279 = vmatprep.subr.mxu0 %v27181_v0  ;;  %926 = vmatmul.mubr.f32.vlgmr.msra.gmra.mxu1 %v27394_v9 }
  0xa5   : > { %26265 = vmatpush3.msra.mxu1 %v1043_v55  ;;  %26272 = vmatmul.mubr.f32.vlgmr.msra.gmra.mxu0 %v27401_v10  ;;  %v1500_v10 = vand.u32 4294901760, %v1499_v61  ;;  %v3243_v39 = vpop.permute.xlu1 %3242  ;;  %v3238_v43 = vpop.permute.xlu0 %3237 }
  0xa6   : > { %26280 = vmatpush3.msra.mxu0 %v1041_v45  ;;  %26266 = vmatprep.mubr.msk.f32.mxu1 %vm27198_vm4, %v27181_v0  ;;  %v3247_v42 = vsel %vm3246_vm6, %v3241_v35, %v3243_v39  ;;  %v3252_v45 = vsel %vm455_vm0, %v394_v40, 0 }
  0xa7   : > { %1419 = vmatprep.subr.mxu0 %v27456_v46  ;;  %26274 = vmatprep.subr.mxu1 %v27181_v0  ;;  %v27593_v50 = vand.u32 4294901760, %v3252_v45 }
  0xa8   : > { %26281 = vmatprep.mubr.msk.f32.mxu0 %vm27198_vm4, %v27181_v0  ;;  %26267 = vmatmul.mubr.f32.vlgmr.msra.gmra.mxu1 %v27394_v9 }
  0xa9   : > { %26275 = vmatpush3.msra.mxu1 %v27431_v30  ;;  %26282 = vmatmul.mubr.f32.vlgmr.msra.gmra.mxu0 %v27394_v9  ;;  %v27606_v53 = vsub.f32 %v3252_v45, %v27593_v50  ;;  %v3245_v58 = vpop.permute.xlu1 %3244  ;;  %v5101_v31 = vpop.permute.xlu0 %5100 }
  0xaa   : > { %1421 = vmatpush1.msra.mxu0 %v27466_v49  ;;  %26276 = vmatprep.mubr.msk.f32.mxu1 %vm27198_vm4, %v27181_v0  ;;  %v3248_v62 = vsel %vm3246_vm6, %v3243_v39, %v3245_v58 }
  0xab   : > { %1580 = vmatprep.subr.mxu0 %v1497_v51  ;;  %26284 = vmatprep.subr.mxu1 %v27181_v0  ;;  %v27620_v57 = vand.u32 4294901760, %v27606_v53  ;;  %v3259_v6 = vsel %vm459_vm2, %v3248_v62, 0 }
  0xac   : > { %1454 = vmatprep.mubr.f32.mxu0 %v27181_v0  ;;  %26277 = vmatmul.mubr.f32.vlgmr.msra.gmra.mxu1 %v27408_v11  ;;  %v2319_v11 = vsel %vm459_vm2, %v2309_v12, 0 }
  0xad   : > { %26285 = vmatpush3.msra.mxu1 %v27431_v30  ;;  %1460 = vmatmul.mubr.f32.vlgmr.msra.gmra.mxu0 %v1459_v63  ;;  %v27526_v20 = vand.u32 4294901760, %v2319_v11  ;;  %v2310_v30 = vsel %vm2308_vm5, %v2305_v7, %v2307_v26  ;;  %v5099_v40 = vpop.permute.xlu0 %5098 }
  0xae   : > { %1583 = vmatpush1.msra.mxu0 %v1503_v54  ;;  %1501 = vmatprep.subr.mxu1 %v1500_v10  ;;  %v2321_v33 = vsel %vm459_vm2, %v2310_v30, 0  ;;  %v27646_v10 = vand.u32 4294901760, %v3259_v6 }
  0xaf   : > { %1734 = vmatprep.subr.mxu0 %v1498_v56  ;;  %26286 = vmatprep.mubr.msk.f32.mxu1 %vm27198_vm4, %v27181_v0  ;;  %v2432_v24 = vsub.f32 %v2319_v11, %v27526_v20  ;;  %v27574_v37 = vand.u32 4294901760, %v2321_v33 }
  0xb0   : > { %1616 = vmatprep.mubr.f32.mxu0 %v27181_v0  ;;  %26287 = vmatmul.mubr.f32.vlgmr.msra.gmra.mxu1 %v27394_v9  ;;  %v2317_v9 = vsel %vm459_vm2, %v2312_v17, 0  ;;  %v4180_v17 = vsel %vm459_vm2, %v27289_v3, 0 }
  0xb1   : > { %1507 = vmatpush1.msra.mxu1 %v1506_v16  ;;  %1619 = vmatmul.mubr.f32.vlgmr.msra.gmra.mxu0 %v27463_v48  ;;  %v27538_v22 = vand.u32 4294901760, %v2317_v9  ;;  %v2433_v29 = vand.u32 4294901760, %v2432_v24  ;;  %v3834_v16 = vsub.f32 %v3259_v6, %v27646_v10  ;;  %v6040_v62 = vpop.permute.xlu0 %6039 }
  0xb2   : > { %1738 = vmatpush1.msra.mxu0 %v1504_v59  ;;  %1656 = vmatprep.subr.mxu1 %v27456_v46 }
  0xb3   : > { %1540 = vmatprep.mubr.f32.mxu1 %v27181_v0  ;;  %1771 = vmatprep.mubr.f32.mxu0 %v27181_v0  ;;  %v2438_v27 = vsub.f32 %v2317_v9, %v27538_v22  ;;  %v2434_v34 = vsub.f32 %v2432_v24, %v2433_v29  ;;  %v3835_v9 = vand.u32 4294901760, %v3834_v16 }
  0xb4   : > { %26289 = vmatprep.subr.mxu0 %v27181_v0  ;;  %1542 = vmatmul.mubr.f32.vlgmr.msra.gmra.mxu1 %v27451_v44 }
  0xb5   : > { %1658 = vmatpush1.msra.mxu1 %v27466_v49  ;;  %1773 = vmatmul.mubr.f32.vlgmr.msra.gmra.mxu0 %v27451_v44  ;;  %v2439_v32 = vand.u32 4294901760, %v2438_v27  ;;  %v2435_v41 = vand.u32 4294901760, %v2434_v34 }
  0xb6   : > { %26290 = vmatpush3.msra.mxu0 %v27502_v4  ;;  %1810 = vmatprep.subr.mxu1 %v27456_v46  ;;  %v2896_v46 = vsub.f32 %v2321_v33, %v27574_v37 }
  0xb7   : > { %1691 = vmatprep.mubr.f32.mxu1 %v27181_v0  ;;  %26291 = vmatprep.mubr.msk.f32.mxu0 %vm27198_vm4, %v27181_v0  ;;  %v2440_v38 = vsub.f32 %v2438_v27, %v2439_v32 }
  0xb8   : > { %26299 = vmatprep.subr.mxu0 %v27181_v0  ;;  %1695 = vmatmul.mubr.f32.vlgmr.msra.gmra.mxu1 %v27476_v52  ;;  %v2897_v51 = vand.u32 4294901760, %v2896_v46 }
  0xb9   : > { %1812 = vmatpush1.msra.mxu1 %v27466_v49  ;;  %26292 = vmatmul.mubr.f32.vlgmr.msra.gmra.mxu0 %v1459_v63  ;;  %v2441_v47 = vand.u32 4294901760, %v2440_v38  ;;  %v3250_v49 = vsel %vm3246_vm6, %v3238_v43, %v3241_v35  ;;  %v3331_v63 = vsub.f32 %v27606_v53, %v27620_v57  ;;  %v5103_v35 = vpop.permute.xlu1 %5102  ;;  %v5105_v43 = vsel %vm5104_vm7, %v5099_v40, %v5101_v31 }
  0xba   : > { %26300 = vmatpush3.msra.mxu0 %v1961_v15  ;;  %1845 = vmatprep.mubr.f32.mxu1 %v27181_v0  ;;  %v2898_v55 = vsub.f32 %v2896_v46, %v2897_v51  ;;  %v4176_v15 = vsel %vm455_vm0, %v395_v13, 0  ;;  %v5106_v39 = vsel %vm5104_vm7, %v5101_v31, %v5103_v35  ;;  %v6038_v13 = vpop.permute.xlu0 %6037 }
  0xbb   : > { %26294 = vmatprep.subr.mxu1 %v27181_v0  ;;  %26301 = vmatprep.mubr.msk.f32.mxu0 %vm27198_vm4, %v27181_v0  ;;  %v3332_v8 = vand.u32 4294901760, %v3331_v63 }
  0xbc   : > { %26309 = vmatprep.subr.mxu0 %v27181_v0  ;;  %1847 = vmatmul.mubr.f32.vlgmr.msra.gmra.mxu1 %v27451_v44  ;;  %v2899_v60 = vand.u32 4294901760, %v2898_v55 }
  0xbd   : > { %26295 = vmatpush3.msra.mxu1 %v1964_v28  ;;  %26302 = vmatmul.mubr.f32.vlgmr.msra.gmra.mxu0 %v27463_v48  ;;  %v3257_v48 = vsel %vm459_vm2, %v3247_v42, 0  ;;  %v5118_v42 = vsel %vm459_vm2, %v5106_v39, 0 }
  0xbe   : > { %26310 = vmatpush3.msra.mxu0 %v1962_v19  ;;  %26296 = vmatprep.mubr.msk.f32.mxu1 %vm27198_vm4, %v27181_v0  ;;  %v27664_v19 = vand.u32 4294901760, %v4176_v15 }
  0xbf   : > { %2354 = vmatprep.subr.mxu0 %v27526_v20  ;;  %26304 = vmatprep.subr.mxu1 %v27181_v0 }
  0xc0   : > { %26311 = vmatprep.mubr.msk.f32.mxu0 %vm27198_vm4, %v27181_v0  ;;  %26297 = vmatmul.mubr.f32.vlgmr.msra.gmra.mxu1 %v27451_v44 }
  0xc1   : > { %26305 = vmatpush3.msra.mxu1 %v27502_v4  ;;  %26312 = vmatmul.mubr.f32.vlgmr.msra.gmra.mxu0 %v27451_v44 }
  0xc2   : > { %2356 = vmatpush1.msra.mxu0 %v27538_v22  ;;  %26306 = vmatprep.mubr.msk.f32.mxu1 %vm27198_vm4, %v27181_v0 }
  0xc3   : > { %2515 = vmatprep.subr.mxu0 %v2432_v24  ;;  %26314 = vmatprep.subr.mxu1 %v27181_v0 }
  0xc4   : > { %2389 = vmatprep.mubr.f32.mxu0 %v27181_v0  ;;  %26307 = vmatmul.mubr.f32.vlgmr.msra.gmra.mxu1 %v27476_v52  ;;  %v27598_v52 = vand.u32 4294901760, %v3257_v48 }
  0xc5   : > { %26315 = vmatpush3.msra.mxu1 %v27502_v4  ;;  %2395 = vmatmul.mubr.f32.vlgmr.msra.gmra.mxu0 %v2394_v36 }
  0xc6   : > { %2518 = vmatpush1.msra.mxu0 %v2438_v27  ;;  %2436 = vmatprep.subr.mxu1 %v2435_v41  ;;  %v3370_v56 = vsub.f32 %v3257_v48, %v27598_v52  ;;  %v5116_v48 = vsel %vm459_vm2, %v5105_v43, 0 }
  0xc7   : > { %2669 = vmatprep.subr.mxu0 %v2433_v29  ;;  %26316 = vmatprep.mubr.msk.f32.mxu1 %vm27198_vm4, %v27181_v0  ;;  %v4182_v29 = vsel %vm459_vm2, %v27279_v1, 0 }
  0xc8   : > { %2551 = vmatprep.mubr.f32.mxu0 %v27181_v0  ;;  %26317 = vmatmul.mubr.f32.vlgmr.msra.gmra.mxu1 %v27451_v44  ;;  %v3255_v44 = vsel %vm459_vm2, %v3250_v49, 0  ;;  %v3371_v61 = vand.u32 4294901760, %v3370_v56  ;;  %v27715_v34 = vand.u32 4294901760, %v4182_v29 }
  0xc9   : > { %2442 = vmatpush1.msra.mxu1 %v2441_v47  ;;  %2554 = vmatmul.mubr.f32.vlgmr.msra.gmra.mxu0 %v27534_v21  ;;  %v27610_v54 = vand.u32 4294901760, %v3255_v44  ;;  %v27742_v47 = vand.u32 4294901760, %v5118_v42 }
  0xca   : > { %2673 = vmatpush1.msra.mxu0 %v2439_v32  ;;  %2591 = vmatprep.subr.mxu1 %v27526_v20  ;;  %v3372_v7 = vsub.f32 %v3370_v56, %v3371_v61  ;;  %v4757_v38 = vsub.f32 %v4182_v29, %v27715_v34 }
  0xcb   : > { %2475 = vmatprep.mubr.f32.mxu1 %v27181_v0  ;;  %2706 = vmatprep.mubr.f32.mxu0 %v27181_v0  ;;  %v3376_v59 = vsub.f32 %v3255_v44, %v27610_v54 }
  0xcc   : > { %26319 = vmatprep.subr.mxu0 %v27181_v0  ;;  %2477 = vmatmul.mubr.f32.vlgmr.msra.gmra.mxu1 %v27521_v18  ;;  %v3373_v14 = vand.u32 4294901760, %v3372_v7  ;;  %v4758_v45 = vand.u32 4294901760, %v4757_v38 }
  0xcd   : > { %2593 = vmatpush1.msra.mxu1 %v27538_v22  ;;  %2708 = vmatmul.mubr.f32.vlgmr.msra.gmra.mxu0 %v27521_v18  ;;  %v3377_v4 = vand.u32 4294901760, %v3376_v59 }
  0xce   : > { %26320 = vmatpush3.msra.mxu0 %v27574_v37  ;;  %2745 = vmatprep.subr.mxu1 %v27526_v20  ;;  %v4178_v20 = vsel %vm459_vm2, %v27281_v2, 0  ;;  %v3836_v2 = vsub.f32 %v3834_v16, %v3835_v9  ;;  %v4759_v49 = vsub.f32 %v4757_v38, %v4758_v45 }
  0xcf   : > { %2626 = vmatprep.mubr.f32.mxu1 %v27181_v0  ;;  %26321 = vmatprep.mubr.msk.f32.mxu0 %vm27198_vm4, %v27181_v0  ;;  %v3378_v12 = vsub.f32 %v3376_v59, %v3377_v4  ;;  %v27677_v3 = vand.u32 4294901760, %v4178_v20 }
  0xd0   : > { %26329 = vmatprep.subr.mxu0 %v27181_v0  ;;  %2630 = vmatmul.mubr.f32.vlgmr.msra.gmra.mxu1 %v27548_v25  ;;  %v4760_v44 = vand.u32 4294901760, %v4759_v49 }
  0xd1   : > { %2747 = vmatpush1.msra.mxu1 %v27538_v22  ;;  %26322 = vmatmul.mubr.f32.vlgmr.msra.gmra.mxu0 %v2394_v36  ;;  %v3379_v11 = vand.u32 4294901760, %v3378_v12  ;;  %v4299_v24 = vsub.f32 %v4178_v20, %v27677_v3  ;;  %v396_v36 = vld [vmem:[%s30126_s3 + $0x28] sm:$0xff] }
  0xd2   : > { %26330 = vmatpush3.msra.mxu0 %v2896_v46  ;;  %2780 = vmatprep.mubr.f32.mxu1 %v27181_v0  ;;  %v5114_v41 = vsel %vm455_vm0, %v396_v36, 0 }
  0xd3   : > { %26324 = vmatprep.subr.mxu1 %v27181_v0  ;;  %26331 = vmatprep.mubr.msk.f32.mxu0 %vm27198_vm4, %v27181_v0  ;;  %v4300_v28 = vand.u32 4294901760, %v4299_v24  ;;  %v27737_v46 = vand.u32 4294901760, %v5114_v41 }
  0xd4   : > { %26339 = vmatprep.subr.mxu0 %v27181_v0  ;;  %2782 = vmatmul.mubr.f32.vlgmr.msra.gmra.mxu1 %v27521_v18 }
  0xd5   : > { %26325 = vmatpush3.msra.mxu1 %v2899_v60  ;;  %26332 = vmatmul.mubr.f32.vlgmr.msra.gmra.mxu0 %v27534_v21  ;;  %v27680_v21 = vsub.f32 %v4176_v15, %v27664_v19  ;;  %v4301_v33 = vsub.f32 %v4299_v24, %v4300_v28 }
  0xd6   : > { %26340 = vmatpush3.msra.mxu0 %v2897_v51  ;;  %26326 = vmatprep.mubr.msk.f32.mxu1 %vm27198_vm4, %v27181_v0  ;;  %v27754_v51 = vand.u32 4294901760, %v5116_v48 }
  0xd7   : > { %3292 = vmatprep.subr.mxu0 %v27598_v52  ;;  %26334 = vmatprep.subr.mxu1 %v27181_v0  ;;  %v27692_v23 = vand.u32 4294901760, %v27680_v21 }
  0xd8   : > { %26341 = vmatprep.mubr.msk.f32.mxu0 %vm27198_vm4, %v27181_v0  ;;  %26327 = vmatmul.mubr.f32.vlgmr.msra.gmra.mxu1 %v27521_v18  ;;  %v5238_v55 = vsub.f32 %v5116_v48, %v27754_v51 }
  0xd9   : > { %26335 = vmatpush3.msra.mxu1 %v27574_v37  ;;  %26342 = vmatmul.mubr.f32.vlgmr.msra.gmra.mxu0 %v27521_v18  ;;  %v4254_v27 = vsub.f32 %v27680_v21, %v27692_v23 }
  0xda   : > { %3294 = vmatpush1.msra.mxu0 %v27610_v54  ;;  %26336 = vmatprep.mubr.msk.f32.mxu1 %vm27198_vm4, %v27181_v0 }
  0xdb   : > { %3453 = vmatprep.subr.mxu0 %v3370_v56  ;;  %26344 = vmatprep.subr.mxu1 %v27181_v0  ;;  %v4255_v32 = vand.u32 4294901760, %v4254_v27 }
  0xdc   : > { %3327 = vmatprep.mubr.f32.mxu0 %v27181_v0  ;;  %26337 = vmatmul.mubr.f32.vlgmr.msra.gmra.mxu1 %v27548_v25  ;;  %v3837_v25 = vand.u32 4294901760, %v3836_v2 }
  0xdd   : > { %26345 = vmatpush3.msra.mxu1 %v27574_v37  ;;  %3333 = vmatmul.mubr.f32.vlgmr.msra.gmra.mxu0 %v3332_v8  ;;  %v4302_v37 = vand.u32 4294901760, %v4301_v33  ;;  %v6979_v33 = vpop.permute.xlu0 %6978 }
  0xde   : > { %3456 = vmatpush1.msra.mxu0 %v3376_v59  ;;  %3374 = vmatprep.subr.mxu1 %v3373_v14  ;;  %v5239_v59 = vand.u32 4294901760, %v5238_v55 }
  0xdf   : > { %3607 = vmatprep.subr.mxu0 %v3371_v61  ;;  %26346 = vmatprep.mubr.msk.f32.mxu1 %vm27198_vm4, %v27181_v0 }
  0xe0   : > { %3489 = vmatprep.mubr.f32.mxu0 %v27181_v0  ;;  %26347 = vmatmul.mubr.f32.vlgmr.msra.gmra.mxu1 %v27521_v18  ;;  %v27671_v18 = vand.u32 4294901760, %v4180_v17  ;;  %v5240_v6 = vsub.f32 %v5238_v55, %v5239_v59 }
  0xe1   : > { %3380 = vmatpush1.msra.mxu1 %v3379_v11  ;;  %3492 = vmatmul.mubr.f32.vlgmr.msra.gmra.mxu0 %v27606_v53  ;;  %v6977_v40 = vpop.permute.xlu0 %6976 }
  0xe2   : > { %3611 = vmatpush1.msra.mxu0 %v3377_v4  ;;  %3529 = vmatprep.subr.mxu1 %v27598_v52  ;;  %v4293_v22 = vsub.f32 %v4180_v17, %v27671_v18  ;;  %v6044_v17 = vsel %vm6043_vm9, %v6038_v13, %v6040_v62 }
  0xe3   : > { %3413 = vmatprep.mubr.f32.mxu1 %v27181_v0  ;;  %3644 = vmatprep.mubr.f32.mxu0 %v27181_v0 }
  0xe4   : > { %26349 = vmatprep.subr.mxu0 %v27181_v0  ;;  %3415 = vmatmul.mubr.f32.vlgmr.msra.gmra.mxu1 %v27593_v50  ;;  %v4294_v26 = vand.u32 4294901760, %v4293_v22 }
  0xe5   : > { %3531 = vmatpush1.msra.mxu1 %v27610_v54  ;;  %3646 = vmatmul.mubr.f32.vlgmr.msra.gmra.mxu0 %v27593_v50 }
  0xe6   : > { %26350 = vmatpush3.msra.mxu0 %v27646_v10  ;;  %3683 = vmatprep.subr.mxu1 %v27598_v52  ;;  %v4295_v30 = vsub.f32 %v4293_v22, %v4294_v26  ;;  %v5232_v52 = vsub.f32 %v5118_v42, %v27742_v47 }
  0xe7   : > { %3564 = vmatprep.mubr.f32.mxu1 %v27181_v0  ;;  %26351 = vmatprep.mubr.msk.f32.mxu0 %vm27198_vm4, %v27181_v0 }
  0xe8   : > { %26359 = vmatprep.subr.mxu0 %v27181_v0  ;;  %3568 = vmatmul.mubr.f32.vlgmr.msra.gmra.mxu1 %v27620_v57  ;;  %v4296_v1 = vand.u32 4294901760, %v4295_v30  ;;  %v5233_v56 = vand.u32 4294901760, %v5232_v52 }
  0xe9   : > { %3685 = vmatpush1.msra.mxu1 %v27610_v54  ;;  %26352 = vmatmul.mubr.f32.vlgmr.msra.gmra.mxu0 %v3332_v8  ;;  %v5109_v54 = vpop.permute.xlu1 %5108  ;;  %v397_v8 = vld [vmem:[%s30126_s3 + $0x30] sm:$0xff] }
  0xea   : > { %26360 = vmatpush3.msra.mxu0 %v3834_v16  ;;  %3718 = vmatprep.mubr.f32.mxu1 %v27181_v0  ;;  %v5234_v61 = vsub.f32 %v5232_v52, %v5233_v56  ;;  %v6053_v14 = vsel %vm455_vm0, %v397_v8, 0  ;;  %v5241_v16 = vand.u32 4294901760, %v5240_v6 }
  0xeb   : > { %26354 = vmatprep.subr.mxu1 %v27181_v0  ;;  %26361 = vmatprep.mubr.msk.f32.mxu0 %vm27198_vm4, %v27181_v0  ;;  %v27809_v20 = vand.u32 4294901760, %v6053_v14 }
  0xec   : > { %26369 = vmatprep.subr.mxu0 %v27181_v0  ;;  %3720 = vmatmul.mubr.f32.vlgmr.msra.gmra.mxu1 %v27593_v50 }
  0xed   : > { %26355 = vmatpush3.msra.mxu1 %v3837_v25  ;;  %26362 = vmatmul.mubr.f32.vlgmr.msra.gmra.mxu0 %v27606_v53  ;;  %v6042_v7 = vpop.permute.xlu1 %6041 }
  0xee   : > { %26370 = vmatpush3.msra.mxu0 %v3835_v9  ;;  %26356 = vmatprep.mubr.msk.f32.mxu1 %vm27198_vm4, %v27181_v0  ;;  %v6045_v12 = vsel %vm6043_vm9, %v6040_v62, %v6042_v7 }
  0xef   : > { %26364 = vmatprep.subr.mxu1 %v27181_v0  ;;  %26371 = vmatprep.mubr.msk.f32.mxu0 %vm27198_vm4, %v27181_v0  ;;  %v6057_v11 = vsel %vm459_vm2, %v6045_v12, 0  ;;  %v399_v12 = vld [vmem:[%s30126_s3 + $0x40] sm:$0xff] }
  0xf0   : > { %26357 = vmatmul.mubr.f32.vlgmr.msra.gmra.mxu1 %v27593_v50  ;;  %4215 = vmatprep.subr.mxu0 %v27671_v18 }
  0xf1   : > { %26365 = vmatpush3.msra.mxu1 %v27646_v10  ;;  %26372 = vmatmul.mubr.f32.vlgmr.msra.gmra.mxu0 %v27593_v50 }
  0xf2   : > { %26366 = vmatprep.mubr.msk.f32.mxu1 %vm27198_vm4, %v27181_v0  ;;  %26374 = vmatprep.subr.mxu1 %v27181_v0 }
  0xf3   : > { %4217 = vmatpush1.msra.mxu0 %v27677_v3  ;;  %4250 = vmatprep.mubr.f32.mxu0 %v27181_v0 }
  0xf4   : > { %26367 = vmatmul.mubr.f32.vlgmr.msra.gmra.mxu1 %v27620_v57  ;;  %4376 = vmatprep.subr.mxu0 %v4293_v22  ;;  %v5112_v57 = vsel %vm5111_vm8, %v5103_v35, %v5109_v54 }
  0xf5   : > { %26375 = vmatpush3.msra.mxu1 %v27646_v10  ;;  %4256 = vmatmul.mubr.f32.vlgmr.msra.gmra.mxu0 %v4255_v32  ;;  %v5121_v60 = vsel %vm459_vm2, %v5112_v57, 0  ;;  %v5235_v10 = vand.u32 4294901760, %v5234_v61 }
  0xf6   : > { %26376 = vmatprep.mubr.msk.f32.mxu1 %vm27198_vm4, %v27181_v0  ;;  %4379 = vmatpush1.msra.mxu0 %v4299_v24  ;;  %v27790_v4 = vand.u32 4294901760, %v5121_v60  ;;  %v6048_v24 = vpop.permute.xlu1 %6047 }
  0xf7   : > { %4412 = vmatprep.mubr.f32.mxu0 %v27181_v0  ;;  %4297 = vmatprep.subr.mxu1 %v4296_v1 }
  0xf8   : > { %26377 = vmatmul.mubr.f32.vlgmr.msra.gmra.mxu1 %v27593_v50  ;;  %4530 = vmatprep.subr.mxu0 %v4294_v26  ;;  %v27750_v50 = vsub.f32 %v5114_v41, %v27737_v46  ;;  %v5696_v15 = vsub.f32 %v5121_v60, %v27790_v4 }
  0xf9   : > { %4415 = vmatmul.mubr.f32.vlgmr.msra.gmra.mxu0 %v27680_v21  ;;  %4303 = vmatpush1.msra.mxu1 %v4302_v37  ;;  %v398_v37 = vld [vmem:[%s30126_s3 + $0x38] sm:$0xff] }
  0xfa   : > { %4336 = vmatprep.mubr.f32.mxu1 %v27181_v0  ;;  %4534 = vmatpush1.msra.mxu0 %v4300_v28  ;;  %v27764_v53 = vand.u32 4294901760, %v27750_v50  ;;  %v5697_v9 = vand.u32 4294901760, %v5696_v15  ;;  %v6051_v28 = vsel %vm6050_vm10, %v6042_v7, %v6048_v24  ;;  %v6981_v36 = vpop.permute.xlu1 %6980  ;;  %v6992_v41 = vsel %vm455_vm0, %v398_v37, 0 }
  0xfb   : > { %4567 = vmatprep.mubr.f32.mxu0 %v27181_v0  ;;  %4452 = vmatprep.subr.mxu1 %v27671_v18  ;;  %v6060_v31 = vsel %vm459_vm2, %v6051_v28, 0  ;;  %v6984_v39 = vsel %vm6982_vm11, %v6979_v33, %v6981_v36  ;;  %v27881_v48 = vand.u32 4294901760, %v6992_v41 }
  0xfc   : > { %4338 = vmatmul.mubr.f32.vlgmr.msra.gmra.mxu1 %v27664_v19  ;;  %26379 = vmatprep.subr.mxu0 %v27181_v0  ;;  %v5193_v58 = vsub.f32 %v27750_v50, %v27764_v53  ;;  %v5698_v2 = vsub.f32 %v5696_v15, %v5697_v9  ;;  %v27862_v1 = vand.u32 4294901760, %v6060_v31 }
  0xfd   : > { %4569 = vmatmul.mubr.f32.vlgmr.msra.gmra.mxu0 %v27664_v19  ;;  %4454 = vmatpush1.msra.mxu1 %v27677_v3 }
  0xfe   : > { %4487 = vmatprep.mubr.f32.mxu1 %v27181_v0  ;;  %26380 = vmatpush3.msra.mxu0 %v27715_v34  ;;  %v5194_v63 = vand.u32 4294901760, %v5193_v58  ;;  %v5699_v26 = vand.u32 4294901760, %v5698_v2  ;;  %v6635_v42 = vsub.f32 %v6060_v31, %v27862_v1 }
  0xff   : > { %26381 = vmatprep.mubr.msk.f32.mxu0 %vm27198_vm4, %v27181_v0  ;;  %4606 = vmatprep.subr.mxu1 %v27671_v18  ;;  %v27814_v18 = vand.u32 4294901760, %v6057_v11 }
 0x100   : > { %4491 = vmatmul.mubr.f32.vlgmr.msra.gmra.mxu1 %v27692_v23  ;;  %26389 = vmatprep.subr.mxu0 %v27181_v0  ;;  %v6636_v49 = vand.u32 4294901760, %v6635_v42 }
 0x101   : > { %26382 = vmatmul.mubr.f32.vlgmr.msra.gmra.mxu0 %v4255_v32  ;;  %4608 = vmatpush1.msra.mxu1 %v27677_v3  ;;  %v27822_v3 = vsub.f32 %v6053_v14, %v27809_v20  ;;  %v6171_v22 = vsub.f32 %v6057_v11, %v27814_v18 }
 0x102   : > { %26390 = vmatpush3.msra.mxu0 %v4757_v38  ;;  %4641 = vmatprep.mubr.f32.mxu1 %v27181_v0 }
 0x103   : > { %26391 = vmatprep.mubr.msk.f32.mxu0 %vm27198_vm4, %v27181_v0  ;;  %26399 = vmatprep.subr.mxu0 %v27181_v0  ;;  %v6172_v27 = vand.u32 4294901760, %v6171_v22 }
 0x104   : > { %4643 = vmatmul.mubr.f32.vlgmr.msra.gmra.mxu1 %v27664_v19  ;;  %26384 = vmatprep.subr.mxu1 %v27181_v0 }
 0x105   : > { %26392 = vmatmul.mubr.f32.vlgmr.msra.gmra.mxu0 %v27680_v21  ;;  %26385 = vmatpush3.msra.mxu1 %v4760_v44  ;;  %v6173_v32 = vsub.f32 %v6171_v22, %v6172_v27  ;;  %v6637_v44 = vsub.f32 %v6635_v42, %v6636_v49 }
 0x106   : > { %26400 = vmatpush3.msra.mxu0 %v4758_v45  ;;  %26386 = vmatprep.mubr.msk.f32.mxu1 %vm27198_vm4, %v27181_v0  ;;  %v6996_v45 = vsel %vm459_vm2, %v6984_v39, 0  ;;  %v400_v39 = vld [vmem:[%s30126_s3 + $0x48] sm:$0xff] }
 0x107   : > { %5154 = vmatprep.subr.mxu0 %v27742_v47  ;;  %26401 = vmatprep.mubr.msk.f32.mxu0 %vm27198_vm4, %v27181_v0  ;;  %v6174_v38 = vand.u32 4294901760, %v6173_v32  ;;  %v6638_v57 = vand.u32 4294901760, %v6637_v44 }
 0x108   : > { %26387 = vmatmul.mubr.f32.vlgmr.msra.gmra.mxu1 %v27664_v19  ;;  %26394 = vmatprep.subr.mxu1 %v27181_v0 }
 0x109   : > { %26402 = vmatmul.mubr.f32.vlgmr.msra.gmra.mxu0 %v27664_v19  ;;  %26395 = vmatpush3.msra.mxu1 %v27715_v34 }
 0x10a   : > { %5156 = vmatpush1.msra.mxu0 %v27754_v51  ;;  %26396 = vmatprep.mubr.msk.f32.mxu1 %vm27198_vm4, %v27181_v0 }
 0x10b   : > { %5315 = vmatprep.subr.mxu0 %v5232_v52  ;;  %26404 = vmatprep.subr.mxu1 %v27181_v0 }
 0x10c   : > { %5189 = vmatprep.mubr.f32.mxu0 %v27181_v0  ;;  %26397 = vmatmul.mubr.f32.vlgmr.msra.gmra.mxu1 %v27692_v23  ;;  %v27836_v23 = vand.u32 4294901760, %v27822_v3 }
 0x10d   : > { %26405 = vmatpush3.msra.mxu1 %v27715_v34  ;;  %5195 = vmatmul.mubr.f32.vlgmr.msra.gmra.mxu0 %v5194_v63 }
 0x10e   : > { %5318 = vmatpush1.msra.mxu0 %v5238_v55  ;;  %5236 = vmatprep.subr.mxu1 %v5235_v10  ;;  %v6132_v29 = vsub.f32 %v27822_v3, %v27836_v23  ;;  %v6987_v55 = vpop.permute.xlu1 %6986 }
 0x10f   : > { %5469 = vmatprep.subr.mxu0 %v5233_v56  ;;  %26406 = vmatprep.mubr.msk.f32.mxu1 %vm27198_vm4, %v27181_v0 }
 0x110   : > { %5351 = vmatprep.mubr.f32.mxu0 %v27181_v0  ;;  %26407 = vmatmul.mubr.f32.vlgmr.msra.gmra.mxu1 %v27664_v19  ;;  %v6055_v19 = vsel %vm459_vm2, %v6044_v17, 0  ;;  %v6133_v34 = vand.u32 4294901760, %v6132_v29 }
 0x111   : > { %5242 = vmatpush1.msra.mxu1 %v5241_v16  ;;  %5354 = vmatmul.mubr.f32.vlgmr.msra.gmra.mxu0 %v27750_v50  ;;  %v27826_v21 = vand.u32 4294901760, %v6055_v19  ;;  %v7931_v16 = vsel %vm455_vm0, %v399_v12, 0 }
 0x112   : > { %5473 = vmatpush1.msra.mxu0 %v5239_v59  ;;  %5391 = vmatprep.subr.mxu1 %v27742_v47  ;;  %v6990_v59 = vsel %vm6989_vm12, %v6981_v36, %v6987_v55  ;;  %v7920_v10 = vpop.permute.xlu1 %7919 }
 0x113   : > { %5275 = vmatprep.mubr.f32.mxu1 %v27181_v0  ;;  %5506 = vmatprep.mubr.f32.mxu0 %v27181_v0  ;;  %v6177_v25 = vsub.f32 %v6055_v19, %v27826_v21  ;;  %v6999_v62 = vsel %vm459_vm2, %v6990_v59, 0  ;;  %v27953_v19 = vand.u32 4294901760, %v7931_v16 }
 0x114   : > { %26409 = vmatprep.subr.mxu0 %v27181_v0  ;;  %5277 = vmatmul.mubr.f32.vlgmr.msra.gmra.mxu1 %v27737_v46  ;;  %v27934_v7 = vand.u32 4294901760, %v6999_v62 }
 0x115   : > { %5393 = vmatpush1.msra.mxu1 %v27754_v51  ;;  %5508 = vmatmul.mubr.f32.vlgmr.msra.gmra.mxu0 %v27737_v46  ;;  %v6178_v30 = vand.u32 4294901760, %v6177_v25  ;;  %v27966_v2 = vsub.f32 %v7931_v16, %v27953_v19 }
 0x116   : > { %26410 = vmatpush3.msra.mxu0 %v27790_v4  ;;  %5545 = vmatprep.subr.mxu1 %v27742_v47  ;;  %v6983_v47 = vsel %vm6982_vm11, %v6977_v40, %v6979_v33  ;;  %v7574_v11 = vsub.f32 %v6999_v62, %v27934_v7 }
 0x117   : > { %5426 = vmatprep.mubr.f32.mxu1 %v27181_v0  ;;  %26411 = vmatprep.mubr.msk.f32.mxu0 %vm27198_vm4, %v27181_v0  ;;  %v6179_v35 = vsub.f32 %v6177_v25, %v6178_v30 }
 0x118   : > { %26419 = vmatprep.subr.mxu0 %v27181_v0  ;;  %5430 = vmatmul.mubr.f32.vlgmr.msra.gmra.mxu1 %v27764_v53 }
 0x119   : > { %5547 = vmatpush1.msra.mxu1 %v27754_v51  ;;  %26412 = vmatmul.mubr.f32.vlgmr.msra.gmra.mxu0 %v5194_v63  ;;  %v6180_v43 = vand.u32 4294901760, %v6179_v35  ;;  %v27894_v51 = vsub.f32 %v6992_v41, %v27881_v48 }
 0x11a   : > { %26420 = vmatpush3.msra.mxu0 %v5696_v15  ;;  %5580 = vmatprep.mubr.f32.mxu1 %v27181_v0 }
 0x11b   : > { %26414 = vmatprep.subr.mxu1 %v27181_v0  ;;  %26421 = vmatprep.mubr.msk.f32.mxu0 %vm27198_vm4, %v27181_v0  ;;  %v27908_v54 = vand.u32 4294901760, %v27894_v51 }
 0x11c   : > { %26429 = vmatprep.subr.mxu0 %v27181_v0  ;;  %5582 = vmatmul.mubr.f32.vlgmr.msra.gmra.mxu1 %v27737_v46 }
 0x11d   : > { %26415 = vmatpush3.msra.mxu1 %v5699_v26  ;;  %26422 = vmatmul.mubr.f32.vlgmr.msra.gmra.mxu0 %v27750_v50  ;;  %v27886_v50 = vand.u32 4294901760, %v6996_v45  ;;  %v7071_v60 = vsub.f32 %v27894_v51, %v27908_v54  ;;  %v7926_v26 = vpop.permute.xlu1 %7925 }
 0x11e   : > { %26430 = vmatpush3.msra.mxu0 %v5697_v9  ;;  %26416 = vmatprep.mubr.msk.f32.mxu1 %vm27198_vm4, %v27181_v0 }
 0x11f   : > { %6093 = vmatprep.subr.mxu0 %v27814_v18  ;;  %26424 = vmatprep.subr.mxu1 %v27181_v0  ;;  %v7072_v6 = vand.u32 4294901760, %v7071_v60 }
 0x120   : > { %26431 = vmatprep.mubr.msk.f32.mxu0 %vm27198_vm4, %v27181_v0  ;;  %26417 = vmatmul.mubr.f32.vlgmr.msra.gmra.mxu1 %v27737_v46 }
 0x121   : > { %26425 = vmatpush3.msra.mxu1 %v27790_v4  ;;  %26432 = vmatmul.mubr.f32.vlgmr.msra.gmra.mxu0 %v27737_v46 }
 0x122   : > { %6095 = vmatpush1.msra.mxu0 %v27826_v21  ;;  %26426 = vmatprep.mubr.msk.f32.mxu1 %vm27198_vm4, %v27181_v0 }
 0x123   : > { %6254 = vmatprep.subr.mxu0 %v6171_v22  ;;  %26434 = vmatprep.subr.mxu1 %v27181_v0 }
 0x124   : > { %6128 = vmatprep.mubr.f32.mxu0 %v27181_v0  ;;  %26427 = vmatmul.mubr.f32.vlgmr.msra.gmra.mxu1 %v27764_v53  ;;  %v7110_v53 = vsub.f32 %v6996_v45, %v27886_v50 }
 0x125   : > { %26435 = vmatpush3.msra.mxu1 %v27790_v4  ;;  %6134 = vmatmul.mubr.f32.vlgmr.msra.gmra.mxu0 %v6133_v34  ;;  %v7918_v4 = vpop.permute.xlu0 %7917 }
 0x126   : > { %6257 = vmatpush1.msra.mxu0 %v6177_v25  ;;  %6175 = vmatprep.subr.mxu1 %v6174_v38  ;;  %v7111_v58 = vand.u32 4294901760, %v7110_v53  ;;  %v7923_v14 = vsel %vm7921_vm13, %v7918_v4, %v7920_v10  ;;  %v27980_v25 = vand.u32 4294901760, %v27966_v2  ;;  %v28011_v38 = vpop.permute.xlu1 %8862 }
 0x127   : > { %6408 = vmatprep.subr.mxu0 %v6172_v27  ;;  %26436 = vmatprep.mubr.msk.f32.mxu1 %vm27198_vm4, %v27181_v0  ;;  %v7935_v9 = vsel %vm459_vm2, %v7923_v14, 0 }
 0x128   : > { %6290 = vmatprep.mubr.f32.mxu0 %v27181_v0  ;;  %26437 = vmatmul.mubr.f32.vlgmr.msra.gmra.mxu1 %v27737_v46  ;;  %v6994_v46 = vsel %vm459_vm2, %v6983_v47, 0  ;;  %v7112_v63 = vsub.f32 %v7110_v53, %v7111_v58  ;;  %v8010_v31 = vsub.f32 %v27966_v2, %v27980_v25  ;;  %v8871_v47 = vsel %vm455_vm0, %v400_v39, 0 }
 0x129   : > { %6181 = vmatpush1.msra.mxu1 %v6180_v43  ;;  %6293 = vmatmul.mubr.f32.vlgmr.msra.gmra.mxu0 %v27822_v3  ;;  %v27898_v52 = vand.u32 4294901760, %v6994_v46  ;;  %v7916_v15 = vpop.permute.xlu0 %7915  ;;  %v28033_v44 = vand.u32 4294901760, %v8871_v47 }
 0x12a   : > { %6412 = vmatpush1.msra.mxu0 %v6178_v30  ;;  %6330 = vmatprep.subr.mxu1 %v27814_v18  ;;  %v7113_v13 = vand.u32 4294901760, %v7112_v63  ;;  %v7929_v30 = vsel %vm7928_vm14, %v7920_v10, %v7926_v26  ;;  %v28003_v35 = vand.u32 4294901760, %v8010_v31  ;;  %v8865_v10 = vpop.permute.xlu1 %8864 }
 0x12b   : > { %6214 = vmatprep.mubr.f32.mxu1 %v27181_v0  ;;  %6445 = vmatprep.mubr.f32.mxu0 %v27181_v0  ;;  %v7116_v56 = vsub.f32 %v6994_v46, %v27898_v52  ;;  %v7938_v33 = vsel %vm459_vm2, %v7929_v30, 0  ;;  %v28047_v59 = vsub.f32 %v8871_v47, %v28033_v44 }
 0x12c   : > { %26439 = vmatprep.subr.mxu0 %v27181_v0  ;;  %6216 = vmatmul.mubr.f32.vlgmr.msra.gmra.mxu1 %v27809_v20  ;;  %v28008_v36 = vand.u32 4294901760, %v7938_v33 }
 0x12d   : > { %6332 = vmatpush1.msra.mxu1 %v27826_v21  ;;  %6447 = vmatmul.mubr.f32.vlgmr.msra.gmra.mxu0 %v27809_v20  ;;  %v7117_v61 = vand.u32 4294901760, %v7116_v56 }
 0x12e   : > { %26440 = vmatpush3.msra.mxu0 %v27862_v1  ;;  %6484 = vmatprep.subr.mxu1 %v27814_v18  ;;  %v7922_v18 = vsel %vm7921_vm13, %v7916_v15, %v7918_v4  ;;  %v28065_v15 = vand.u32 4294901760, %v28047_v59 }
 0x12f   : > { %6365 = vmatprep.mubr.f32.mxu1 %v27181_v0  ;;  %26441 = vmatprep.mubr.msk.f32.mxu0 %vm27198_vm4, %v27181_v0  ;;  %v7118_v8 = vsub.f32 %v7116_v56, %v7117_v61 }
 0x130   : > { %26449 = vmatprep.subr.mxu0 %v27181_v0  ;;  %6369 = vmatmul.mubr.f32.vlgmr.msra.gmra.mxu1 %v27836_v23 }
 0x131   : > { %6486 = vmatpush1.msra.mxu1 %v27826_v21  ;;  %26442 = vmatmul.mubr.f32.vlgmr.msra.gmra.mxu0 %v6133_v34  ;;  %v7119_v17 = vand.u32 4294901760, %v7118_v8  ;;  %v27958_v21 = vand.u32 4294901760, %v7935_v9 }
 0x132   : > { %26450 = vmatpush3.msra.mxu0 %v6635_v42  ;;  %6519 = vmatprep.mubr.f32.mxu1 %v27181_v0 }
 0x133   : > { %26444 = vmatprep.subr.mxu1 %v27181_v0  ;;  %26451 = vmatprep.mubr.msk.f32.mxu0 %vm27198_vm4, %v27181_v0  ;;  %v8049_v24 = vsub.f32 %v7935_v9, %v27958_v21 }
 0x134   : > { %26459 = vmatprep.subr.mxu0 %v27181_v0  ;;  %6521 = vmatmul.mubr.f32.vlgmr.msra.gmra.mxu1 %v27809_v20 }
 0x135   : > { %26445 = vmatpush3.msra.mxu1 %v6638_v57  ;;  %26452 = vmatmul.mubr.f32.vlgmr.msra.gmra.mxu0 %v27822_v3  ;;  %v7575_v3 = vand.u32 4294901760, %v7574_v11  ;;  %v8050_v29 = vand.u32 4294901760, %v8049_v24 }
 0x136   : > { %26460 = vmatpush3.msra.mxu0 %v6636_v49  ;;  %26446 = vmatprep.mubr.msk.f32.mxu1 %vm27198_vm4, %v27181_v0  ;;  %v28024_v49 = vsub.f32 %v7938_v33, %v28008_v36 }
 0x137   : > { %7032 = vmatprep.subr.mxu0 %v27886_v50  ;;  %26454 = vmatprep.subr.mxu1 %v27181_v0  ;;  %v8051_v34 = vsub.f32 %v8049_v24, %v8050_v29 }
 0x138   : > { %26461 = vmatprep.mubr.msk.f32.mxu0 %vm27198_vm4, %v27181_v0  ;;  %26447 = vmatmul.mubr.f32.vlgmr.msra.gmra.mxu1 %v27809_v20 }
 0x139   : > { %26455 = vmatpush3.msra.mxu1 %v27862_v1  ;;  %26462 = vmatmul.mubr.f32.vlgmr.msra.gmra.mxu0 %v27809_v20  ;;  %v8052_v41 = vand.u32 4294901760, %v8051_v34 }
 0x13a   : > { %7034 = vmatpush1.msra.mxu0 %v27898_v52  ;;  %26456 = vmatprep.mubr.msk.f32.mxu1 %vm27198_vm4, %v27181_v0 }
 0x13b   : > { %7193 = vmatprep.subr.mxu0 %v7110_v53  ;;  %26464 = vmatprep.subr.mxu1 %v27181_v0 }
 0x13c   : > { %7067 = vmatprep.mubr.f32.mxu0 %v27181_v0  ;;  %26457 = vmatmul.mubr.f32.vlgmr.msra.gmra.mxu1 %v27836_v23  ;;  %v7576_v23 = vsub.f32 %v7574_v11, %v7575_v3 }
 0x13d   : > { %26465 = vmatpush3.msra.mxu1 %v27862_v1  ;;  %7073 = vmatmul.mubr.f32.vlgmr.msra.gmra.mxu0 %v7072_v6  ;;  %v8861_v1 = vpop.permute.xlu0 %8860 }
 0x13e   : > { %7196 = vmatpush1.msra.mxu0 %v7116_v56  ;;  %7114 = vmatprep.subr.mxu1 %v7113_v13  ;;  %v7577_v28 = vand.u32 4294901760, %v7576_v23  ;;  %v8866_v43 = vsel %vm436_vm3, %v8861_v1, %v28011_v38 }
 0x13f   : > { %7347 = vmatprep.subr.mxu0 %v7111_v58  ;;  %26466 = vmatprep.mubr.msk.f32.mxu1 %vm27198_vm4, %v27181_v0 }
 0x140   : > { %7229 = vmatprep.mubr.f32.mxu0 %v27181_v0  ;;  %26467 = vmatmul.mubr.f32.vlgmr.msra.gmra.mxu1 %v27809_v20  ;;  %v7933_v20 = vsel %vm459_vm2, %v7922_v18, 0 }
 0x141   : > { %7120 = vmatpush1.msra.mxu1 %v7119_v17  ;;  %7232 = vmatmul.mubr.f32.vlgmr.msra.gmra.mxu0 %v27894_v51  ;;  %v27970_v22 = vand.u32 4294901760, %v7933_v20  ;;  %v8856_v45 = vpop.permute.xlu0 %8855 }
 0x142   : > { %7351 = vmatpush1.msra.mxu0 %v7117_v61  ;;  %7269 = vmatprep.subr.mxu1 %v27886_v50 }
 0x143   : > { %7153 = vmatprep.mubr.f32.mxu1 %v27181_v0  ;;  %7384 = vmatprep.mubr.f32.mxu0 %v27181_v0  ;;  %v8055_v27 = vsub.f32 %v7933_v20, %v27970_v22 }
 0x144   : > { %26469 = vmatprep.subr.mxu0 %v27181_v0  ;;  %7155 = vmatmul.mubr.f32.vlgmr.msra.gmra.mxu1 %v27881_v48 }
 0x145   : > { %7271 = vmatpush1.msra.mxu1 %v27898_v52  ;;  %7386 = vmatmul.mubr.f32.vlgmr.msra.gmra.mxu0 %v27881_v48  ;;  %v8056_v32 = vand.u32 4294901760, %v8055_v27  ;;  %v9798_v34 = vpop.permute.xlu0 %9797 }
 0x146   : > { %26470 = vmatpush3.msra.mxu0 %v27934_v7  ;;  %7423 = vmatprep.subr.mxu1 %v27886_v50 }
 0x147   : > { %7304 = vmatprep.mubr.f32.mxu1 %v27181_v0  ;;  %26471 = vmatprep.mubr.msk.f32.mxu0 %vm27198_vm4, %v27181_v0  ;;  %v8057_v37 = vsub.f32 %v8055_v27, %v8056_v32 }
 0x148   : > { %26479 = vmatprep.subr.mxu0 %v27181_v0  ;;  %7308 = vmatmul.mubr.f32.vlgmr.msra.gmra.mxu1 %v27908_v54 }
 0x149   : > { %7425 = vmatpush1.msra.mxu1 %v27898_v52  ;;  %26472 = vmatmul.mubr.f32.vlgmr.msra.gmra.mxu0 %v7072_v6  ;;  %v8058_v50 = vand.u32 4294901760, %v8057_v37  ;;  %v8869_v52 = vsel %vm436_vm3, %v8856_v45, %v8861_v1  ;;  %v401_v45 = vld [vmem:[%s30126_s3 + $0x50] sm:$0xff] }
 0x14a   : > { %26480 = vmatpush3.msra.mxu0 %v7574_v11  ;;  %7458 = vmatprep.mubr.f32.mxu1 %v27181_v0  ;;  %v8874_v56 = vsel %vm459_vm2, %v8869_v52, 0 }
 0x14b   : > { %26474 = vmatprep.subr.mxu1 %v27181_v0  ;;  %26481 = vmatprep.mubr.msk.f32.mxu0 %vm27198_vm4, %v27181_v0  ;;  %v28051_v61 = vand.u32 4294901760, %v8874_v56 }
 0x14c   : > { %26489 = vmatprep.subr.mxu0 %v27181_v0  ;;  %7460 = vmatmul.mubr.f32.vlgmr.msra.gmra.mxu1 %v27881_v48 }
 0x14d   : > { %26475 = vmatpush3.msra.mxu1 %v7577_v28  ;;  %26482 = vmatmul.mubr.f32.vlgmr.msra.gmra.mxu0 %v27894_v51  ;;  %v8876_v51 = vsel %vm459_vm2, %v8866_v43, 0  ;;  %v28070_v11 = vsub.f32 %v8874_v56, %v28051_v61  ;;  %v28105_v43 = vpop.permute.xlu1 %9799 }
 0x14e   : > { %26490 = vmatpush3.msra.mxu0 %v7575_v3  ;;  %26476 = vmatprep.mubr.msk.f32.mxu1 %vm27198_vm4, %v27181_v0 }
 0x14f   : > { %7971 = vmatprep.subr.mxu0 %v27958_v21  ;;  %26484 = vmatprep.subr.mxu1 %v27181_v0 }
 0x150   : > { %26491 = vmatprep.mubr.msk.f32.mxu0 %vm27198_vm4, %v27181_v0  ;;  %26477 = vmatmul.mubr.f32.vlgmr.msra.gmra.mxu1 %v27881_v48 }
 0x151   : > { %26485 = vmatpush3.msra.mxu1 %v27934_v7  ;;  %26492 = vmatmul.mubr.f32.vlgmr.msra.gmra.mxu0 %v27881_v48 }
 0x152   : > { %7973 = vmatpush1.msra.mxu0 %v27970_v22  ;;  %26486 = vmatprep.mubr.msk.f32.mxu1 %vm27198_vm4, %v27181_v0 }
 0x153   : > { %8132 = vmatprep.subr.mxu0 %v8049_v24  ;;  %26494 = vmatprep.subr.mxu1 %v27181_v0 }
 0x154   : > { %8006 = vmatprep.mubr.f32.mxu0 %v27181_v0  ;;  %v540_v40 = vpop.f32.mrf.mxu0  ;;  %26487 = vmatmul.mubr.f32.vlgmr.msra.gmra.mxu1 %v27908_v54  ;;  %v8514_v54 = vand.u32 4294901760, %v28024_v49 }
 0x155   : > { %26495 = vmatpush3.msra.mxu1 %v27934_v7  ;;  %8012 = vmatmul.mubr.f32.vlgmr.msra.gmra.mxu0 %v28003_v35 }
 0x156   : > { %8135 = vmatpush1.msra.mxu0 %v8055_v27  ;;  %8053 = vmatprep.subr.mxu1 %v8052_v41  ;;  %v542_v42 = vpop.f32.mrf.mxu0  ;;  %v8515_v6 = vsub.f32 %v28024_v49, %v8514_v54  ;;  %v8950_v27 = vsub.f32 %v28047_v59, %v28065_v15 }
 0x157   : > { %8286 = vmatprep.subr.mxu0 %v8050_v29  ;;  %26496 = vmatprep.mubr.msk.f32.mxu1 %vm27198_vm4, %v27181_v0  ;;  %v8996_v29 = vand.u32 4294901760, %v28070_v11 }
 0x158   : > { %8168 = vmatprep.mubr.f32.mxu0 %v27181_v0  ;;  %v699_v46 = vpop.f32.mrf.mxu0  ;;  %26497 = vmatmul.mubr.f32.vlgmr.msra.gmra.mxu1 %v27881_v48  ;;  %v28039_v48 = vand.u32 4294901760, %v8876_v51  ;;  %v8516_v3 = vand.u32 4294901760, %v8515_v6  ;;  %v28095_v37 = vand.u32 4294901760, %v8950_v27 }
 0x159   : > { %8059 = vmatpush1.msra.mxu1 %v8058_v50  ;;  %8171 = vmatmul.mubr.f32.vlgmr.msra.gmra.mxu0 %v27966_v2 }
 0x15a   : > { %8290 = vmatpush1.msra.mxu0 %v8056_v32  ;;  %8208 = vmatprep.subr.mxu1 %v27958_v21  ;;  %v701_v53 = vpop.f32.mrf.mxu0  ;;  %v28058_v7 = vsub.f32 %v8876_v51, %v28039_v48 }
 0x15b   : > { %8092 = vmatprep.mubr.f32.mxu1 %v27181_v0  ;;  %8323 = vmatprep.mubr.f32.mxu0 %v27181_v0 }
 0x15c   : > { %26499 = vmatprep.subr.mxu0 %v27181_v0  ;;  %v622_v55 = vpop.f32.mrf.mxu1  ;;  %8094 = vmatmul.mubr.f32.vlgmr.msra.gmra.mxu1 %v27953_v19 }
 0x15d   : > { %v623_v57 = vadd.f32 %v622_v55, %v540_v40  ;;  %v853_v58 = vpop.f32.mrf.mxu0  ;;  %8210 = vmatpush1.msra.mxu1 %v27970_v22  ;;  %8325 = vmatmul.mubr.f32.vlgmr.msra.gmra.mxu0 %v27953_v19  ;;  %v9808_v55 = vsel %vm455_vm0, %v401_v45, 0 }
 0x15e   : > { %26500 = vmatpush3.msra.mxu0 %v28008_v36  ;;  %8362 = vmatprep.subr.mxu1 %v27958_v21  ;;  %v624_v60 = vpop.f32.mrf.mxu1  ;;  %v8867_v21 = vsel %vm436_vm3, %v28011_v38, %v8865_v10 }
 0x15f   : > { %v625_v62 = vadd.f32 %v624_v60, %v542_v42  ;;  %v855_v63 = vpop.f32.mrf.mxu0  ;;  %8243 = vmatprep.mubr.f32.mxu1 %v27181_v0  ;;  %26501 = vmatprep.mubr.msk.f32.mxu0 %vm27198_vm4, %v27181_v0  ;;  %v700_v4 = vadd.f32 %v699_v46, %v623_v57  ;;  %v8878_v32 = vsel %vm459_vm2, %v8867_v21, 0  ;;  %v8997_v42 = vsub.f32 %v28070_v11, %v8996_v29 }
 0x160   : > { %26509 = vmatprep.subr.mxu0 %v27181_v0  ;;  %v775_v8 = vpop.f32.mrf.mxu1  ;;  %8247 = vmatmul.mubr.f32.vlgmr.msra.gmra.mxu1 %v27980_v25  ;;  %v28100_v39 = vand.u32 4294901760, %v8878_v32 }
 0x161   : > { %v776_v12 = vadd.f32 %v775_v8, %v700_v4  ;;  %v1004_v13 = vpop.f32.mrf.mxu0  ;;  %8364 = vmatpush1.msra.mxu1 %v27970_v22  ;;  %26502 = vmatmul.mubr.f32.vlgmr.msra.gmra.mxu0 %v28003_v35  ;;  %v702_v14 = vadd.f32 %v701_v53, %v625_v62  ;;  %v8990_v22 = vand.u32 4294901760, %v28058_v7  ;;  %v9803_v53 = vsel %vm450_vm1, %v9798_v34, %v28105_v43 }
 0x162   : > { %26510 = vmatpush3.msra.mxu0 %v28024_v49  ;;  %v777_v16 = vpop.f32.mrf.mxu1  ;;  %8397 = vmatprep.mubr.f32.mxu1 %v27181_v0  ;;  %v8998_v57 = vand.u32 4294901760, %v8997_v42  ;;  %v9813_v4 = vsel %vm459_vm2, %v9803_v53, 0 }
 0x163   : > { %v778_v17 = vadd.f32 %v777_v16, %v702_v14  ;;  %v26263_v9 = vpop.f32.mrf.mxu0  ;;  %26504 = vmatprep.subr.mxu1 %v27181_v0  ;;  %26511 = vmatprep.mubr.msk.f32.mxu0 %vm27198_vm4, %v27181_v0  ;;  %v854_v18 = vadd.f32 %v853_v58, %v776_v12  ;;  %v8991_v33 = vsub.f32 %v28058_v7, %v8990_v22 }
 0x164   : > { %26519 = vmatprep.subr.mxu0 %v27181_v0  ;;  %v927_v20 = vpop.f32.mrf.mxu1  ;;  %8399 = vmatmul.mubr.f32.vlgmr.msra.gmra.mxu1 %v27953_v19 }
 0x165   : > { %v928_v23 = vadd.f32 %v927_v20, %v854_v18  ;;  %v1154_v24 = vpop.f32.mrf.mxu0  ;;  %26505 = vmatpush3.msra.mxu1 %v8516_v3  ;;  %26512 = vmatmul.mubr.f32.vlgmr.msra.gmra.mxu0 %v27966_v2  ;;  %v856_v26 = vadd.f32 %v855_v63, %v778_v17  ;;  %v8992_v49 = vand.u32 4294901760, %v8991_v33 }
 0x166   : > { %26520 = vmatpush3.msra.mxu0 %v8514_v54  ;;  %v929_v28 = vpop.f32.mrf.mxu1  ;;  %26506 = vmatprep.mubr.msk.f32.mxu1 %vm27198_vm4, %v27181_v0  ;;  %v9795_v54 = vpop.permute.xlu0 %9794 }
 0x167   : > { %8911 = vmatprep.subr.mxu0 %v28039_v48  ;;  %v930_v30 = vadd.f32 %v929_v28, %v856_v26  ;;  %v26273_v31 = vpop.f32.mrf.mxu0  ;;  %26514 = vmatprep.subr.mxu1 %v27181_v0  ;;  %v9806_v6 = vsel %vm450_vm1, %v9795_v54, %v9798_v34  ;;  %v9802_v34 = vpop.permute.xlu1 %9801 }
 0x168   : > { %26521 = vmatprep.mubr.msk.f32.mxu0 %vm27198_vm4, %v27181_v0  ;;  %v1080_v2 = vpop.f32.mrf.mxu1  ;;  %26507 = vmatmul.mubr.f32.vlgmr.msra.gmra.mxu1 %v27953_v19  ;;  %v9811_v14 = vsel %vm459_vm2, %v9806_v6, 0  ;;  %v402_v6 = vld [vmem:[%s30126_s3 + $0x58] sm:$0xff] }
 0x169   : > { %v1081_v1 = vadd.f32 %v1080_v2, %v1004_v13  ;;  %v1302_v35 = vpop.f32.mrf.mxu0  ;;  %26515 = vmatpush3.msra.mxu1 %v28008_v36  ;;  %26522 = vmatmul.mubr.f32.vlgmr.msra.gmra.mxu0 %v27953_v19  ;;  %v28146_v18 = vand.u32 4294901760, %v9811_v14 }
 0x16a   : > { %8913 = vmatpush1.msra.mxu0 %v28051_v61  ;;  %v26268_v38 = vpop.f32.mrf.mxu1  ;;  %26516 = vmatprep.mubr.msk.f32.mxu1 %vm27198_vm4, %v27181_v0 }
 0x16b   : > { %9072 = vmatprep.subr.mxu0 %v28058_v7  ;;  %v26283_v40 = vpop.f32.mrf.mxu0  ;;  %26524 = vmatprep.subr.mxu1 %v27181_v0  ;;  %v1155_v41 = vadd.f32 %v1154_v24, %v1081_v1  ;;  %v28128_v7 = vand.u32 4294901760, %v9808_v55  ;;  %v28165_v31 = vsub.f32 %v9811_v14, %v28146_v18 }
 0x16c   : > { %8946 = vmatprep.mubr.f32.mxu0 %v27181_v0  ;;  %v1228_v47 = vpop.f32.mrf.mxu1  ;;  %26517 = vmatmul.mubr.f32.vlgmr.msra.gmra.mxu1 %v27980_v25  ;;  %v28119_v25 = vsub.f32 %v8878_v32, %v28100_v39 }
 0x16d   : > { %v1229_v50 = vadd.f32 %v1228_v47, %v1155_v41  ;;  %v1461_v46 = vpop.f32.mrf.mxu0  ;;  %26525 = vmatpush3.msra.mxu1 %v28008_v36  ;;  %8952 = vmatmul.mubr.f32.vlgmr.msra.gmra.mxu0 %v28095_v37  ;;  %v28142_v17 = vsub.f32 %v9808_v55, %v28128_v7  ;;  %v9933_v45 = vand.u32 4294901760, %v28165_v31  ;;  %v9804_v47 = vsel %vm450_vm1, %v28105_v43, %v9802_v34  ;;  %v10735_v55 = vpop.permute.xlu0 %10734 }
 0x16e   : > { %v1462_v51 = vadd.f32 %v1461_v46, %v928_v23  ;;  %9075 = vmatpush1.msra.mxu0 %v28070_v11  ;;  %8993 = vmatprep.subr.mxu1 %v8992_v49  ;;  %v26278_v52 = vpop.f32.mrf.mxu1  ;;  %v9454_v10 = vand.u32 4294901760, %v28119_v25  ;;  %v9815_v53 = vsel %vm459_vm2, %v9804_v47, 0 }
 0x16f   : > { %9226 = vmatprep.subr.mxu0 %v8990_v22  ;;  %v1463_v56 = vpop.f32.mrf.mxu0  ;;  %26526 = vmatprep.mubr.msk.f32.mxu1 %vm27198_vm4, %v27181_v0  ;;  %v1303_v36 = vadd.f32 %v1302_v35, %v1229_v50  ;;  %v28160_v28 = vand.u32 4294901760, %v28142_v17 }
 0x170   : > { %v1464_v58 = vadd.f32 %v1463_v56, %v930_v30  ;;  %9108 = vmatprep.mubr.f32.mxu0 %v27181_v0  ;;  %v1374_v60 = vpop.f32.mrf.mxu1  ;;  %26527 = vmatmul.mubr.f32.vlgmr.msra.gmra.mxu1 %v27953_v19  ;;  %v28134_v19 = vand.u32 4294901760, %v9813_v4  ;;  %v9455_v22 = vsub.f32 %v28119_v25, %v9454_v10 }
 0x171   : > { %v1375_v62 = vadd.f32 %v1374_v60, %v1303_v36  ;;  %v1620_v63 = vpop.f32.mrf.mxu0  ;;  %8999 = vmatpush1.msra.mxu1 %v8998_v57  ;;  %9111 = vmatmul.mubr.f32.vlgmr.msra.gmra.mxu0 %v28047_v59  ;;  %v9887_v41 = vsub.f32 %v28142_v17, %v28160_v28  ;;  %v9934_v36 = vsub.f32 %v28165_v31, %v9933_v45  ;;  %v28204_v60 = vand.u32 4294901760, %v9815_v53  ;;  %v10732_v14 = vpop.permute.xlu0 %10731 }
 0x172   : > { %9230 = vmatpush1.msra.mxu0 %v8996_v29  ;;  %9148 = vmatprep.subr.mxu1 %v28039_v48  ;;  %v26288_v8 = vpop.f32.mrf.mxu1  ;;  %v28153_v23 = vsub.f32 %v9813_v4, %v28134_v19  ;;  %v9456_v2 = vand.u32 4294901760, %v9455_v22  ;;  %v28208_v4 = vpop.permute.xlu1 %10736 }
 0x173   : > { %v1622_v12 = vpop.f32.mrf.mxu0  ;;  %9032 = vmatprep.mubr.f32.mxu1 %v27181_v0  ;;  %9263 = vmatprep.mubr.f32.mxu0 %v27181_v0  ;;  %v28193_v43 = vand.u32 4294901760, %v9887_v41 }
 0x174   : > { %26529 = vmatprep.subr.mxu0 %v27181_v0  ;;  %v1543_v13 = vpop.f32.mrf.mxu1  ;;  %9034 = vmatmul.mubr.f32.vlgmr.msra.gmra.mxu1 %v28033_v44  ;;  %v9927_v35 = vand.u32 4294901760, %v28153_v23 }
 0x175   : > { %v1544_v16 = vadd.f32 %v1543_v13, %v1462_v51  ;;  %v1774_v11 = vpop.f32.mrf.mxu0  ;;  %9150 = vmatpush1.msra.mxu1 %v28051_v61  ;;  %9265 = vmatmul.mubr.f32.vlgmr.msra.gmra.mxu0 %v28033_v44  ;;  %v10740_v13 = vsel %vm2308_vm5, %v10735_v55, %v28208_v4 }
 0x176   : > { %26530 = vmatpush3.msra.mxu0 %v28100_v39  ;;  %9302 = vmatprep.subr.mxu1 %v28039_v48  ;;  %v1545_v9 = vpop.f32.mrf.mxu1  ;;  %v9928_v46 = vsub.f32 %v28153_v23, %v9927_v35 }
 0x177   : > { %v1546_v3 = vadd.f32 %v1545_v9, %v1464_v58  ;;  %v1776_v21 = vpop.f32.mrf.mxu0  ;;  %9183 = vmatprep.mubr.f32.mxu1 %v27181_v0  ;;  %26531 = vmatprep.mubr.msk.f32.mxu0 %vm27198_vm4, %v27181_v0  ;;  %v1621_v20 = vadd.f32 %v1620_v63, %v1544_v16  ;;  %v10745_v16 = vsel %vm455_vm0, %v402_v6, 0 }
 0x178   : > { %26539 = vmatprep.subr.mxu0 %v27181_v0  ;;  %v1696_v24 = vpop.f32.mrf.mxu1  ;;  %9187 = vmatmul.mubr.f32.vlgmr.msra.gmra.mxu1 %v28065_v15  ;;  %v9929_v58 = vand.u32 4294901760, %v9928_v46 }
 0x179   : > { %v1697_v48 = vadd.f32 %v1696_v24, %v1621_v20  ;;  %v1925_v26 = vpop.f32.mrf.mxu0  ;;  %9304 = vmatpush1.msra.mxu1 %v28051_v61  ;;  %26532 = vmatmul.mubr.f32.vlgmr.msra.gmra.mxu0 %v28095_v37  ;;  %v1623_v27 = vadd.f32 %v1622_v12, %v1546_v3  ;;  %v10743_v20 = vsel %vm2308_vm5, %v10732_v14, %v10735_v55 }
 0x17a   : > { %v1926_v29 = vadd.f32 %v1925_v26, %v1375_v62  ;;  %26540 = vmatpush3.msra.mxu0 %v28119_v25  ;;  %v1698_v30 = vpop.f32.mrf.mxu1  ;;  %9337 = vmatprep.mubr.f32.mxu1 %v27181_v0 }
 0x17b   : > { %v1699_v32 = vadd.f32 %v1698_v30, %v1623_v27  ;;  %26534 = vmatprep.subr.mxu1 %v27181_v0  ;;  %26541 = vmatprep.mubr.msk.f32.mxu0 %vm27198_vm4, %v27181_v0  ;;  %v1775_v61 = vadd.f32 %v1774_v11, %v1697_v48  ;;  %v26293_v33 = vpop.f32.mrf.mxu0  ;;  %v28222_v11 = vsub.f32 %v9815_v53, %v28204_v60  ;;  %v10748_v30 = vsel %vm459_vm2, %v10743_v20, 0 }
 0x17c   : > { %26549 = vmatprep.subr.mxu0 %v27181_v0  ;;  %v1848_v1 = vpop.f32.mrf.mxu1  ;;  %9339 = vmatmul.mubr.f32.vlgmr.msra.gmra.mxu1 %v28033_v44  ;;  %v28253_v34 = vand.u32 4294901760, %v10748_v30 }
 0x17d   : > { %v28173_v37 = vadd.f32 %v1848_v1, %v1775_v61  ;;  %26535 = vmatpush3.msra.mxu1 %v9456_v2  ;;  %26542 = vmatmul.mubr.f32.vlgmr.msra.gmra.mxu0 %v28047_v59  ;;  %v1777_v38 = vadd.f32 %v1776_v21, %v1699_v32  ;;  %v2075_v40 = vpop.f32.mrf.mxu0  ;;  %v10391_v48 = vand.u32 4294901760, %v28222_v11 }
 0x17e   : > { %26550 = vmatpush3.msra.mxu0 %v9454_v10  ;;  %v1850_v42 = vpop.f32.mrf.mxu1  ;;  %26536 = vmatprep.mubr.msk.f32.mxu1 %vm27198_vm4, %v27181_v0  ;;  %v9935_v10 = vand.u32 4294901760, %v9934_v36 }
 0x17f   : > { %9848 = vmatprep.subr.mxu0 %v28134_v19  ;;  %v28184_v49 = vadd.f32 %v1850_v42, %v1777_v38  ;;  %26544 = vmatprep.subr.mxu1 %v27181_v0  ;;  %v26303_v59 = vpop.f32.mrf.mxu0  ;;  %v10392_v38 = vsub.f32 %v28222_v11, %v10391_v48 }
 0x180   : > { %26551 = vmatprep.mubr.msk.f32.mxu0 %vm27198_vm4, %v27181_v0  ;;  %v2001_v50 = vpop.f32.mrf.mxu1  ;;  %26537 = vmatmul.mubr.f32.vlgmr.msra.gmra.mxu1 %v28033_v44  ;;  %v28269_v59 = vld [vmem:[%s27356_s19] sm:$0xff] }
 0x181   : > { %v2002_v51 = vadd.f32 %v2001_v50, %v1926_v29  ;;  %26545 = vmatpush3.msra.mxu1 %v28100_v39  ;;  %26552 = vmatmul.mubr.f32.vlgmr.msra.gmra.mxu0 %v28033_v44  ;;  %v2223_v52 = vpop.f32.mrf.mxu0 }
 0x182   : > { %9850 = vmatpush1.msra.mxu0 %v28146_v18  ;;  %v26298_v54 = vpop.f32.mrf.mxu1  ;;  %26546 = vmatprep.mubr.msk.f32.mxu1 %vm27198_vm4, %v27181_v0 }
 0x183   : > { %v2076_v25 = vadd.f32 %v2075_v40, %v2002_v51  ;;  %10009 = vmatprep.subr.mxu0 %v28153_v23  ;;  %26554 = vmatprep.subr.mxu1 %v27181_v0  ;;  %v26313_v56 = vpop.f32.mrf.mxu0  ;;  %v28232_v23 = vand.u32 4294901760, %v10745_v16  ;;  %v10393_v54 = vand.u32 4294901760, %v10392_v38 }
 0x184   : > { %9883 = vmatprep.mubr.f32.mxu0 %v27181_v0  ;;  %v2149_v57 = vpop.f32.mrf.mxu1  ;;  %26547 = vmatmul.mubr.f32.vlgmr.msra.gmra.mxu1 %v28065_v15 }
 0x185   : > { %v2150_v62 = vadd.f32 %v2149_v57, %v2076_v25  ;;  %26555 = vmatpush3.msra.mxu1 %v28100_v39  ;;  %9889 = vmatmul.mubr.f32.vlgmr.msra.gmra.mxu0 %v28193_v43  ;;  %v2396_v63 = vpop.f32.mrf.mxu0  ;;  %v28248_v33 = vsub.f32 %v10745_v16, %v28232_v23  ;;  %v10739_v25 = vpop.permute.xlu1 %10738 }
 0x186   : > { %10012 = vmatpush1.msra.mxu0 %v28165_v31  ;;  %9930 = vmatprep.subr.mxu1 %v9929_v58  ;;  %v26308_v8 = vpop.f32.mrf.mxu1 }
 0x187   : > { %v2224_v15 = vadd.f32 %v2223_v52, %v2150_v62  ;;  %10163 = vmatprep.subr.mxu0 %v9927_v35  ;;  %26556 = vmatprep.mubr.msk.f32.mxu1 %vm27198_vm4, %v27181_v0  ;;  %v2398_v39 = vpop.f32.mrf.mxu0  ;;  %v28274_v51 = vand.u32 4294901760, %v28248_v33  ;;  %v10741_v8 = vsel %vm2308_vm5, %v28208_v4, %v10739_v25 }
 0x188   : > { %10045 = vmatprep.mubr.f32.mxu0 %v27181_v0  ;;  %v2295_v12 = vpop.f32.mrf.mxu1  ;;  %26557 = vmatmul.mubr.f32.vlgmr.msra.gmra.mxu1 %v28033_v44  ;;  %v10750_v44 = vsel %vm459_vm2, %v10740_v13, 0  ;;  %v10752_v14 = vsel %vm459_vm2, %v10741_v8, 0 }
 0x189   : > { %v28224_v9 = vadd.f32 %v2295_v12, %v2224_v15  ;;  %9936 = vmatpush1.msra.mxu1 %v9935_v10  ;;  %10048 = vmatmul.mubr.f32.vlgmr.msra.gmra.mxu0 %v28142_v17  ;;  %v2555_v3 = vpop.f32.mrf.mxu0  ;;  %v28239_v29 = vand.u32 4294901760, %v10750_v44 }
 0x18a   : > { %10167 = vmatpush1.msra.mxu0 %v9933_v45  ;;  %10085 = vmatprep.subr.mxu1 %v28134_v19  ;;  %v26318_v21 = vpop.f32.mrf.mxu1  ;;  %v28264_v45 = vld [vmem:[%s27356_s19 + $0x8] sm:$0xf]  ;;  %s30156_s19 = smov 50  }
 0x18b   : > { %9969 = vmatprep.mubr.f32.mxu1 %v27181_v0  ;;  %10200 = vmatprep.mubr.f32.mxu0 %v27181_v0  ;;  %v2557_v22 = vpop.f32.mrf.mxu0  ;;  %v28259_v41 = vsub.f32 %v10750_v44, %v28239_v29 }
 0x18c   : > { %26559 = vmatprep.subr.mxu0 %v27181_v0  ;;  %v2478_v24 = vpop.f32.mrf.mxu1  ;;  %9971 = vmatmul.mubr.f32.vlgmr.msra.gmra.mxu1 %v28128_v7 }
 0x18d   : > { %v2479_v26 = vadd.f32 %v2478_v24, %v2396_v63  ;;  %10087 = vmatpush1.msra.mxu1 %v28146_v18  ;;  %10202 = vmatmul.mubr.f32.vlgmr.msra.gmra.mxu0 %v28128_v7  ;;  %v2709_v27 = vpop.f32.mrf.mxu0  ;;  %v10864_v36 = vand.u32 4294901760, %v28259_v41  ;;  %v10824_v63 = vsub.f32 %v28248_v33, %v28274_v51  ;;  %v28321_v24 = vand.u32 4294901760, %v10752_v14 }
 0x18e   : > { %26560 = vmatpush3.msra.mxu0 %v28204_v60  ;;  %10239 = vmatprep.subr.mxu1 %v28134_v19  ;;  %v2480_v31 = vpop.f32.mrf.mxu1 }
 0x18f   : > { %v2556_v32 = vadd.f32 %v2555_v3, %v2479_v26  ;;  %v2481_v61 = vadd.f32 %v2480_v31, %v2398_v39  ;;  %10120 = vmatprep.mubr.f32.mxu1 %v27181_v0  ;;  %v2711_v2 = vpop.f32.mrf.mxu0  ;;  %26561 = vmatprep.mubr.msk.f32.mxu0 %vm27198_vm4, %v27181_v0  ;;  %v10865_v12 = vsub.f32 %v28259_v41, %v10864_v36  ;;  %v28310_v4 = vand.u32 4294901760, %v10824_v63  ;;  %v28325_v26 = vpop.permute.xlu1 %11673 }
 0x190   : > { %26569 = vmatprep.subr.mxu0 %v27181_v0  ;;  %v2631_v19 = vpop.f32.mrf.mxu1  ;;  %10124 = vmatmul.mubr.f32.vlgmr.msra.gmra.mxu1 %v28160_v28 }
 0x191   : > { %v2558_v1 = vadd.f32 %v2557_v22, %v2481_v61  ;;  %v2632_v35 = vadd.f32 %v2631_v19, %v2556_v32  ;;  %26562 = vmatmul.mubr.f32.vlgmr.msra.gmra.mxu0 %v28193_v43  ;;  %v2860_v40 = vpop.f32.mrf.mxu0  ;;  %10241 = vmatpush1.msra.mxu1 %v28146_v18  ;;  %v28279_v43 = vsub.f32 %v10748_v30, %v28253_v34  ;;  %v10866_v20 = vand.u32 4294901760, %v10865_v12  ;;  %v403_v30 = vld [vmem:[%s30126_s3 + $0x60] sm:$0xff] }
 0x192   : > { %26570 = vmatpush3.msra.mxu0 %v28222_v11  ;;  %v2633_v42 = vpop.f32.mrf.mxu1  ;;  %15406 = vrot.lane.b32.xlu1 %v28264_v45, %s30155_s18  ;;  %v11672_v11 = vpop.permute.xlu0 %11671 }
 0x193   : > { %v2710_v47 = vadd.f32 %v2709_v27, %v2632_v35  ;;  %15402 = vrot.lane.b32.xlu0 %v28269_v59, %s30155_s18  ;;  %v2634_v50 = vadd.f32 %v2633_v42, %v2558_v1  ;;  %v26323_v46 = vpop.f32.mrf.mxu0  ;;  %10274 = vmatprep.mubr.f32.mxu1 %v27181_v0  ;;  %v11682_v1 = vsel %vm455_vm0, %v403_v30, 0  ;;  %v28339_v35 = vsub.f32 %v10752_v14, %v28321_v24 }
 0x194   : > { %26564 = vmatprep.subr.mxu1 %v27181_v0  ;;  %v2783_v18 = vpop.f32.mrf.mxu1  ;;  %26571 = vmatprep.mubr.msk.f32.mxu0 %vm27198_vm4, %v27181_v0 }
 0x195   : > { %v2712_v52 = vadd.f32 %v2711_v2, %v2634_v50  ;;  %26579 = vmatprep.subr.mxu0 %v27181_v0  ;;  %v2784_v53 = vadd.f32 %v2783_v18, %v2710_v47  ;;  %v3010_v55 = vpop.f32.mrf.mxu0  ;;  %10276 = vmatmul.mubr.f32.vlgmr.msra.gmra.mxu1 %v28128_v7  ;;  %v11677_v2 = vsel %vm3246_vm6, %v11672_v11, %v28325_v26  ;;  %v11328_v18 = vand.u32 4294901760, %v28339_v35 }
 0x196   : > { %26572 = vmatmul.mubr.f32.vlgmr.msra.gmra.mxu0 %v28142_v17  ;;  %v2785_v56 = vpop.f32.mrf.mxu1  ;;  %26565 = vmatpush3.msra.mxu1 %v10393_v54  ;;  %v10870_v17 = vand.u32 4294901760, %v28279_v43  ;;  %v11669_v19 = vpop.permute.xlu0 %11668 }
 0x197   : > { %v28288_v57 = vadd.f32 %v2784_v53, %v28173_v37  ;;  %26580 = vmatpush3.msra.mxu0 %v10391_v48  ;;  %v2786_v58 = vadd.f32 %v2785_v56, %v2712_v52  ;;  %v26333_v62 = vpop.f32.mrf.mxu0  ;;  %15411 = vrot.lane.b32.xlu1 %v28269_v59, %s30156_s19  ;;  %v11680_v47 = vsel %vm3246_vm6, %v11669_v19, %v11672_v11 }
 0x198   : > { %10785 = vmatprep.subr.mxu0 %v28239_v29  ;;  %v2936_v6 = vpop.f32.mrf.mxu1  ;;  %26566 = vmatprep.mubr.msk.f32.mxu1 %vm27198_vm4, %v27181_v0  ;;  %v10871_v21 = vsub.f32 %v28279_v43, %v10870_v17  ;;  %v11329_v8 = vsub.f32 %v28339_v35, %v11328_v18 }
 0x199   : > { %v28299_v37 = vadd.f32 %v2786_v58, %v28184_v49  ;;  %26574 = vmatprep.subr.mxu1 %v27181_v0  ;;  %v2937_v15 = vadd.f32 %v2936_v6, %v2860_v40  ;;  %v3158_v10 = vpop.f32.mrf.mxu0  ;;  %26581 = vmatprep.mubr.msk.f32.mxu0 %vm27198_vm4, %v27181_v0 }
 0x19a   : > { %26567 = vmatmul.mubr.f32.vlgmr.msra.gmra.mxu1 %v28128_v7  ;;  %v26328_v39 = vpop.f32.mrf.mxu1  ;;  %26582 = vmatmul.mubr.f32.vlgmr.msra.gmra.mxu0 %v28128_v7 }
 0x19b   : > { %26575 = vmatpush3.msra.mxu1 %v28204_v60  ;;  %v3011_v49 = vadd.f32 %v3010_v55, %v2937_v15  ;;  %v26343_v13 = vpop.f32.mrf.mxu0  ;;  %10787 = vmatpush1.msra.mxu0 %v28253_v34  ;;  %v11685_v55 = vsel %vm459_vm2, %v11680_v47, 0 }
 0x19c   : > { %26576 = vmatprep.mubr.msk.f32.mxu1 %vm27198_vm4, %v27181_v0  ;;  %v3084_v16 = vpop.f32.mrf.mxu1  ;;  %10946 = vmatprep.subr.mxu0 %v28259_v41  ;;  %v11687_v41 = vsel %vm459_vm2, %v11677_v2, 0  ;;  %v28372_v63 = vand.u32 4294901760, %v11685_v55 }
 0x19d   : > { %26584 = vmatprep.subr.mxu1 %v27181_v0  ;;  %v3085_v3 = vadd.f32 %v3084_v16, %v3011_v49  ;;  %v3334_v44 = vpop.f32.mrf.mxu0  ;;  %10820 = vmatprep.mubr.f32.mxu0 %v27181_v0  ;;  %v28357_v54 = vand.u32 4294901760, %v11687_v41  ;;  %v11676_v16 = vpop.permute.xlu1 %11675 }
 0x19e   : > { %26577 = vmatmul.mubr.f32.vlgmr.msra.gmra.mxu1 %v28160_v28  ;;  %v26338_v22 = vpop.f32.mrf.mxu1  ;;  %10826 = vmatmul.mubr.f32.vlgmr.msra.gmra.mxu0 %v28310_v4  ;;  %v28398_v14 = vsub.f32 %v11685_v55, %v28372_v63 }
 0x19f   : > { %26585 = vmatpush3.msra.mxu1 %v28204_v60  ;;  %v3159_v48 = vadd.f32 %v3158_v10, %v3085_v3  ;;  %v3336_v27 = vpop.f32.mrf.mxu0  ;;  %10949 = vmatpush1.msra.mxu0 %v28279_v43  ;;  %v10872_v60 = vand.u32 4294901760, %v10871_v21  ;;  %v28384_v10 = vsub.f32 %v11687_v41, %v28357_v54  ;;  %v11330_v3 = vand.u32 4294901760, %v11329_v8 }
 0x1a0   : > { %10867 = vmatprep.subr.mxu1 %v10866_v20  ;;  %v3230_v28 = vpop.f32.mrf.mxu1  ;;  %11100 = vmatprep.subr.mxu0 %v10864_v36 }
 0x1a1   : > { %26586 = vmatprep.mubr.msk.f32.mxu1 %vm27198_vm4, %v27181_v0  ;;  %v3231_v31 = vadd.f32 %v3230_v28, %v3159_v48  ;;  %v3493_v32 = vpop.f32.mrf.mxu0  ;;  %10982 = vmatprep.mubr.f32.mxu0 %v27181_v0  ;;  %v11801_v22 = vand.u32 4294901760, %v28384_v10  ;;  %v11678_v28 = vsel %vm3246_vm6, %v28325_v26, %v11676_v16 }
 0x1a2   : > { %26587 = vmatmul.mubr.f32.vlgmr.msra.gmra.mxu1 %v28128_v7  ;;  %v26348_v61 = vpop.f32.mrf.mxu1  ;;  %10985 = vmatmul.mubr.f32.vlgmr.msra.gmra.mxu0 %v28248_v33 }
 0x1a3   : > { %v28342_v38 = vadd.f32 %v3231_v31, %v28224_v9  ;;  %10873 = vmatpush1.msra.mxu1 %v10872_v60  ;;  %v3495_v40 = vpop.f32.mrf.mxu0  ;;  %11104 = vmatpush1.msra.mxu0 %v10870_v17  ;;  %v28350_v9 = vand.u32 4294901760, %v11682_v1  ;;  %v11807_v31 = vand.u32 4294901760, %v28398_v14  ;;  %v11689_v61 = vsel %vm459_vm2, %v11678_v28, 0 }
 0x1a4   : > { %11022 = vmatprep.subr.mxu1 %v28239_v29  ;;  %v3416_v7 = vpop.f32.mrf.mxu1  ;;  %10906 = vmatprep.mubr.f32.mxu1 %v27181_v0 }
 0x1a5   : > { %11137 = vmatprep.mubr.f32.mxu0 %v27181_v0  ;;  %v3417_v42 = vadd.f32 %v3416_v7, %v3334_v44  ;;  %v3647_v50 = vpop.f32.mrf.mxu0  ;;  %26589 = vmatprep.subr.mxu0 %v27181_v0  ;;  %v28367_v62 = vsub.f32 %v11682_v1, %v28350_v9  ;;  %v11808_v7 = vsub.f32 %v28398_v14, %v11807_v31 }
 0x1a6   : > { %10908 = vmatmul.mubr.f32.vlgmr.msra.gmra.mxu1 %v28232_v23  ;;  %v3418_v46 = vpop.f32.mrf.mxu1  ;;  %11139 = vmatmul.mubr.f32.vlgmr.msra.gmra.mxu0 %v28232_v23 }
 0x1a7   : > { %11024 = vmatpush1.msra.mxu1 %v28253_v34  ;;  %v3494_v43 = vadd.f32 %v3493_v32, %v3417_v42  ;;  %v3419_v52 = vadd.f32 %v3418_v46, %v3336_v27  ;;  %v3649_v53 = vpop.f32.mrf.mxu0  ;;  %26590 = vmatpush3.msra.mxu0 %v28321_v24  ;;  %v28393_v13 = vand.u32 4294901760, %v28367_v62  ;;  %v11802_v32 = vsub.f32 %v28384_v10, %v11801_v22  ;;  %v404_v46 = vld [vmem:[%s30126_s3 + $0x68] sm:$0xff] }
 0x1a8   : > { %11176 = vmatprep.subr.mxu1 %v28239_v29  ;;  %v3569_v25 = vpop.f32.mrf.mxu1  ;;  %16341 = vrot.lane.b32.xlu0 %v27365_v5, %s30148_s10  ;;  %v28448_v42 = vand.u32 4294901760, %v11689_v61 }
 0x1a9   : > { %v3496_v56 = vadd.f32 %v3495_v40, %v3419_v52  ;;  %11057 = vmatprep.mubr.f32.mxu1 %v27181_v0  ;;  %v3570_v36 = vadd.f32 %v3569_v25, %v3494_v43  ;;  %v3798_v58 = vpop.f32.mrf.mxu0  ;;  %26591 = vmatprep.mubr.msk.f32.mxu0 %vm27198_vm4, %v27181_v0  ;;  %v11761_v27 = vsub.f32 %v28367_v62, %v28393_v13  ;;  %v11803_v47 = vand.u32 4294901760, %v11802_v32 }
 0x1aa   : > { %26599 = vmatprep.subr.mxu0 %v27181_v0  ;;  %v3571_v29 = vpop.f32.mrf.mxu1  ;;  %11061 = vmatmul.mubr.f32.vlgmr.msra.gmra.mxu1 %v28274_v51  ;;  %v28466_v25 = vsub.f32 %v11689_v61, %v28448_v42 }
 0x1ab   : > { %26592 = vmatmul.mubr.f32.vlgmr.msra.gmra.mxu0 %v28310_v4  ;;  %v3648_v6 = vadd.f32 %v3647_v50, %v3570_v36  ;;  %v3572_v17 = vadd.f32 %v3571_v29, %v3496_v56  ;;  %v26353_v15 = vpop.f32.mrf.mxu0  ;;  %11178 = vmatpush1.msra.mxu1 %v28253_v34  ;;  %v28437_v19 = vand.u32 4294901760, %v11761_v27  ;;  %v12610_v29 = vsel %vm459_vm2, %v27365_v5, 0 }
 0x1ac   : > { %26600 = vmatpush3.msra.mxu0 %v28339_v35  ;;  %v3721_v39 = vpop.f32.mrf.mxu1  ;;  %16343 = vrot.lane.b32.xlu1 %v28264_v45, %s30148_s10  ;;  %v12265_v15 = vand.u32 4294901760, %v28466_v25  ;;  %v12608_v5 = vsel %vm459_vm2, %v28269_v59, 0 }
 0x1ad   : > { %16339 = vrot.lane.b32.xlu0 %v28269_v59, %s30148_s10  ;;  %v3650_v12 = vadd.f32 %v3649_v53, %v3572_v17  ;;  %v3722_v49 = vadd.f32 %v3721_v39, %v3648_v6  ;;  %v3948_v4 = vpop.f32.mrf.mxu0  ;;  %11211 = vmatprep.mubr.f32.mxu1 %v27181_v0  ;;  %v11809_v53 = vand.u32 4294901760, %v11808_v7  ;;  %s30159_s10 = smov 1  }
 0x1ae   : > { %26594 = vmatprep.subr.mxu1 %v27181_v0  ;;  %v3723_v34 = vpop.f32.mrf.mxu1  ;;  %26601 = vmatprep.mubr.msk.f32.mxu0 %vm27198_vm4, %v27181_v0 }
 0x1af   : > { %26609 = vmatprep.subr.mxu0 %v27181_v0  ;;  %v28404_v11 = vadd.f32 %v3722_v49, %v28288_v57  ;;  %v3724_v21 = vadd.f32 %v3723_v34, %v3650_v12  ;;  %v26363_v44 = vpop.f32.mrf.mxu0  ;;  %11213 = vmatmul.mubr.f32.vlgmr.msra.gmra.mxu1 %v28232_v23  ;;  %v28493_v34 = vand.u32 4294901760, %v12610_v29 }
 0x1b0   : > { %26602 = vmatmul.mubr.f32.vlgmr.msra.gmra.mxu0 %v28248_v33  ;;  %v3874_v20 = vpop.f32.mrf.mxu1  ;;  %26595 = vmatpush3.msra.mxu1 %v11330_v3 }
 0x1b1   : > { %26610 = vmatpush3.msra.mxu0 %v11328_v18  ;;  %v28416_v57 = vadd.f32 %v3724_v21, %v28299_v37  ;;  %v3875_v48 = vadd.f32 %v3874_v20, %v3798_v58  ;;  %v4096_v30 = vpop.f32.mrf.mxu0  ;;  %16348 = vrot.lane.b32.xlu1 %v28269_v59, %s30147_s11  ;;  %v28507_v20 = vand.u32 4294901760, %v12608_v5 }
 0x1b2   : > { %11722 = vmatprep.subr.mxu0 %v28357_v54  ;;  %v26358_v33 = vpop.f32.mrf.mxu1  ;;  %26596 = vmatprep.mubr.msk.f32.mxu1 %vm27198_vm4, %v27181_v0 }
 0x1b3   : > { %26604 = vmatprep.subr.mxu1 %v27181_v0  ;;  %v3949_v37 = vadd.f32 %v3948_v4, %v3875_v48  ;;  %v26373_v60 = vpop.f32.mrf.mxu0  ;;  %26611 = vmatprep.mubr.msk.f32.mxu0 %vm27198_vm4, %v27181_v0  ;;  %v12266_v48 = vsub.f32 %v28466_v25, %v12265_v15  ;;  %v28519_v33 = vsub.f32 %v12610_v29, %v28493_v34 }
 0x1b4   : > { %26597 = vmatmul.mubr.f32.vlgmr.msra.gmra.mxu1 %v28232_v23  ;;  %v4022_v26 = vpop.f32.mrf.mxu1  ;;  %26612 = vmatmul.mubr.f32.vlgmr.msra.gmra.mxu0 %v28232_v23  ;;  %v28534_v61 = vsub.f32 %v12608_v5, %v28507_v20 }
 0x1b5   : > { %26605 = vmatpush3.msra.mxu1 %v28321_v24  ;;  %v4023_v2 = vadd.f32 %v4022_v26, %v3949_v37  ;;  %v4257_v1 = vpop.f32.mrf.mxu0  ;;  %11724 = vmatpush1.msra.mxu0 %v28372_v63 }
 0x1b6   : > { %26606 = vmatprep.mubr.msk.f32.mxu1 %vm27198_vm4, %v27181_v0  ;;  %v26368_v35 = vpop.f32.mrf.mxu1  ;;  %11883 = vmatprep.subr.mxu0 %v28384_v10  ;;  %v28487_v10 = vld [vmem:[%s28474_s20] sm:$0xff] }
 0x1b7   : > { %26614 = vmatprep.subr.mxu1 %v27181_v0  ;;  %v4097_v40 = vadd.f32 %v4096_v30, %v4023_v2  ;;  %v4259_v41 = vpop.f32.mrf.mxu0  ;;  %11757 = vmatprep.mubr.f32.mxu0 %v27181_v0  ;;  %v28505_v59 = vcombine.high %v28487_v10, %v28487_v10  ;;  %v12267_v2 = vand.u32 4294901760, %v12266_v48  ;;  %v12724_v35 = vand.u32 4294901760, %v28519_v33 }
 0x1b8   : > { %26607 = vmatmul.mubr.f32.vlgmr.msra.gmra.mxu1 %v28274_v51  ;;  %v4168_v50 = vpop.f32.mrf.mxu1  ;;  %11763 = vmatmul.mubr.f32.vlgmr.msra.gmra.mxu0 %v28437_v19 }
 0x1b9   : > { %26615 = vmatpush3.msra.mxu1 %v28321_v24  ;;  %v4169_v18 = vadd.f32 %v4168_v50, %v4097_v40  ;;  %v4416_v43 = vpop.f32.mrf.mxu0  ;;  %11886 = vmatpush1.msra.mxu0 %v28398_v14  ;;  %v12606_v24 = vsel %vm455_vm0, %v404_v46, 0  ;;  %v12730_v50 = vand.u32 4294901760, %v28534_v61  ;;  %v12725_v46 = vsub.f32 %v28519_v33, %v12724_v35 }
 0x1ba   : > { %11804 = vmatprep.subr.mxu1 %v11803_v47  ;;  %v26378_v52 = vpop.f32.mrf.mxu1  ;;  %12037 = vmatprep.subr.mxu0 %v11801_v22 }
 0x1bb   : > { %26616 = vmatprep.mubr.msk.f32.mxu1 %vm27198_vm4, %v27181_v0  ;;  %v28462_v51 = vadd.f32 %v4169_v18, %v28342_v38  ;;  %v4418_v55 = vpop.f32.mrf.mxu0  ;;  %11919 = vmatprep.mubr.f32.mxu0 %v27181_v0 }
 0x1bc   : > { %26617 = vmatmul.mubr.f32.vlgmr.msra.gmra.mxu1 %v28232_v23  ;;  %v4339_v56 = vpop.f32.mrf.mxu1  ;;  %11922 = vmatmul.mubr.f32.vlgmr.msra.gmra.mxu0 %v28367_v62  ;;  %v28479_v23 = vand.u32 4294901760, %v12606_v24 }
 0x1bd   : > { %11810 = vmatpush1.msra.mxu1 %v11809_v53  ;;  %v4340_v36 = vadd.f32 %v4339_v56, %v4257_v1  ;;  %v4570_v38 = vpop.f32.mrf.mxu0  ;;  %12041 = vmatpush1.msra.mxu0 %v11807_v31  ;;  %v13531_v56 = vpop.permute.xlu0 %13530 }
 0x1be   : > { %11959 = vmatprep.subr.mxu1 %v28357_v54  ;;  %v4341_v58 = vpop.f32.mrf.mxu1  ;;  %11843 = vmatprep.mubr.f32.mxu1 %v27181_v0  ;;  %v28498_v16 = vsub.f32 %v12606_v24, %v28479_v23 }
 0x1bf   : > { %12074 = vmatprep.mubr.f32.mxu0 %v27181_v0  ;;  %v4417_v6 = vadd.f32 %v4416_v43, %v4340_v36  ;;  %v4342_v17 = vadd.f32 %v4341_v58, %v4259_v41  ;;  %v4572_v8 = vpop.f32.mrf.mxu0  ;;  %26619 = vmatprep.subr.mxu0 %v27181_v0  ;;  %v12726_v58 = vand.u32 4294901760, %v12725_v46 }
 0x1c0   : > { %11845 = vmatmul.mubr.f32.vlgmr.msra.gmra.mxu1 %v28350_v9  ;;  %v4492_v39 = vpop.f32.mrf.mxu1  ;;  %12076 = vmatmul.mubr.f32.vlgmr.msra.gmra.mxu0 %v28350_v9  ;;  %v28524_v37 = vand.u32 4294901760, %v28498_v16 }
 0x1c1   : > { %11961 = vmatpush1.msra.mxu1 %v28372_v63  ;;  %v4419_v12 = vadd.f32 %v4418_v55, %v4342_v17  ;;  %v4493_v49 = vadd.f32 %v4492_v39, %v4417_v6  ;;  %v4721_v4 = vpop.f32.mrf.mxu0  ;;  %26620 = vmatpush3.msra.mxu0 %v28448_v42  ;;  %v12731_v55 = vsub.f32 %v28534_v61, %v12730_v50 }
 0x1c2   : > { %12113 = vmatprep.subr.mxu1 %v28357_v54  ;;  %v4494_v14 = vpop.f32.mrf.mxu1  ;;  %17282 = vrot.lane.b32.xlu0 %v28487_v10, %s27184_s14  ;;  %v28513_v54 = vld [vmem:[%s28474_s20 + $0x8] sm:$0xf]  ;;  %v12684_v7 = vsub.f32 %v28498_v16, %v28524_v37 }
 0x1c3   : > { %11994 = vmatprep.mubr.f32.mxu1 %v27181_v0  ;;  %v4571_v3 = vadd.f32 %v4570_v38, %v4493_v49  ;;  %v4495_v21 = vadd.f32 %v4494_v14, %v4419_v12  ;;  %v26383_v44 = vpop.f32.mrf.mxu0  ;;  %26621 = vmatprep.mubr.msk.f32.mxu0 %vm27198_vm4, %v27181_v0  ;;  %v13529_v49 = vpop.permute.xlu0 %13528 }
 0x1c4   : > { %26629 = vmatprep.subr.mxu0 %v27181_v0  ;;  %v4644_v22 = vpop.f32.mrf.mxu1  ;;  %11998 = vmatmul.mubr.f32.vlgmr.msra.gmra.mxu1 %v28393_v13  ;;  %v28560_v43 = vand.u32 4294901760, %v12684_v7 }
 0x1c5   : > { %26622 = vmatmul.mubr.f32.vlgmr.msra.gmra.mxu0 %v28437_v19  ;;  %v4573_v27 = vadd.f32 %v4572_v8, %v4495_v21  ;;  %v4645_v30 = vadd.f32 %v4644_v22, %v4571_v3  ;;  %v4871_v28 = vpop.f32.mrf.mxu0  ;;  %12115 = vmatpush1.msra.mxu1 %v28372_v63 }
 0x1c6   : > { %26630 = vmatpush3.msra.mxu0 %v28466_v25  ;;  %v4646_v31 = vpop.f32.mrf.mxu1  ;;  %17284 = vrot.lane.b32.xlu1 %v28505_v59, %s27184_s14  ;;  %v12612_v25 = vsel %vm459_vm2, %v28264_v45, 0  ;;  %v28574_v45 = vpop.permute.xlu1 %13532 }
 0x1c7   : > { %17277 = vrot.lane.b32.xlu0 %v28513_v54, %s27185_s15  ;;  %v28531_v60 = vadd.f32 %v4645_v30, %v28404_v11  ;;  %v4647_v26 = vadd.f32 %v4646_v31, %v4573_v27  ;;  %v26393_v32 = vpop.f32.mrf.mxu0  ;;  %12148 = vmatprep.mubr.f32.mxu1 %v27181_v0  ;;  %v28576_v17 = vand.u32 4294901760, %v12612_v25  ;;  %v13534_v27 = vsel %vm5104_vm7, %v13529_v49, %v13531_v56 }
 0x1c8   : > { %26624 = vmatprep.subr.mxu1 %v27181_v0  ;;  %v4797_v63 = vpop.f32.mrf.mxu1  ;;  %26631 = vmatprep.mubr.msk.f32.mxu0 %vm27198_vm4, %v27181_v0 }
 0x1c9   : > { %26639 = vmatprep.subr.mxu0 %v27181_v0  ;;  %v28542_v19 = vadd.f32 %v4647_v26, %v28416_v57  ;;  %v4798_v11 = vadd.f32 %v4797_v63, %v4721_v4  ;;  %v5019_v1 = vpop.f32.mrf.mxu0  ;;  %12150 = vmatmul.mubr.f32.vlgmr.msra.gmra.mxu1 %v28350_v9  ;;  %v28595_v14 = vsub.f32 %v12612_v25, %v28576_v17 }
 0x1ca   : > { %26632 = vmatmul.mubr.f32.vlgmr.msra.gmra.mxu0 %v28367_v62  ;;  %v26388_v40 = vpop.f32.mrf.mxu1  ;;  %26625 = vmatpush3.msra.mxu1 %v12267_v2 }
 0x1cb   : > { %26640 = vmatpush3.msra.mxu0 %v12265_v15  ;;  %v4872_v41 = vadd.f32 %v4871_v28, %v4798_v11  ;;  %v26403_v47 = vpop.f32.mrf.mxu0  ;;  %17286 = vrot.lane.b32.xlu1 %v28513_v54, %s27184_s14  ;;  %v12732_v15 = vand.u32 4294901760, %v12731_v55  ;;  %v13188_v32 = vand.u32 4294901760, %v28595_v14 }
 0x1cc   : > { %26626 = vmatprep.mubr.msk.f32.mxu1 %vm27198_vm4, %v27181_v0  ;;  %v4945_v57 = vpop.f32.mrf.mxu1  ;;  %26634 = vmatprep.subr.mxu1 %v27181_v0 }
 0x1cd   : > { %26641 = vmatprep.mubr.msk.f32.mxu0 %vm27198_vm4, %v27181_v0  ;;  %v4946_v62 = vadd.f32 %v4945_v57, %v4872_v41  ;;  %v5196_v18 = vpop.f32.mrf.mxu0  ;;  %26627 = vmatmul.mubr.f32.vlgmr.msra.gmra.mxu1 %v28350_v9 }
 0x1ce   : > { %26642 = vmatmul.mubr.f32.vlgmr.msra.gmra.mxu0 %v28350_v9  ;;  %v26398_v52 = vpop.f32.mrf.mxu1  ;;  %26635 = vmatpush3.msra.mxu1 %v28448_v42 }
 0x1cf   : > { %12645 = vmatprep.subr.mxu0 %v28493_v34  ;;  %v5020_v53 = vadd.f32 %v5019_v1, %v4946_v62  ;;  %v5198_v24 = vpop.f32.mrf.mxu0  ;;  %26636 = vmatprep.mubr.msk.f32.mxu1 %vm27198_vm4, %v27181_v0  ;;  %v13544_v1 = vsel %vm459_vm2, %v13534_v27, 0 }
 0x1d0   : > { %26644 = vmatprep.subr.mxu1 %v27181_v0  ;;  %v5091_v36 = vpop.f32.mrf.mxu1  ;;  %12647 = vmatpush1.msra.mxu0 %v28507_v20  ;;  %v28625_v62 = vand.u32 4294901760, %v13544_v1 }
 0x1d1   : > { %12680 = vmatprep.mubr.f32.mxu0 %v27181_v0  ;;  %v5092_v38 = vadd.f32 %v5091_v36, %v5020_v53  ;;  %v5355_v29 = vpop.f32.mrf.mxu0  ;;  %26637 = vmatmul.mubr.f32.vlgmr.msra.gmra.mxu1 %v28393_v13  ;;  %v405_v13 = vld [vmem:[%s30126_s3 + $0x70] sm:$0xff] }
 0x1d2   : > { %12686 = vmatmul.mubr.f32.vlgmr.msra.gmra.mxu0 %v28560_v43  ;;  %v26408_v6 = vpop.f32.mrf.mxu1  ;;  %26645 = vmatpush3.msra.mxu1 %v28448_v42  ;;  %v13535_v42 = vsel %vm5104_vm7, %v13531_v56, %v28574_v45  ;;  %v13542_v3 = vsel %vm455_vm0, %v405_v13, 0  ;;  %v28651_v56 = vsub.f32 %v13544_v1, %v28625_v62 }
 0x1d3   : > { %12806 = vmatprep.subr.mxu0 %v28519_v33  ;;  %v28581_v8 = vadd.f32 %v5092_v38, %v28462_v51  ;;  %v5357_v39 = vpop.f32.mrf.mxu0  ;;  %26646 = vmatprep.mubr.msk.f32.mxu1 %vm27198_vm4, %v27181_v0  ;;  %v13546_v48 = vsel %vm459_vm2, %v13535_v42, 0  ;;  %v28603_v31 = vand.u32 4294901760, %v13542_v3  ;;  %v13538_v38 = vpop.permute.xlu1 %13537 }
 0x1d4   : > { %12809 = vmatpush1.msra.mxu0 %v28534_v61  ;;  %v5278_v5 = vpop.f32.mrf.mxu1  ;;  %12842 = vmatprep.mubr.f32.mxu0 %v27181_v0  ;;  %v28611_v11 = vand.u32 4294901760, %v13546_v48 }
 0x1d5   : > { %12727 = vmatprep.subr.mxu1 %v12726_v58  ;;  %v5279_v51 = vadd.f32 %v5278_v5, %v5196_v18  ;;  %v5509_v12 = vpop.f32.mrf.mxu0  ;;  %26647 = vmatmul.mubr.f32.vlgmr.msra.gmra.mxu1 %v28350_v9  ;;  %v28620_v47 = vsub.f32 %v13542_v3, %v28603_v31  ;;  %v13667_v5 = vand.u32 4294901760, %v28651_v56 }
 0x1d6   : > { %12845 = vmatmul.mubr.f32.vlgmr.msra.gmra.mxu0 %v28498_v16  ;;  %v5280_v4 = vpop.f32.mrf.mxu1  ;;  %12733 = vmatpush1.msra.mxu1 %v12732_v15  ;;  %v28634_v53 = vsub.f32 %v13546_v48, %v28611_v11 }
 0x1d7   : > { %12960 = vmatprep.subr.mxu0 %v12724_v35  ;;  %v5356_v21 = vadd.f32 %v5355_v29, %v5279_v51  ;;  %v5281_v44 = vadd.f32 %v5280_v4, %v5198_v24  ;;  %v5511_v22 = vpop.f32.mrf.mxu0  ;;  %12766 = vmatprep.mubr.f32.mxu1 %v27181_v0  ;;  %v28645_v55 = vand.u32 4294901760, %v28620_v47  ;;  %v13668_v48 = vsub.f32 %v28651_v56, %v13667_v5 }
 0x1d8   : > { %12964 = vmatpush1.msra.mxu0 %v12730_v50  ;;  %v5431_v9 = vpop.f32.mrf.mxu1  ;;  %12997 = vmatprep.mubr.f32.mxu0 %v27181_v0  ;;  %v13189_v50 = vsub.f32 %v28595_v14, %v13188_v32  ;;  %v13661_v29 = vand.u32 4294901760, %v28634_v53 }
 0x1d9   : > { %12882 = vmatprep.subr.mxu1 %v28493_v34  ;;  %v5358_v30 = vadd.f32 %v5357_v39, %v5281_v44  ;;  %v5432_v28 = vadd.f32 %v5431_v9, %v5356_v21  ;;  %v5660_v33 = vpop.f32.mrf.mxu0  ;;  %12768 = vmatmul.mubr.f32.vlgmr.msra.gmra.mxu1 %v28479_v23  ;;  %v13621_v15 = vsub.f32 %v28620_v47, %v28645_v55  ;;  %v14468_v21 = vpop.permute.xlu0 %14467 }
 0x1da   : > { %12999 = vmatmul.mubr.f32.vlgmr.msra.gmra.mxu0 %v28479_v23  ;;  %v5433_v26 = vpop.f32.mrf.mxu1  ;;  %12884 = vmatpush1.msra.mxu1 %v28507_v20 }
 0x1db   : > { %18219 = vrot.lane.b32.xlu0 %v28487_v10, %s27183_s13  ;;  %v5510_v61 = vadd.f32 %v5509_v12, %v5432_v28  ;;  %v5434_v63 = vadd.f32 %v5433_v26, %v5358_v30  ;;  %v26413_v2 = vpop.f32.mrf.mxu0  ;;  %26649 = vmatprep.subr.mxu0 %v27181_v0  ;;  %v13662_v12 = vsub.f32 %v28634_v53, %v13661_v29  ;;  %v28689_v30 = vpop.permute.xlu1 %14469 }
 0x1dc   : > { %12917 = vmatprep.mubr.f32.mxu1 %v27181_v0  ;;  %v5583_v35 = vpop.f32.mrf.mxu1  ;;  %26650 = vmatpush3.msra.mxu0 %v28576_v17 }
 0x1dd   : > { %26651 = vmatprep.mubr.msk.f32.mxu0 %vm27198_vm4, %v27181_v0  ;;  %v5512_v40 = vadd.f32 %v5511_v22, %v5434_v63  ;;  %v5584_v7 = vadd.f32 %v5583_v35, %v5510_v61  ;;  %v5810_v41 = vpop.f32.mrf.mxu0  ;;  %12921 = vmatmul.mubr.f32.vlgmr.msra.gmra.mxu1 %v28524_v37  ;;  %v13663_v27 = vand.u32 4294901760, %v13662_v12  ;;  %v13669_v61 = vand.u32 4294901760, %v13668_v48  ;;  %v14466_v35 = vpop.permute.xlu0 %14465 }
 0x1de   : > { %13036 = vmatprep.subr.mxu1 %v28493_v34  ;;  %v5585_v57 = vpop.f32.mrf.mxu1  ;;  %26652 = vmatmul.mubr.f32.vlgmr.msra.gmra.mxu0 %v28560_v43 }
 0x1df   : > { %18221 = vrot.lane.b32.xlu1 %v28505_v59, %s27183_s13  ;;  %v28631_v46 = vadd.f32 %v5584_v7, %v28531_v60  ;;  %v5586_v18 = vadd.f32 %v5585_v57, %v5512_v40  ;;  %v26423_v52 = vpop.f32.mrf.mxu0  ;;  %13038 = vmatpush1.msra.mxu1 %v28507_v20  ;;  %v13190_v20 = vand.u32 4294901760, %v13189_v50 }
 0x1e0   : > { %26659 = vmatprep.subr.mxu0 %v27181_v0  ;;  %v5736_v34 = vpop.f32.mrf.mxu1  ;;  %18216 = vrot.lane.b32.xlu0 %v28513_v54, %s27182_s12  ;;  %s30160_s12 = smov 109  }
 0x1e1   : > { %26660 = vmatpush3.msra.mxu0 %v28595_v14  ;;  %v28642_v43 = vadd.f32 %v5586_v18, %v28542_v19  ;;  %v5737_v60 = vadd.f32 %v5736_v34, %v5660_v33  ;;  %v5958_v24 = vpop.f32.mrf.mxu0  ;;  %13071 = vmatprep.mubr.f32.mxu1 %v27181_v0 }
 0x1e2   : > { %26661 = vmatprep.mubr.msk.f32.mxu0 %vm27198_vm4, %v27181_v0  ;;  %v26418_v25 = vpop.f32.mrf.mxu1  ;;  %26669 = vmatprep.subr.mxu0 %v27181_v0 }
 0x1e3   : > { %13073 = vmatmul.mubr.f32.vlgmr.msra.gmra.mxu1 %v28479_v23  ;;  %v5811_v19 = vadd.f32 %v5810_v41, %v5737_v60  ;;  %v26433_v36 = vpop.f32.mrf.mxu0  ;;  %26654 = vmatprep.subr.mxu1 %v27181_v0 }
 0x1e4   : > { %26662 = vmatmul.mubr.f32.vlgmr.msra.gmra.mxu0 %v28498_v16  ;;  %v5884_v58 = vpop.f32.mrf.mxu1  ;;  %18223 = vrot.lane.b32.xlu1 %v28513_v54, %s27183_s13  ;;  %v13540_v16 = vsel %vm5111_vm8, %v28574_v45, %v13538_v38  ;;  %v28675_v45 = vand.u32 4294901760, %v13621_v15  ;;  %s30161_s13 = smov 49  }
 0x1e5   : > { %26670 = vmatpush3.msra.mxu0 %v13188_v32  ;;  %v5885_v6 = vadd.f32 %v5884_v58, %v5811_v19  ;;  %v6135_v39 = vpop.f32.mrf.mxu0  ;;  %26655 = vmatpush3.msra.mxu1 %v13190_v20  ;;  %v13549_v3 = vsel %vm459_vm2, %v13540_v16, 0  ;;  %v406_v32 = vld [vmem:[%s30126_s3 + $0x78] sm:$0xff] }
 0x1e6   : > { %13582 = vmatprep.subr.mxu0 %v28611_v11  ;;  %v26428_v13 = vpop.f32.mrf.mxu1  ;;  %26656 = vmatprep.mubr.msk.f32.mxu1 %vm27198_vm4, %v27181_v0  ;;  %v28691_v33 = vand.u32 4294901760, %v13549_v3  ;;  %v14479_v7 = vsel %vm455_vm0, %v406_v32, 0 }
 0x1e7   : > { %26671 = vmatprep.mubr.msk.f32.mxu0 %vm27198_vm4, %v27181_v0  ;;  %v5959_v42 = vadd.f32 %v5958_v24, %v5885_v6  ;;  %v6137_v51 = vpop.f32.mrf.mxu0  ;;  %26657 = vmatmul.mubr.f32.vlgmr.msra.gmra.mxu1 %v28479_v23  ;;  %v28715_v20 = vand.u32 4294901760, %v14479_v7 }
 0x1e8   : > { %26664 = vmatprep.subr.mxu1 %v27181_v0  ;;  %v6030_v49 = vpop.f32.mrf.mxu1  ;;  %26672 = vmatmul.mubr.f32.vlgmr.msra.gmra.mxu0 %v28479_v23  ;;  %v28707_v41 = vsub.f32 %v13549_v3, %v28691_v33 }
 0x1e9   : > { %26665 = vmatpush3.msra.mxu1 %v28576_v17  ;;  %v6031_v4 = vadd.f32 %v6030_v49, %v5959_v42  ;;  %v6294_v14 = vpop.f32.mrf.mxu0  ;;  %13584 = vmatpush1.msra.mxu0 %v28625_v62 }
 0x1ea   : > { %26666 = vmatprep.mubr.msk.f32.mxu1 %vm27198_vm4, %v27181_v0  ;;  %v26438_v44 = vpop.f32.mrf.mxu1  ;;  %13743 = vmatprep.subr.mxu0 %v28634_v53 }
 0x1eb   : > { %26674 = vmatprep.subr.mxu1 %v27181_v0  ;;  %v28684_v22 = vadd.f32 %v6031_v4, %v28581_v8  ;;  %v6296_v9 = vpop.f32.mrf.mxu0  ;;  %13617 = vmatprep.mubr.f32.mxu0 %v27181_v0 }
 0x1ec   : > { %26667 = vmatmul.mubr.f32.vlgmr.msra.gmra.mxu1 %v28524_v37  ;;  %v6217_v28 = vpop.f32.mrf.mxu1  ;;  %13623 = vmatmul.mubr.f32.vlgmr.msra.gmra.mxu0 %v28675_v45 }
 0x1ed   : > { %26675 = vmatpush3.msra.mxu1 %v28576_v17  ;;  %v6218_v26 = vadd.f32 %v6217_v28, %v6135_v39  ;;  %v6448_v8 = vpop.f32.mrf.mxu0  ;;  %13746 = vmatpush1.msra.mxu0 %v28651_v56  ;;  %v14472_v17 = vsel %vm6043_vm9, %v14468_v21, %v28689_v30  ;;  %v14125_v56 = vand.u32 4294901760, %v28707_v41 }
 0x1ee   : > { %13664 = vmatprep.subr.mxu1 %v13663_v27  ;;  %v6219_v37 = vpop.f32.mrf.mxu1  ;;  %13897 = vmatprep.subr.mxu0 %v13661_v29  ;;  %v14483_v52 = vsel %vm459_vm2, %v14472_v17, 0 }
 0x1ef   : > { %26676 = vmatprep.mubr.msk.f32.mxu1 %vm27198_vm4, %v27181_v0  ;;  %v6295_v63 = vadd.f32 %v6294_v14, %v6218_v26  ;;  %v6220_v2 = vadd.f32 %v6219_v37, %v6137_v51  ;;  %v6450_v1 = vpop.f32.mrf.mxu0  ;;  %13779 = vmatprep.mubr.f32.mxu0 %v27181_v0  ;;  %v28722_v58 = vand.u32 4294901760, %v14483_v52 }
 0x1f0   : > { %26677 = vmatmul.mubr.f32.vlgmr.msra.gmra.mxu1 %v28479_v23  ;;  %v6370_v40 = vpop.f32.mrf.mxu1  ;;  %13782 = vmatmul.mubr.f32.vlgmr.msra.gmra.mxu0 %v28620_v47  ;;  %v14471_v23 = vsel %vm6043_vm9, %v14466_v35, %v14468_v21 }
 0x1f1   : > { %13670 = vmatpush1.msra.mxu1 %v13669_v61  ;;  %v6297_v50 = vadd.f32 %v6296_v9, %v6220_v2  ;;  %v6371_v57 = vadd.f32 %v6370_v40, %v6295_v63  ;;  %v6599_v18 = vpop.f32.mrf.mxu0  ;;  %13901 = vmatpush1.msra.mxu0 %v13667_v5  ;;  %v14481_v29 = vsel %vm459_vm2, %v14471_v23, 0  ;;  %v28734_v5 = vsub.f32 %v14479_v7, %v28715_v20  ;;  %v14475_v9 = vpop.permute.xlu1 %14474  ;;  %v407_v23 = vld [vmem:[%s30126_s3 + $0x80] sm:$0xff] }
 0x1f2   : > { %13819 = vmatprep.subr.mxu1 %v28611_v11  ;;  %v6372_v53 = vpop.f32.mrf.mxu1  ;;  %13703 = vmatprep.mubr.f32.mxu1 %v27181_v0  ;;  %v28739_v16 = vand.u32 4294901760, %v14481_v29  ;;  %v28748_v49 = vsub.f32 %v14483_v52, %v28722_v58 }
 0x1f3   : > { %13934 = vmatprep.mubr.f32.mxu0 %v27181_v0  ;;  %v6449_v34 = vadd.f32 %v6448_v8, %v6371_v57  ;;  %v6373_v60 = vadd.f32 %v6372_v53, %v6297_v50  ;;  %v26443_v24 = vpop.f32.mrf.mxu0  ;;  %26679 = vmatprep.subr.mxu0 %v27181_v0 }
 0x1f4   : > { %13705 = vmatmul.mubr.f32.vlgmr.msra.gmra.mxu1 %v28603_v31  ;;  %v6522_v25 = vpop.f32.mrf.mxu1  ;;  %13936 = vmatmul.mubr.f32.vlgmr.msra.gmra.mxu0 %v28603_v31  ;;  %v14598_v27 = vand.u32 4294901760, %v28748_v49 }
 0x1f5   : > { %13821 = vmatpush1.msra.mxu1 %v28625_v62  ;;  %v6451_v19 = vadd.f32 %v6450_v1, %v6373_v60  ;;  %v6523_v36 = vadd.f32 %v6522_v25, %v6449_v34  ;;  %v6749_v38 = vpop.f32.mrf.mxu0  ;;  %26680 = vmatpush3.msra.mxu0 %v28691_v33 }
 0x1f6   : > { %13973 = vmatprep.subr.mxu1 %v28611_v11  ;;  %v6524_v6 = vpop.f32.mrf.mxu1  ;;  %19156 = vrot.lane.b32.xlu0 %v28487_v10, %s27186_s16  ;;  %v14599_v2 = vsub.f32 %v28748_v49, %v14598_v27 }
 0x1f7   : > { %13854 = vmatprep.mubr.f32.mxu1 %v27181_v0  ;;  %v28731_v15 = vadd.f32 %v6523_v36, %v28631_v46  ;;  %v6525_v39 = vadd.f32 %v6524_v6, %v6451_v19  ;;  %v26453_v13 = vpop.f32.mrf.mxu0  ;;  %26681 = vmatprep.mubr.msk.f32.mxu0 %vm27198_vm4, %v27181_v0  ;;  %v14126_v46 = vsub.f32 %v28707_v41, %v14125_v56 }
 0x1f8   : > { %26689 = vmatprep.subr.mxu0 %v27181_v0  ;;  %v6675_v11 = vpop.f32.mrf.mxu1  ;;  %13858 = vmatmul.mubr.f32.vlgmr.msra.gmra.mxu1 %v28645_v55 }
 0x1f9   : > { %26682 = vmatmul.mubr.f32.vlgmr.msra.gmra.mxu0 %v28675_v45  ;;  %v28745_v42 = vadd.f32 %v6525_v39, %v28642_v43  ;;  %v6676_v51 = vadd.f32 %v6675_v11, %v6599_v18  ;;  %v6897_v12 = vpop.f32.mrf.mxu0  ;;  %13975 = vmatpush1.msra.mxu1 %v28625_v62  ;;  %v28757_v43 = vand.u32 4294901760, %v28734_v5  ;;  %v28762_v62 = vsub.f32 %v14481_v29, %v28739_v16 }
 0x1fa   : > { %26690 = vmatpush3.msra.mxu0 %v28707_v41  ;;  %v26448_v4 = vpop.f32.mrf.mxu1  ;;  %19158 = vrot.lane.b32.xlu1 %v28505_v59, %s27186_s16  ;;  %v14127_v21 = vand.u32 4294901760, %v14126_v46  ;;  %v15405_v41 = vpop.permute.xlu0 %15404 }
 0x1fb   : > { %19153 = vrot.lane.b32.xlu0 %v28513_v54, %s30158_s17  ;;  %v6750_v45 = vadd.f32 %v6749_v38, %v6676_v51  ;;  %v26463_v14 = vpop.f32.mrf.mxu0  ;;  %14008 = vmatprep.mubr.f32.mxu1 %v27181_v0  ;;  %v14558_v26 = vsub.f32 %v28734_v5, %v28757_v43  ;;  %v14604_v61 = vand.u32 4294901760, %v28762_v62 }
 0x1fc   : > { %26684 = vmatprep.subr.mxu1 %v27181_v0  ;;  %v6823_v3 = vpop.f32.mrf.mxu1  ;;  %26691 = vmatprep.mubr.msk.f32.mxu0 %vm27198_vm4, %v27181_v0 }
 0x1fd   : > { %26699 = vmatprep.subr.mxu0 %v27181_v0  ;;  %v6824_v44 = vadd.f32 %v6823_v3, %v6750_v45  ;;  %v7074_v48 = vpop.f32.mrf.mxu0  ;;  %14010 = vmatmul.mubr.f32.vlgmr.msra.gmra.mxu1 %v28603_v31  ;;  %v14605_v57 = vsub.f32 %v28762_v62, %v14604_v61 }
 0x1fe   : > { %26692 = vmatmul.mubr.f32.vlgmr.msra.gmra.mxu0 %v28620_v47  ;;  %v26458_v28 = vpop.f32.mrf.mxu1  ;;  %26685 = vmatpush3.msra.mxu1 %v14127_v21  ;;  %v14477_v47 = vsel %vm6050_vm10, %v28689_v30, %v14475_v9  ;;  %v28787_v30 = vand.u32 4294901760, %v14558_v26 }
 0x1ff   : > { %26700 = vmatpush3.msra.mxu0 %v14125_v56  ;;  %v6898_v8 = vadd.f32 %v6897_v12, %v6824_v44  ;;  %v7076_v32 = vpop.f32.mrf.mxu0  ;;  %19160 = vrot.lane.b32.xlu1 %v28513_v54, %s27186_s16  ;;  %v14486_v7 = vsel %vm459_vm2, %v14477_v47, 0  ;;  %v14606_v19 = vand.u32 4294901760, %v14605_v57 }
 0x200   : > { %14519 = vmatprep.subr.mxu0 %v28722_v58  ;;  %v6969_v37 = vpop.f32.mrf.mxu1  ;;  %26686 = vmatprep.mubr.msk.f32.mxu1 %vm27198_vm4, %v27181_v0  ;;  %v28804_v34 = vand.u32 4294901760, %v14486_v7 }
 0x201   : > { %26694 = vmatprep.subr.mxu1 %v27181_v0  ;;  %v6970_v17 = vadd.f32 %v6969_v37, %v6898_v8  ;;  %v7233_v63 = vpop.f32.mrf.mxu0  ;;  %26701 = vmatprep.mubr.msk.f32.mxu0 %vm27198_vm4, %v27181_v0 }
 0x202   : > { %26687 = vmatmul.mubr.f32.vlgmr.msra.gmra.mxu1 %v28603_v31  ;;  %v26468_v1 = vpop.f32.mrf.mxu1  ;;  %26702 = vmatmul.mubr.f32.vlgmr.msra.gmra.mxu0 %v28603_v31  ;;  %v28819_v13 = vsub.f32 %v14486_v7, %v28804_v34 }
 0x203   : > { %26695 = vmatpush3.msra.mxu1 %v28691_v33  ;;  %v28790_v35 = vadd.f32 %v6970_v17, %v28684_v22  ;;  %v7235_v40 = vpop.f32.mrf.mxu0  ;;  %14521 = vmatpush1.msra.mxu0 %v28739_v16  ;;  %v14600_v22 = vand.u32 4294901760, %v14599_v2 }
 0x204   : > { %26696 = vmatprep.mubr.msk.f32.mxu1 %vm27198_vm4, %v27181_v0  ;;  %v7156_v50 = vpop.f32.mrf.mxu1  ;;  %14680 = vmatprep.subr.mxu0 %v28748_v49  ;;  %v28808_v60 = vpop.permute.xlu1 %15406  ;;  %v15062_v21 = vand.u32 4294901760, %v28819_v13 }
 0x205   : > { %26704 = vmatprep.subr.mxu1 %v27181_v0  ;;  %v7157_v18 = vadd.f32 %v7156_v50, %v7074_v48  ;;  %14554 = vmatprep.mubr.f32.mxu0 %v27181_v0  ;;  %v7387_v53 = vpop.f32.mrf.mxu0  ;;  %v15409_v29 = vsel %vm6982_vm11, %v15405_v41, %v28808_v60  ;;  %v15403_v6 = vpop.permute.xlu0 %15402 }
 0x206   : > { %26697 = vmatmul.mubr.f32.vlgmr.msra.gmra.mxu1 %v28645_v55  ;;  %v7158_v52 = vpop.f32.mrf.mxu1  ;;  %14560 = vmatmul.mubr.f32.vlgmr.msra.gmra.mxu0 %v28787_v30  ;;  %v15408_v4 = vsel %vm6982_vm11, %v15403_v6, %v15405_v41  ;;  %v408_v6 = vld [vmem:[%s30126_s3 + $0x88] sm:$0xff] }
 0x207   : > { %26705 = vmatpush3.msra.mxu1 %v28691_v33  ;;  %v7234_v24 = vadd.f32 %v7233_v63, %v7157_v18  ;;  %v7159_v25 = vadd.f32 %v7158_v52, %v7076_v32  ;;  %14683 = vmatpush1.msra.mxu0 %v28762_v62  ;;  %v7389_v56 = vpop.f32.mrf.mxu0  ;;  %v15416_v33 = vsel %vm455_vm0, %v407_v23, 0  ;;  %v15418_v28 = vsel %vm459_vm2, %v15408_v4, 0 }
 0x208   : > { %14601 = vmatprep.subr.mxu1 %v14600_v22  ;;  %v7309_v55 = vpop.f32.mrf.mxu1  ;;  %14834 = vmatprep.subr.mxu0 %v14598_v27  ;;  %v28823_v49 = vand.u32 4294901760, %v15416_v33 }
 0x209   : > { %26706 = vmatprep.mubr.msk.f32.mxu1 %vm27198_vm4, %v27181_v0  ;;  %v7236_v36 = vadd.f32 %v7235_v40, %v7159_v25  ;;  %v7310_v38 = vadd.f32 %v7309_v55, %v7234_v24  ;;  %14716 = vmatprep.mubr.f32.mxu0 %v27181_v0  ;;  %v7538_v51 = vpop.f32.mrf.mxu0  ;;  %v15412_v40 = vpop.permute.xlu1 %15411 }
 0x20a   : > { %26707 = vmatmul.mubr.f32.vlgmr.msra.gmra.mxu1 %v28603_v31  ;;  %v7311_v39 = vpop.f32.mrf.mxu1  ;;  %14719 = vmatmul.mubr.f32.vlgmr.msra.gmra.mxu0 %v28734_v5  ;;  %v15420_v31 = vsel %vm459_vm2, %v15409_v29, 0  ;;  %v28849_v37 = vsub.f32 %v15416_v33, %v28823_v49  ;;  %v15414_v52 = vsel %vm6989_vm12, %v28808_v60, %v15412_v40 }
 0x20b   : > { %14607 = vmatpush1.msra.mxu1 %v14606_v19  ;;  %v7388_v11 = vadd.f32 %v7387_v53, %v7310_v38  ;;  %v7312_v46 = vadd.f32 %v7311_v39, %v7236_v36  ;;  %14838 = vmatpush1.msra.mxu0 %v14604_v61  ;;  %v26473_v3 = vpop.f32.mrf.mxu0  ;;  %v28837_v27 = vand.u32 4294901760, %v15420_v31  ;;  %v28854_v61 = vand.u32 4294901760, %v15418_v28 }
 0x20c   : > { %14756 = vmatprep.subr.mxu1 %v28722_v58  ;;  %v7461_v12 = vpop.f32.mrf.mxu1  ;;  %14640 = vmatprep.mubr.f32.mxu1 %v27181_v0  ;;  %v28869_v1 = vand.u32 4294901760, %v28849_v37  ;;  %v15423_v19 = vsel %vm459_vm2, %v15414_v52, 0 }
 0x20d   : > { %14871 = vmatprep.mubr.f32.mxu0 %v27181_v0  ;;  %v7390_v45 = vadd.f32 %v7389_v56, %v7312_v46  ;;  %v7462_v14 = vadd.f32 %v7461_v12, %v7388_v11  ;;  %26709 = vmatprep.subr.mxu0 %v27181_v0  ;;  %v7688_v9 = vpop.f32.mrf.mxu0  ;;  %v28860_v17 = vsub.f32 %v15420_v31, %v28837_v27  ;;  %v28911_v39 = vand.u32 4294901760, %v15423_v19 }
 0x20e   : > { %14642 = vmatmul.mubr.f32.vlgmr.msra.gmra.mxu1 %v28715_v20  ;;  %v7463_v62 = vpop.f32.mrf.mxu1  ;;  %14873 = vmatmul.mubr.f32.vlgmr.msra.gmra.mxu0 %v28715_v20  ;;  %v28874_v7 = vsub.f32 %v15418_v28, %v28854_v61  ;;  %v15495_v53 = vsub.f32 %v28849_v37, %v28869_v1 }
 0x20f   : > { %14758 = vmatpush1.msra.mxu1 %v28739_v16  ;;  %v28835_v44 = vadd.f32 %v7462_v14, %v28731_v15  ;;  %v7464_v48 = vadd.f32 %v7463_v62, %v7390_v45  ;;  %26710 = vmatpush3.msra.mxu0 %v28804_v34  ;;  %v26483_v32 = vpop.f32.mrf.mxu0  ;;  %v15535_v18 = vand.u32 4294901760, %v28860_v17  ;;  %v16353_v62 = vsel %vm455_vm0, %v408_v6, 0 }
 0x210   : > { %14910 = vmatprep.subr.mxu1 %v28722_v58  ;;  %v7614_v26 = vpop.f32.mrf.mxu1  ;;  %20093 = vrot.lane.b32.xlu0 %v28487_v10, %s30159_s10  ;;  %v15063_v10 = vsub.f32 %v28819_v13, %v15062_v21  ;;  %v28903_v38 = vand.u32 4294901760, %v15495_v53  ;;  %v28933_v32 = vand.u32 4294901760, %v16353_v62 }
 0x211   : > { %14791 = vmatprep.mubr.f32.mxu1 %v27181_v0  ;;  %v28846_v8 = vadd.f32 %v7464_v48, %v28745_v42  ;;  %v7615_v15 = vadd.f32 %v7614_v26, %v7538_v51  ;;  %26711 = vmatprep.mubr.msk.f32.mxu0 %vm27198_vm4, %v27181_v0  ;;  %v7836_v47 = vpop.f32.mrf.mxu0 }
 0x212   : > { %26719 = vmatprep.subr.mxu0 %v27181_v0  ;;  %v26478_v58 = vpop.f32.mrf.mxu1  ;;  %14795 = vmatmul.mubr.f32.vlgmr.msra.gmra.mxu1 %v28757_v43  ;;  %v15064_v41 = vand.u32 4294901760, %v15063_v10 }
 0x213   : > { %26712 = vmatmul.mubr.f32.vlgmr.msra.gmra.mxu0 %v28787_v30  ;;  %v7689_v42 = vadd.f32 %v7688_v9, %v7615_v15  ;;  %14912 = vmatpush1.msra.mxu1 %v28739_v16  ;;  %v26493_v30 = vpop.f32.mrf.mxu0  ;;  %v28927_v9 = vsub.f32 %v15423_v19, %v28911_v39 }
 0x214   : > { %26720 = vmatpush3.msra.mxu0 %v28819_v13  ;;  %v7762_v63 = vpop.f32.mrf.mxu1  ;;  %20095 = vrot.lane.b32.xlu1 %v28505_v59, %s30159_s10 }
 0x215   : > { %20090 = vrot.lane.b32.xlu0 %v28513_v54, %s30150_s30  ;;  %v7763_v2 = vadd.f32 %v7762_v63, %v7689_v42  ;;  %14945 = vmatprep.mubr.f32.mxu1 %v27181_v0  ;;  %v8013_v57 = vpop.f32.mrf.mxu0 }
 0x216   : > { %26714 = vmatprep.subr.mxu1 %v27181_v0  ;;  %v26488_v16 = vpop.f32.mrf.mxu1  ;;  %26721 = vmatprep.mubr.msk.f32.mxu0 %vm27198_vm4, %v27181_v0 }
 0x217   : > { %26729 = vmatprep.subr.mxu0 %v27181_v0  ;;  %v7837_v50 = vadd.f32 %v7836_v47, %v7763_v2  ;;  %14947 = vmatmul.mubr.f32.vlgmr.msra.gmra.mxu1 %v28715_v20  ;;  %v8015_v24 = vpop.f32.mrf.mxu0  ;;  %v15999_v2 = vand.u32 4294901760, %v28927_v9 }
 0x218   : > { %26722 = vmatmul.mubr.f32.vlgmr.msra.gmra.mxu0 %v28734_v5  ;;  %v7908_v22 = vpop.f32.mrf.mxu1  ;;  %26715 = vmatpush3.msra.mxu1 %v15064_v41  ;;  %v15541_v5 = vand.u32 4294901760, %v28874_v7 }
 0x219   : > { %26730 = vmatpush3.msra.mxu0 %v15062_v21  ;;  %v7909_v23 = vadd.f32 %v7908_v22, %v7837_v50  ;;  %20097 = vrot.lane.b32.xlu1 %v28513_v54, %s30159_s10  ;;  %v8172_v56 = vpop.f32.mrf.mxu0  ;;  %v15536_v54 = vsub.f32 %v28860_v17, %v15535_v18 }
 0x21a   : > { %15456 = vmatprep.subr.mxu0 %v28837_v27  ;;  %v26498_v25 = vpop.f32.mrf.mxu1  ;;  %26716 = vmatprep.mubr.msk.f32.mxu1 %vm27198_vm4, %v27181_v0  ;;  %v16342_v60 = vpop.permute.xlu0 %16341  ;;  %v15542_v13 = vsub.f32 %v28874_v7, %v15541_v5 }
 0x21b   : > { %26724 = vmatprep.subr.mxu1 %v27181_v0  ;;  %v28894_v55 = vadd.f32 %v7909_v23, %v28790_v35  ;;  %26731 = vmatprep.mubr.msk.f32.mxu0 %vm27198_vm4, %v27181_v0  ;;  %v8174_v35 = vpop.f32.mrf.mxu0  ;;  %v15537_v12 = vand.u32 4294901760, %v15536_v54 }
 0x21c   : > { %26717 = vmatmul.mubr.f32.vlgmr.msra.gmra.mxu1 %v28715_v20  ;;  %v8095_v36 = vpop.f32.mrf.mxu1  ;;  %26732 = vmatmul.mubr.f32.vlgmr.msra.gmra.mxu0 %v28715_v20 }
 0x21d   : > { %26725 = vmatpush3.msra.mxu1 %v28804_v34  ;;  %v8096_v33 = vadd.f32 %v8095_v36, %v8013_v57  ;;  %15458 = vmatpush1.msra.mxu0 %v28854_v61  ;;  %v8326_v4 = vpop.f32.mrf.mxu0 }
 0x21e   : > { %26726 = vmatprep.mubr.msk.f32.mxu1 %vm27198_vm4, %v27181_v0  ;;  %v8097_v29 = vpop.f32.mrf.mxu1  ;;  %15617 = vmatprep.subr.mxu0 %v28860_v17  ;;  %v28916_v11 = vpop.permute.xlu1 %16343 }
 0x21f   : > { %26734 = vmatprep.subr.mxu1 %v27181_v0  ;;  %v8173_v46 = vadd.f32 %v8172_v56, %v8096_v33  ;;  %v8098_v51 = vadd.f32 %v8097_v29, %v8015_v24  ;;  %15491 = vmatprep.mubr.f32.mxu0 %v27181_v0  ;;  %v16340_v45 = vpop.permute.xlu0 %16339  ;;  %v16346_v21 = vsel %vm7921_vm13, %v16342_v60, %v28916_v11 }
 0x220   : > { %26727 = vmatmul.mubr.f32.vlgmr.msra.gmra.mxu1 %v28757_v43  ;;  %v8248_v31 = vpop.f32.mrf.mxu1  ;;  %15497 = vmatmul.mubr.f32.vlgmr.msra.gmra.mxu0 %v28903_v38  ;;  %v8328_v43 = vpop.f32.mrf.mxu0  ;;  %v16357_v58 = vsel %vm459_vm2, %v16346_v21, 0  ;;  %v16345_v10 = vsel %vm7921_vm13, %v16340_v45, %v16342_v60 }
 0x221   : > { %26735 = vmatpush3.msra.mxu1 %v28804_v34  ;;  %v8175_v14 = vadd.f32 %v8174_v35, %v8098_v51  ;;  %v8249_v3 = vadd.f32 %v8248_v31, %v8173_v46  ;;  %15620 = vmatpush1.msra.mxu0 %v28874_v7  ;;  %v15543_v34 = vand.u32 4294901760, %v15542_v13  ;;  %v28945_v16 = vand.u32 4294901760, %v16357_v58 }
 0x222   : > { %15538 = vmatprep.subr.mxu1 %v15537_v12  ;;  %v8250_v48 = vpop.f32.mrf.mxu1  ;;  %15771 = vmatprep.subr.mxu0 %v15535_v18  ;;  %v8477_v17 = vpop.f32.mrf.mxu0  ;;  %v16355_v7 = vsel %vm459_vm2, %v16345_v10, 0  ;;  %v28956_v18 = vsub.f32 %v16353_v62, %v28933_v32 }
 0x223   : > { %26736 = vmatprep.mubr.msk.f32.mxu1 %vm27198_vm4, %v27181_v0  ;;  %v8327_v28 = vadd.f32 %v8326_v4, %v8249_v3  ;;  %v8251_v26 = vadd.f32 %v8250_v48, %v8175_v14  ;;  %15653 = vmatprep.mubr.f32.mxu0 %v27181_v0  ;;  %v28960_v52 = vand.u32 4294901760, %v16355_v7  ;;  %v28967_v24 = vsub.f32 %v16357_v58, %v28945_v16 }
 0x224   : > { %26737 = vmatmul.mubr.f32.vlgmr.msra.gmra.mxu1 %v28715_v20  ;;  %v8400_v15 = vpop.f32.mrf.mxu1  ;;  %15656 = vmatmul.mubr.f32.vlgmr.msra.gmra.mxu0 %v28849_v37  ;;  %v26503_v40 = vpop.f32.mrf.mxu0 }
 0x225   : > { %15544 = vmatpush1.msra.mxu1 %v15543_v34  ;;  %v8329_v42 = vadd.f32 %v8328_v43, %v8251_v26  ;;  %v8401_v47 = vadd.f32 %v8400_v15, %v8327_v28  ;;  %15775 = vmatpush1.msra.mxu0 %v15541_v5  ;;  %v28974_v5 = vand.u32 4294901760, %v28956_v18  ;;  %v28979_v19 = vsub.f32 %v16355_v7, %v28960_v52 }
 0x226   : > { %15693 = vmatprep.subr.mxu1 %v28837_v27  ;;  %v8402_v63 = vpop.f32.mrf.mxu1  ;;  %15577 = vmatprep.mubr.f32.mxu1 %v27181_v0  ;;  %v8627_v57 = vpop.f32.mrf.mxu0  ;;  %v16472_v33 = vand.u32 4294901760, %v28967_v24 }
 0x227   : > { %15808 = vmatprep.mubr.f32.mxu0 %v27181_v0  ;;  %v28943_v20 = vadd.f32 %v8401_v47, %v28835_v44  ;;  %v8403_v30 = vadd.f32 %v8402_v63, %v8329_v42  ;;  %26739 = vmatprep.subr.mxu0 %v27181_v0  ;;  %v16432_v29 = vsub.f32 %v28956_v18, %v28974_v5  ;;  %v16478_v51 = vand.u32 4294901760, %v28979_v19  ;;  %v409_v47 = vld [vmem:[%s30126_s3 + $0x90] sm:$0xff] }
 0x228   : > { %15579 = vmatmul.mubr.f32.vlgmr.msra.gmra.mxu1 %v28823_v49  ;;  %v8553_v41 = vpop.f32.mrf.mxu1  ;;  %15810 = vmatmul.mubr.f32.vlgmr.msra.gmra.mxu0 %v28823_v49  ;;  %v26513_v23 = vpop.f32.mrf.mxu0  ;;  %v16473_v4 = vsub.f32 %v28967_v24, %v16472_v33 }
 0x229   : > { %15695 = vmatpush1.msra.mxu1 %v28854_v61  ;;  %v28953_v50 = vadd.f32 %v8403_v30, %v28846_v8  ;;  %v8554_v44 = vadd.f32 %v8553_v41, %v8477_v17  ;;  %26740 = vmatpush3.msra.mxu0 %v28911_v39  ;;  %v16000_v8 = vsub.f32 %v28927_v9, %v15999_v2 }
 0x22a   : > { %15847 = vmatprep.subr.mxu1 %v28837_v27  ;;  %v26508_v22 = vpop.f32.mrf.mxu1  ;;  %15728 = vmatprep.mubr.f32.mxu1 %v27181_v0  ;;  %v8775_v60 = vpop.f32.mrf.mxu0  ;;  %v16479_v48 = vsub.f32 %v28979_v19, %v16478_v51  ;;  %v16474_v28 = vand.u32 4294901760, %v16473_v4  ;;  %v29081_v4 = vld [vmem:[%s28474_s20 + $0x8] sm:$0xf] }
 0x22b   : > { %26741 = vmatprep.mubr.msk.f32.mxu0 %vm27198_vm4, %v27181_v0  ;;  %v8628_v53 = vadd.f32 %v8627_v57, %v8554_v44  ;;  %26749 = vmatprep.subr.mxu0 %v27181_v0  ;;  %v17293_v44 = vsel %vm455_vm0, %v409_v47, 0 }
 0x22c   : > { %15732 = vmatmul.mubr.f32.vlgmr.msra.gmra.mxu1 %v28869_v1  ;;  %v8701_v27 = vpop.f32.mrf.mxu1  ;;  %26742 = vmatmul.mubr.f32.vlgmr.msra.gmra.mxu0 %v28903_v38  ;;  %v26523_v36 = vpop.f32.mrf.mxu0 }
 0x22d   : > { %15849 = vmatpush1.msra.mxu1 %v28854_v61  ;;  %v8702_v25 = vadd.f32 %v8701_v27, %v8628_v53  ;;  %26750 = vmatpush3.msra.mxu0 %v28927_v9  ;;  %v16001_v61 = vand.u32 4294901760, %v16000_v8  ;;  %v16349_v38 = vpop.permute.xlu1 %16348 }
 0x22e   : > { %15882 = vmatprep.mubr.f32.mxu1 %v27181_v0  ;;  %v26518_v56 = vpop.f32.mrf.mxu1  ;;  %26744 = vmatprep.subr.mxu1 %v27181_v0  ;;  %v8953_v13 = vpop.f32.mrf.mxu0  ;;  %v16351_v12 = vsel %vm7928_vm14, %v28916_v11, %v16349_v38  ;;  %v29006_v11 = vand.u32 4294901760, %v16432_v29 }
 0x22f   : > { %26751 = vmatprep.mubr.msk.f32.mxu0 %vm27198_vm4, %v27181_v0  ;;  %v8776_v54 = vadd.f32 %v8775_v60, %v8702_v25  ;;  %26759 = vmatprep.subr.mxu0 %v27181_v0  ;;  %v29046_v25 = vand.u32 4294901760, %v17293_v44 }
 0x230   : > { %15884 = vmatmul.mubr.f32.vlgmr.msra.gmra.mxu1 %v28823_v49  ;;  %v8847_v35 = vpop.f32.mrf.mxu1  ;;  %26752 = vmatmul.mubr.f32.vlgmr.msra.gmra.mxu0 %v28849_v37  ;;  %v8955_v31 = vpop.f32.mrf.mxu0 }
 0x231   : > { %26745 = vmatpush3.msra.mxu1 %v16001_v61  ;;  %v8848_v6 = vadd.f32 %v8847_v35, %v8776_v54  ;;  %26760 = vmatpush3.msra.mxu0 %v15999_v2  ;;  %v29065_v29 = vsub.f32 %v17293_v44, %v29046_v25 }
 0x232   : > { %26746 = vmatprep.mubr.msk.f32.mxu1 %vm27198_vm4, %v27181_v0  ;;  %v26528_v46 = vpop.f32.mrf.mxu1  ;;  %16393 = vmatprep.subr.mxu0 %v28945_v16  ;;  %v9112_v62 = vpop.f32.mrf.mxu0 }
 0x233   : > { %26754 = vmatprep.subr.mxu1 %v27181_v0  ;;  %v28998_v37 = vadd.f32 %v8848_v6, %v28894_v55  ;;  %26761 = vmatprep.mubr.msk.f32.mxu0 %vm27198_vm4, %v27181_v0  ;;  %v16360_v55 = vsel %vm459_vm2, %v16351_v12, 0 }
 0x234   : > { %26747 = vmatmul.mubr.f32.vlgmr.msra.gmra.mxu1 %v28823_v49  ;;  %v9035_v45 = vpop.f32.mrf.mxu1  ;;  %26762 = vmatmul.mubr.f32.vlgmr.msra.gmra.mxu0 %v28823_v49  ;;  %v17283_v14 = vpop.permute.xlu0 %17282  ;;  %v29017_v15 = vand.u32 4294901760, %v16360_v55 }
 0x235   : > { %26755 = vmatpush3.msra.mxu1 %v28911_v39  ;;  %v9036_v3 = vadd.f32 %v9035_v45, %v8953_v13  ;;  %16395 = vmatpush1.msra.mxu0 %v28960_v52  ;;  %v9114_v34 = vpop.f32.mrf.mxu0  ;;  %v29086_v45 = vld [vmem:[%s28474_s20] sm:$0xff] }
 0x236   : > { %26756 = vmatprep.mubr.msk.f32.mxu1 %vm27198_vm4, %v27181_v0  ;;  %v9037_v21 = vpop.f32.mrf.mxu1  ;;  %16554 = vmatprep.subr.mxu0 %v28967_v24  ;;  %v29035_v57 = vsub.f32 %v16360_v55, %v29017_v15 }
 0x237   : > { %26764 = vmatprep.subr.mxu1 %v27181_v0  ;;  %v9113_v43 = vadd.f32 %v9112_v62, %v9036_v3  ;;  %v9038_v9 = vadd.f32 %v9037_v21, %v8955_v31  ;;  %16428 = vmatprep.mubr.f32.mxu0 %v27181_v0 }
 0x238   : > { %26757 = vmatmul.mubr.f32.vlgmr.msra.gmra.mxu1 %v28869_v1  ;;  %v9188_v26 = vpop.f32.mrf.mxu1  ;;  %16434 = vmatmul.mubr.f32.vlgmr.msra.gmra.mxu0 %v29006_v11  ;;  %v29021_v58 = vpop.permute.xlu1 %17284 }
 0x239   : > { %26765 = vmatpush3.msra.mxu1 %v28911_v39  ;;  %v9115_v10 = vadd.f32 %v9114_v34, %v9038_v9  ;;  %v9189_v42 = vadd.f32 %v9188_v26, %v9113_v43  ;;  %16557 = vmatpush1.msra.mxu0 %v28979_v19  ;;  %v9266_v1 = vpop.f32.mrf.mxu0  ;;  %v16480_v39 = vand.u32 4294901760, %v16479_v48  ;;  %v17278_v63 = vpop.permute.xlu0 %17277  ;;  %v17288_v40 = vsel %vm436_vm3, %v17283_v14, %v29021_v58 }
 0x23a   : > { %16475 = vmatprep.subr.mxu1 %v16474_v28  ;;  %v9190_v17 = vpop.f32.mrf.mxu1  ;;  %16708 = vmatprep.subr.mxu0 %v16472_v33  ;;  %v17291_v23 = vsel %vm436_vm3, %v17278_v63, %v17283_v14  ;;  %v16936_v19 = vand.u32 4294901760, %v29035_v57 }
 0x23b   : > { %26766 = vmatprep.mubr.msk.f32.mxu1 %vm27198_vm4, %v27181_v0  ;;  %v9267_v2 = vadd.f32 %v9266_v1, %v9189_v42  ;;  %v9191_v30 = vadd.f32 %v9190_v17, %v9115_v10  ;;  %16590 = vmatprep.mubr.f32.mxu0 %v27181_v0  ;;  %v9268_v7 = vpop.f32.mrf.mxu0 }
 0x23c   : > { %26767 = vmatmul.mubr.f32.vlgmr.msra.gmra.mxu1 %v28823_v49  ;;  %v9340_v41 = vpop.f32.mrf.mxu1  ;;  %16593 = vmatmul.mubr.f32.vlgmr.msra.gmra.mxu0 %v28956_v18  ;;  %v17298_v49 = vsel %vm459_vm2, %v17288_v40, 0  ;;  %v16937_v13 = vsub.f32 %v29035_v57, %v16936_v19 }
 0x23d   : > { %16481 = vmatpush1.msra.mxu1 %v16480_v39  ;;  %v9269_v22 = vadd.f32 %v9268_v7, %v9191_v30  ;;  %v9341_v8 = vadd.f32 %v9340_v41, %v9267_v2  ;;  %16712 = vmatpush1.msra.mxu0 %v16478_v51  ;;  %v9417_v53 = vpop.f32.mrf.mxu0  ;;  %v29053_v54 = vand.u32 4294901760, %v17298_v49  ;;  %v17287_v48 = vpop.permute.xlu1 %17286 }
 0x23e   : > { %16630 = vmatprep.subr.mxu1 %v28945_v16  ;;  %16514 = vmatprep.mubr.f32.mxu1 %v27181_v0  ;;  %v9342_v27 = vpop.f32.mrf.mxu1  ;;  %v16938_v55 = vand.u32 4294901760, %v16937_v13  ;;  %v17289_v47 = vsel %vm436_vm3, %v29021_v58, %v17287_v48 }
 0x23f   : > { %16745 = vmatprep.mubr.f32.mxu0 %v27181_v0  ;;  %v29044_v24 = vadd.f32 %v9341_v8, %v28943_v20  ;;  %26769 = vmatprep.subr.mxu0 %v27181_v0  ;;  %v9343_v60 = vadd.f32 %v9342_v27, %v9269_v22  ;;  %v26533_v56 = vpop.f32.mrf.mxu0  ;;  %v17296_v20 = vsel %vm459_vm2, %v17291_v23, 0  ;;  %v29076_v51 = vsub.f32 %v17298_v49, %v29053_v54  ;;  %v410_v23 = vld [vmem:[%s30126_s3 + $0x98] sm:$0xff] }
 0x240   : > { %16516 = vmatmul.mubr.f32.vlgmr.msra.gmra.mxu1 %v28933_v32  ;;  %16747 = vmatmul.mubr.f32.vlgmr.msra.gmra.mxu0 %v28933_v32  ;;  %v9493_v61 = vpop.f32.mrf.mxu1  ;;  %v29070_v6 = vand.u32 4294901760, %v17296_v20  ;;  %v17300_v30 = vsel %vm459_vm2, %v17289_v47, 0 }
 0x241   : > { %16632 = vmatpush1.msra.mxu1 %v28960_v52  ;;  %26770 = vmatpush3.msra.mxu0 %v29017_v15  ;;  %v29059_v36 = vadd.f32 %v9343_v60, %v28953_v50  ;;  %v9494_v38 = vadd.f32 %v9493_v61, %v9417_v53  ;;  %v9567_v33 = vpop.f32.mrf.mxu0  ;;  %v17412_v43 = vand.u32 4294901760, %v29076_v51  ;;  %v29138_v27 = vand.u32 4294901760, %v17300_v30 }
 0x242   : > { %16784 = vmatprep.subr.mxu1 %v28945_v16  ;;  %21952 = vrot.lane.b32.xlu0 %v28505_v59, %s30151_s7  ;;  %v26538_v35 = vpop.f32.mrf.mxu1  ;;  %v29096_v62 = vsub.f32 %v17296_v20, %v29070_v6 }
 0x243   : > { %16665 = vmatprep.mubr.f32.mxu1 %v27181_v0  ;;  %26771 = vmatprep.mubr.msk.f32.mxu0 %vm27198_vm4, %v27181_v0  ;;  %v9568_v16 = vadd.f32 %v9567_v33, %v9494_v38  ;;  %v26543_v50 = vpop.f32.mrf.mxu0  ;;  %v18230_v33 = vsel %vm455_vm0, %v410_v23, 0  ;;  %v29153_v13 = vsub.f32 %v17300_v30, %v29138_v27 }
 0x244   : > { %26779 = vmatprep.subr.mxu0 %v27181_v0  ;;  %16669 = vmatmul.mubr.f32.vlgmr.msra.gmra.mxu1 %v28974_v5  ;;  %v9641_v46 = vpop.f32.mrf.mxu1 }
 0x245   : > { %26772 = vmatmul.mubr.f32.vlgmr.msra.gmra.mxu0 %v29006_v11  ;;  %16786 = vmatpush1.msra.mxu1 %v28960_v52  ;;  %v9642_v12 = vadd.f32 %v9641_v46, %v9568_v16  ;;  %v9715_v31 = vpop.f32.mrf.mxu0  ;;  %v29091_v11 = vand.u32 4294901760, %v29065_v29 }
 0x246   : > { %26780 = vmatpush3.msra.mxu0 %v29035_v57  ;;  %21954 = vrot.lane.b32.xlu1 %v29081_v4, %s30151_s7  ;;  %v26548_v14 = vpop.f32.mrf.mxu1 }
 0x247   : > { %21950 = vrot.lane.b32.xlu0 %v29086_v45, %s30151_s7  ;;  %16819 = vmatprep.mubr.f32.mxu1 %v27181_v0  ;;  %v9716_v52 = vadd.f32 %v9715_v31, %v9642_v12  ;;  %v26553_v3 = vpop.f32.mrf.mxu0  ;;  %v17372_v28 = vsub.f32 %v29065_v29, %v29091_v11  ;;  %v29157_v31 = vand.u32 4294901760, %v18230_v33 }
 0x248   : > { %26774 = vmatprep.subr.mxu1 %v27181_v0  ;;  %26781 = vmatprep.mubr.msk.f32.mxu0 %vm27198_vm4, %v27181_v0  ;;  %v9787_v21 = vpop.f32.mrf.mxu1 }
 0x249   : > { %26789 = vmatprep.subr.mxu0 %v27181_v0  ;;  %16821 = vmatmul.mubr.f32.vlgmr.msra.gmra.mxu1 %v28933_v32  ;;  %v9788_v9 = vadd.f32 %v9787_v21, %v9716_v52  ;;  %v9890_v34 = vpop.f32.mrf.mxu0  ;;  %v29124_v58 = vand.u32 4294901760, %v17372_v28  ;;  %v17876_v21 = vand.u32 4294901760, %v29153_v13 }
 0x24a   : > { %26782 = vmatmul.mubr.f32.vlgmr.msra.gmra.mxu0 %v28956_v18  ;;  %26775 = vmatpush3.msra.mxu1 %v16938_v55  ;;  %v26558_v26 = vpop.f32.mrf.mxu1  ;;  %v17418_v18 = vand.u32 4294901760, %v29096_v62 }
 0x24b   : > { %26790 = vmatpush3.msra.mxu0 %v16936_v19  ;;  %21959 = vrot.lane.b32.xlu1 %v29086_v45, %s30152_s8  ;;  %v29110_v10 = vadd.f32 %v9788_v9, %v28998_v37  ;;  %v9892_v42 = vpop.f32.mrf.mxu0  ;;  %v17413_v37 = vsub.f32 %v29076_v51, %v17412_v43  ;;  %s27074_s8 = smul.u32 48, %s30173_s22 }
 0x24c   : > { %17333 = vmatprep.subr.mxu0 %v29053_v54  ;;  %26776 = vmatprep.mubr.msk.f32.mxu1 %vm27198_vm4, %v27181_v0  ;;  %v9972_v1 = vpop.f32.mrf.mxu1  ;;  %v17419_v44 = vsub.f32 %v29096_v62, %v17418_v18 }
 0x24d   : > { %26784 = vmatprep.subr.mxu1 %v27181_v0  ;;  %26791 = vmatprep.mubr.msk.f32.mxu0 %vm27198_vm4, %v27181_v0  ;;  %v9973_v17 = vadd.f32 %v9972_v1, %v9890_v34  ;;  %v10049_v39 = vpop.f32.mrf.mxu0  ;;  %v18220_v63 = vpop.permute.xlu0 %18219  ;;  %v17414_v22 = vand.u32 4294901760, %v17413_v37 }
 0x24e   : > { %26777 = vmatmul.mubr.f32.vlgmr.msra.gmra.mxu1 %v28933_v32  ;;  %26792 = vmatmul.mubr.f32.vlgmr.msra.gmra.mxu0 %v28933_v32  ;;  %v9974_v2 = vpop.f32.mrf.mxu1  ;;  %v17420_v20 = vand.u32 4294901760, %v17419_v44 }
 0x24f   : > { %26785 = vmatpush3.msra.mxu1 %v29017_v15  ;;  %17335 = vmatpush1.msra.mxu0 %v29070_v6  ;;  %v10050_v40 = vadd.f32 %v10049_v39, %v9973_v17  ;;  %v9975_v7 = vadd.f32 %v9974_v2, %v9892_v42  ;;  %v10051_v41 = vpop.f32.mrf.mxu0 }
 0x250   : > { %26786 = vmatprep.mubr.msk.f32.mxu1 %vm27198_vm4, %v27181_v0  ;;  %17494 = vmatprep.subr.mxu0 %v29076_v51  ;;  %v10125_v57 = vpop.f32.mrf.mxu1 }
 0x251   : > { %26794 = vmatprep.subr.mxu1 %v27181_v0  ;;  %17368 = vmatprep.mubr.f32.mxu0 %v27181_v0  ;;  %v10052_v8 = vadd.f32 %v10051_v41, %v9975_v7  ;;  %v10126_v53 = vadd.f32 %v10125_v57, %v10050_v40  ;;  %v10203_v49 = vpop.f32.mrf.mxu0  ;;  %v29142_v60 = vpop.permute.xlu1 %18221 }
 0x252   : > { %26787 = vmatmul.mubr.f32.vlgmr.msra.gmra.mxu1 %v28974_v5  ;;  %17374 = vmatmul.mubr.f32.vlgmr.msra.gmra.mxu0 %v29124_v58  ;;  %v10127_v56 = vpop.f32.mrf.mxu1  ;;  %v18217_v38 = vpop.permute.xlu0 %18216 }
 0x253   : > { %26795 = vmatpush3.msra.mxu1 %v29017_v15  ;;  %17497 = vmatpush1.msra.mxu0 %v29096_v62  ;;  %v10204_v5 = vadd.f32 %v10203_v49, %v10126_v53  ;;  %v10128_v19 = vadd.f32 %v10127_v56, %v10052_v8  ;;  %v10205_v61 = vpop.f32.mrf.mxu0  ;;  %v18225_v15 = vsel %vm450_vm1, %v18220_v63, %v29142_v60 }
 0x254   : > { %17415 = vmatprep.subr.mxu1 %v17414_v22  ;;  %17648 = vmatprep.subr.mxu0 %v17412_v43  ;;  %v18228_v14 = vsel %vm450_vm1, %v18217_v38, %v18220_v63 }
 0x255   : > { %26796 = vmatprep.mubr.msk.f32.mxu1 %vm27198_vm4, %v27181_v0  ;;  %17530 = vmatprep.mubr.f32.mxu0 %v27181_v0  ;;  %v10206_v35 = vadd.f32 %v10205_v61, %v10128_v19  ;;  %v10277_v16 = vpop.f32.mrf.mxu1  ;;  %v10354_v50 = vpop.f32.mrf.mxu0 }
 0x256   : > { %26797 = vmatmul.mubr.f32.vlgmr.msra.gmra.mxu1 %v28933_v32  ;;  %17533 = vmatmul.mubr.f32.vlgmr.msra.gmra.mxu0 %v29065_v29  ;;  %v10278_v46 = vadd.f32 %v10277_v16, %v10204_v5  ;;  %v18235_v32 = vsel %vm459_vm2, %v18225_v15, 0  ;;  %v18224_v40 = vpop.permute.xlu1 %18223 }
 0x257   : > { %17421 = vmatpush1.msra.mxu1 %v17420_v20  ;;  %17652 = vmatpush1.msra.mxu0 %v17418_v18  ;;  %v10279_v51 = vpop.f32.mrf.mxu1  ;;  %v26563_v12 = vpop.f32.mrf.mxu0  ;;  %v29174_v9 = vand.u32 4294901760, %v18235_v32  ;;  %v18226_v56 = vsel %vm450_vm1, %v29142_v60, %v18224_v40 }
 0x258   : > { %17570 = vmatprep.subr.mxu1 %v29053_v54  ;;  %17454 = vmatprep.mubr.f32.mxu1 %v27181_v0  ;;  %v29164_v52 = vadd.f32 %v10278_v46, %v29044_v24  ;;  %v10280_v3 = vadd.f32 %v10279_v51, %v10206_v35  ;;  %v18233_v24 = vsel %vm459_vm2, %v18228_v14, 0  ;;  %v18237_v15 = vsel %vm459_vm2, %v18226_v56, 0 }
 0x259   : > { %17685 = vmatprep.mubr.f32.mxu0 %v27181_v0  ;;  %26799 = vmatprep.subr.mxu0 %v27181_v0  ;;  %v10504_v55 = vpop.f32.mrf.mxu0  ;;  %v29188_v47 = vand.u32 4294901760, %v18233_v24  ;;  %v29194_v37 = vsub.f32 %v18235_v32, %v29174_v9  ;;  %v411_v32 = vld [vmem:[%s30126_s3 + $0xa0] sm:$0xff]  ;;  %v29250_v14 = vand.u32 4294901760, %v18237_v15 }
 0x25a   : > { %17456 = vmatmul.mubr.f32.vlgmr.msra.gmra.mxu1 %v29046_v25  ;;  %v10430_v62 = vpop.f32.mrf.mxu1  ;;  %17687 = vmatmul.mubr.f32.vlgmr.msra.gmra.mxu0 %v29046_v25  ;;  %v29172_v48 = vadd.f32 %v10280_v3, %v29059_v36  ;;  %v29183_v36 = vsub.f32 %v18230_v33, %v29157_v31 }
 0x25b   : > { %17572 = vmatpush1.msra.mxu1 %v29070_v6  ;;  %v10431_v43 = vadd.f32 %v10430_v62, %v10354_v50  ;;  %26800 = vmatpush3.msra.mxu0 %v29138_v27  ;;  %v26573_v28 = vpop.f32.mrf.mxu0  ;;  %v29208_v30 = vsub.f32 %v18233_v24, %v29188_v47  ;;  %v18349_v44 = vand.u32 4294901760, %v29194_v37 }
 0x25c   : > { %17724 = vmatprep.subr.mxu1 %v29053_v54  ;;  %v26568_v34 = vpop.f32.mrf.mxu1  ;;  %22889 = vrot.lane.b32.xlu0 %v28505_v59, %s30153_s28  ;;  %v17877_v54 = vsub.f32 %v29153_v13, %v17876_v21 }
 0x25d   : > { %17605 = vmatprep.mubr.f32.mxu1 %v27181_v0  ;;  %v10505_v26 = vadd.f32 %v10504_v55, %v10431_v43  ;;  %26801 = vmatprep.mubr.msk.f32.mxu0 %vm27198_vm4, %v27181_v0  ;;  %v10652_v18 = vpop.f32.mrf.mxu0  ;;  %v19167_v34 = vsel %vm455_vm0, %v411_v32, 0 }
 0x25e   : > { %26809 = vmatprep.subr.mxu0 %v27181_v0  ;;  %v10578_v42 = vpop.f32.mrf.mxu1  ;;  %17609 = vmatmul.mubr.f32.vlgmr.msra.gmra.mxu1 %v29091_v11  ;;  %v17878_v7 = vand.u32 4294901760, %v17877_v54 }
 0x25f   : > { %26802 = vmatmul.mubr.f32.vlgmr.msra.gmra.mxu0 %v29124_v58  ;;  %v10579_v1 = vadd.f32 %v10578_v42, %v10505_v26  ;;  %17726 = vmatpush1.msra.mxu1 %v29070_v6  ;;  %v26583_v39 = vpop.f32.mrf.mxu0  ;;  %v29203_v58 = vand.u32 4294901760, %v29183_v36  ;;  %v29265_v42 = vsub.f32 %v18237_v15, %v29250_v14 }
 0x260   : > { %26810 = vmatpush3.msra.mxu0 %v29153_v13  ;;  %v26578_v17 = vpop.f32.mrf.mxu1  ;;  %22891 = vrot.lane.b32.xlu1 %v29081_v4, %s30153_s28 }
 0x261   : > { %22887 = vrot.lane.b32.xlu0 %v29086_v45, %s30153_s28  ;;  %v10653_v63 = vadd.f32 %v10652_v18, %v10579_v1  ;;  %17759 = vmatprep.mubr.f32.mxu1 %v27181_v0  ;;  %v10827_v6 = vpop.f32.mrf.mxu0  ;;  %v18309_v8 = vsub.f32 %v29183_v36, %v29203_v58  ;;  %s27073_s28 = smul.u32 3, %s30179_s21 }
 0x262   : > { %26804 = vmatprep.subr.mxu1 %v27181_v0  ;;  %v10724_v2 = vpop.f32.mrf.mxu1  ;;  %26811 = vmatprep.mubr.msk.f32.mxu0 %vm27198_vm4, %v27181_v0 }
 0x263   : > { %26819 = vmatprep.subr.mxu0 %v27181_v0  ;;  %v10725_v41 = vadd.f32 %v10724_v2, %v10653_v63  ;;  %17761 = vmatmul.mubr.f32.vlgmr.msra.gmra.mxu1 %v29046_v25  ;;  %v10829_v22 = vpop.f32.mrf.mxu0  ;;  %v29236_v60 = vand.u32 4294901760, %v18309_v8 }
 0x264   : > { %26812 = vmatmul.mubr.f32.vlgmr.msra.gmra.mxu0 %v29065_v29  ;;  %v26588_v57 = vpop.f32.mrf.mxu1  ;;  %26805 = vmatpush3.msra.mxu1 %v17878_v7  ;;  %v18355_v29 = vand.u32 4294901760, %v29208_v30 }
 0x265   : > { %26820 = vmatpush3.msra.mxu0 %v17876_v21  ;;  %v29219_v53 = vadd.f32 %v10725_v41, %v29110_v10  ;;  %22896 = vrot.lane.b32.xlu1 %v29086_v45, %s30154_s9  ;;  %v10986_v23 = vpop.f32.mrf.mxu0  ;;  %v18350_v10 = vsub.f32 %v29194_v37, %v18349_v44  ;;  %s380_s9 = sadd.s32 %s27074_s8, %s27073_s28 }
 0x266   : > { %18270 = vmatprep.subr.mxu0 %v29174_v9  ;;  %v10909_v49 = vpop.f32.mrf.mxu1  ;;  %26806 = vmatprep.mubr.msk.f32.mxu1 %vm27198_vm4, %v27181_v0  ;;  %v18356_v16 = vsub.f32 %v29208_v30, %v18355_v29 }
 0x267   : > { %26814 = vmatprep.subr.mxu1 %v27181_v0  ;;  %v10910_v5 = vadd.f32 %v10909_v49, %v10827_v6  ;;  %26821 = vmatprep.mubr.msk.f32.mxu0 %vm27198_vm4, %v27181_v0  ;;  %v10988_v61 = vpop.f32.mrf.mxu0  ;;  %v18351_v46 = vand.u32 4294901760, %v18350_v10 }
 0x268   : > { %26807 = vmatmul.mubr.f32.vlgmr.msra.gmra.mxu1 %v29046_v25  ;;  %v10911_v19 = vpop.f32.mrf.mxu1  ;;  %26822 = vmatmul.mubr.f32.vlgmr.msra.gmra.mxu0 %v29046_v25  ;;  %v19157_v20 = vpop.permute.xlu0 %19156  ;;  %v18357_v21 = vand.u32 4294901760, %v18356_v16 }
 0x269   : > { %26815 = vmatpush3.msra.mxu1 %v29138_v27  ;;  %v10987_v38 = vadd.f32 %v10986_v23, %v10910_v5  ;;  %v10912_v33 = vadd.f32 %v10911_v19, %v10829_v22  ;;  %18272 = vmatpush1.msra.mxu0 %v29188_v47  ;;  %v11140_v35 = vpop.f32.mrf.mxu0 }
 0x26a   : > { %26816 = vmatprep.mubr.msk.f32.mxu1 %vm27198_vm4, %v27181_v0  ;;  %18431 = vmatprep.subr.mxu0 %v29194_v37  ;;  %v11062_v13 = vpop.f32.mrf.mxu1  ;;  %v29269_v37 = vand.u32 4294901760, %v19167_v34 }
 0x26b   : > { %26824 = vmatprep.subr.mxu1 %v27181_v0  ;;  %v10989_v50 = vadd.f32 %v10988_v61, %v10912_v33  ;;  %18305 = vmatprep.mubr.f32.mxu0 %v27181_v0  ;;  %v11063_v51 = vadd.f32 %v11062_v13, %v10987_v38  ;;  %v11142_v12 = vpop.f32.mrf.mxu0 }
 0x26c   : > { %26817 = vmatmul.mubr.f32.vlgmr.msra.gmra.mxu1 %v29091_v11  ;;  %18311 = vmatmul.mubr.f32.vlgmr.msra.gmra.mxu0 %v29236_v60  ;;  %v29254_v3 = vpop.permute.xlu1 %19158  ;;  %v11064_v11 = vpop.f32.mrf.mxu1 }
 0x26d   : > { %26825 = vmatpush3.msra.mxu1 %v29138_v27  ;;  %18434 = vmatpush1.msra.mxu0 %v29208_v30  ;;  %v11141_v62 = vadd.f32 %v11140_v35, %v11063_v51  ;;  %v11291_v55 = vpop.f32.mrf.mxu0  ;;  %v19154_v43 = vpop.permute.xlu0 %19153  ;;  %v11065_v24 = vadd.f32 %v11064_v11, %v10989_v50  ;;  %v19162_v27 = vsel %vm2308_vm5, %v19157_v20, %v29254_v3  ;;  %v18813_v30 = vand.u32 4294901760, %v29265_v42 }
 0x26e   : > { %18352 = vmatprep.subr.mxu1 %v18351_v46  ;;  %18585 = vmatprep.subr.mxu0 %v18349_v44  ;;  %v19165_v17 = vsel %vm2308_vm5, %v19154_v43, %v19157_v20 }
 0x26f   : > { %26826 = vmatprep.mubr.msk.f32.mxu1 %vm27198_vm4, %v27181_v0  ;;  %18467 = vmatprep.mubr.f32.mxu0 %v27181_v0  ;;  %v11214_v28 = vpop.f32.mrf.mxu1  ;;  %v26593_v26 = vpop.f32.mrf.mxu0  ;;  %v11143_v18 = vadd.f32 %v11142_v12, %v11065_v24  ;;  %v19170_v44 = vsel %vm459_vm2, %v19165_v17, 0 }
 0x270   : > { %26827 = vmatmul.mubr.f32.vlgmr.msra.gmra.mxu1 %v29046_v25  ;;  %18470 = vmatmul.mubr.f32.vlgmr.msra.gmra.mxu0 %v29183_v36  ;;  %v11215_v54 = vadd.f32 %v11214_v28, %v11141_v62  ;;  %v19172_v25 = vsel %vm459_vm2, %v19162_v27, 0  ;;  %v29300_v23 = vand.u32 4294901760, %v19170_v44 }
 0x271   : > { %18358 = vmatpush1.msra.mxu1 %v18357_v21  ;;  %18589 = vmatpush1.msra.mxu0 %v18355_v29  ;;  %v11216_v1 = vpop.f32.mrf.mxu1  ;;  %v11441_v2 = vpop.f32.mrf.mxu0 }
 0x272   : > { %18507 = vmatprep.subr.mxu1 %v29174_v9  ;;  %18391 = vmatprep.mubr.f32.mxu1 %v27181_v0  ;;  %v29276_v39 = vadd.f32 %v11215_v54, %v29164_v52  ;;  %v11217_v63 = vadd.f32 %v11216_v1, %v11143_v18  ;;  %v29286_v52 = vand.u32 4294901760, %v19172_v25  ;;  %v19161_v35 = vpop.permute.xlu1 %19160 }
 0x273   : > { %18622 = vmatprep.mubr.f32.mxu0 %v27181_v0  ;;  %26829 = vmatprep.subr.mxu0 %v27181_v0  ;;  %v26603_v41 = vpop.f32.mrf.mxu0  ;;  %v19163_v32 = vsel %vm2308_vm5, %v29254_v3, %v19161_v35 }
 0x274   : > { %18393 = vmatmul.mubr.f32.vlgmr.msra.gmra.mxu1 %v29157_v31  ;;  %v11367_v6 = vpop.f32.mrf.mxu1  ;;  %18624 = vmatmul.mubr.f32.vlgmr.msra.gmra.mxu0 %v29157_v31  ;;  %v29284_v40 = vadd.f32 %v11217_v63, %v29172_v48  ;;  %v29295_v48 = vsub.f32 %v19167_v34, %v29269_v37  ;;  %v29306_v5 = vsub.f32 %v19172_v25, %v29286_v52  ;;  %v19174_v27 = vsel %vm459_vm2, %v19163_v32, 0  ;;  %v412_v25 = vld [vmem:[%s30126_s3 + $0xa8] sm:$0xff] }
 0x275   : > { %18509 = vmatpush1.msra.mxu1 %v29188_v47  ;;  %v11368_v7 = vadd.f32 %v11367_v6, %v11291_v55  ;;  %26830 = vmatpush3.msra.mxu0 %v29250_v14  ;;  %v11589_v8 = vpop.f32.mrf.mxu0  ;;  %v29362_v17 = vand.u32 4294901760, %v19174_v27 }
 0x276   : > { %18661 = vmatprep.subr.mxu1 %v29174_v9  ;;  %v26598_v57 = vpop.f32.mrf.mxu1  ;;  %23826 = vrot.lane.b32.xlu0 %v28505_v59, %s30155_s18  ;;  %v18814_v9 = vsub.f32 %v29265_v42, %v18813_v30  ;;  %v29315_v19 = vand.u32 4294901760, %v29295_v48  ;;  %v19286_v16 = vand.u32 4294901760, %v29306_v5 }
 0x277   : > { %18542 = vmatprep.mubr.f32.mxu1 %v27181_v0  ;;  %v11442_v22 = vadd.f32 %v11441_v2, %v11368_v7  ;;  %26831 = vmatprep.mubr.msk.f32.mxu0 %vm27198_vm4, %v27181_v0  ;;  %v26613_v56 = vpop.f32.mrf.mxu0 }
 0x278   : > { %26839 = vmatprep.subr.mxu0 %v27181_v0  ;;  %v11515_v49 = vpop.f32.mrf.mxu1  ;;  %18546 = vmatmul.mubr.f32.vlgmr.msra.gmra.mxu1 %v29203_v58  ;;  %v18815_v38 = vand.u32 4294901760, %v18814_v9  ;;  %v19246_v13 = vsub.f32 %v29295_v48, %v29315_v19  ;;  %v19287_v11 = vsub.f32 %v29306_v5, %v19286_v16 }
 0x279   : > { %26832 = vmatmul.mubr.f32.vlgmr.msra.gmra.mxu0 %v29236_v60  ;;  %v11516_v29 = vadd.f32 %v11515_v49, %v11442_v22  ;;  %18663 = vmatpush1.msra.mxu1 %v29188_v47  ;;  %v11764_v60 = vpop.f32.mrf.mxu0  ;;  %v29320_v47 = vsub.f32 %v19170_v44, %v29300_v23  ;;  %v20104_v44 = vsel %vm455_vm0, %v412_v25, 0 }
 0x27a   : > { %26840 = vmatpush3.msra.mxu0 %v29265_v42  ;;  %v26608_v10 = vpop.f32.mrf.mxu1  ;;  %23828 = vrot.lane.b32.xlu1 %v29081_v4, %s30155_s18  ;;  %v29348_v3 = vand.u32 4294901760, %v19246_v13  ;;  %v19288_v54 = vand.u32 4294901760, %v19287_v11  ;;  %v29381_v56 = vand.u32 4294901760, %v20104_v44 }
 0x27b   : > { %23824 = vrot.lane.b32.xlu0 %v29086_v45, %s30155_s18  ;;  %v11590_v61 = vadd.f32 %v11589_v8, %v11516_v29  ;;  %18696 = vmatprep.mubr.f32.mxu1 %v27181_v0  ;;  %v11766_v15 = vpop.f32.mrf.mxu0  ;;  %v29377_v8 = vsub.f32 %v19174_v27, %v29362_v17 }
 0x27c   : > { %26834 = vmatprep.subr.mxu1 %v27181_v0  ;;  %v11661_v20 = vpop.f32.mrf.mxu1  ;;  %26841 = vmatprep.mubr.msk.f32.mxu0 %vm27198_vm4, %v27181_v0 }
 0x27d   : > { %26849 = vmatprep.subr.mxu0 %v27181_v0  ;;  %v11662_v33 = vadd.f32 %v11661_v20, %v11590_v61  ;;  %18698 = vmatmul.mubr.f32.vlgmr.msra.gmra.mxu1 %v29157_v31  ;;  %v11923_v51 = vpop.f32.mrf.mxu0 }
 0x27e   : > { %26842 = vmatmul.mubr.f32.vlgmr.msra.gmra.mxu0 %v29183_v36  ;;  %v26618_v50 = vpop.f32.mrf.mxu1  ;;  %26835 = vmatpush3.msra.mxu1 %v18815_v38  ;;  %v19292_v36 = vand.u32 4294901760, %v29320_v47 }
 0x27f   : > { %26850 = vmatpush3.msra.mxu0 %v18813_v30  ;;  %v29331_v46 = vadd.f32 %v11662_v33, %v29219_v53  ;;  %23833 = vrot.lane.b32.xlu1 %v29086_v45, %s30156_s19  ;;  %v11925_v53 = vpop.f32.mrf.mxu0 }
 0x280   : > { %19207 = vmatprep.subr.mxu0 %v29286_v52  ;;  %v11846_v12 = vpop.f32.mrf.mxu1  ;;  %26836 = vmatprep.mubr.msk.f32.mxu1 %vm27198_vm4, %v27181_v0  ;;  %v19293_v28 = vsub.f32 %v29320_v47, %v19292_v36 }
 0x281   : > { %26844 = vmatprep.subr.mxu1 %v27181_v0  ;;  %v11847_v62 = vadd.f32 %v11846_v12, %v11764_v60  ;;  %26851 = vmatprep.mubr.msk.f32.mxu0 %vm27198_vm4, %v27181_v0  ;;  %v12077_v34 = vpop.f32.mrf.mxu0 }
 0x282   : > { %26837 = vmatmul.mubr.f32.vlgmr.msra.gmra.mxu1 %v29157_v31  ;;  %v11848_v55 = vpop.f32.mrf.mxu1  ;;  %26852 = vmatmul.mubr.f32.vlgmr.msra.gmra.mxu0 %v29157_v31  ;;  %v20094_v21 = vpop.permute.xlu0 %20093  ;;  %v19294_v30 = vand.u32 4294901760, %v19293_v28 }
 0x283   : > { %26845 = vmatpush3.msra.mxu1 %v29250_v14  ;;  %v11924_v43 = vadd.f32 %v11923_v51, %v11847_v62  ;;  %v11849_v24 = vadd.f32 %v11848_v55, %v11766_v15  ;;  %19209 = vmatpush1.msra.mxu0 %v29300_v23  ;;  %v12079_v18 = vpop.f32.mrf.mxu0 }
 0x284   : > { %26846 = vmatprep.mubr.msk.f32.mxu1 %vm27198_vm4, %v27181_v0  ;;  %19368 = vmatprep.subr.mxu0 %v29306_v5  ;;  %v11999_v42 = vpop.f32.mrf.mxu1 }
 0x285   : > { %26854 = vmatprep.subr.mxu1 %v27181_v0  ;;  %v11926_v26 = vadd.f32 %v11925_v53, %v11849_v24  ;;  %19242 = vmatprep.mubr.f32.mxu0 %v27181_v0  ;;  %v12000_v1 = vadd.f32 %v11999_v42, %v11924_v43 }
 0x286   : > { %26847 = vmatmul.mubr.f32.vlgmr.msra.gmra.mxu1 %v29203_v58  ;;  %19248 = vmatmul.mubr.f32.vlgmr.msra.gmra.mxu0 %v29348_v3  ;;  %v29366_v63 = vpop.permute.xlu1 %20095  ;;  %v12001_v6 = vpop.f32.mrf.mxu1 }
 0x287   : > { %26855 = vmatpush3.msra.mxu1 %v29250_v14  ;;  %19371 = vmatpush1.msra.mxu0 %v29320_v47  ;;  %v12078_v2 = vadd.f32 %v12077_v34, %v12000_v1  ;;  %v12228_v58 = vpop.f32.mrf.mxu0  ;;  %v20091_v7 = vpop.permute.xlu0 %20090  ;;  %v12002_v41 = vadd.f32 %v12001_v6, %v11926_v26  ;;  %v20099_v14 = vsel %vm3246_vm6, %v20094_v21, %v29366_v63  ;;  %v19750_v47 = vand.u32 4294901760, %v29377_v8 }
 0x288   : > { %19289 = vmatprep.subr.mxu1 %v19288_v54  ;;  %19522 = vmatprep.subr.mxu0 %v19286_v16  ;;  %v20102_v5 = vsel %vm3246_vm6, %v20091_v7, %v20094_v21 }
 0x289   : > { %26856 = vmatprep.mubr.msk.f32.mxu1 %vm27198_vm4, %v27181_v0  ;;  %19404 = vmatprep.mubr.f32.mxu0 %v27181_v0  ;;  %v12151_v57 = vpop.f32.mrf.mxu1  ;;  %v26623_v22 = vpop.f32.mrf.mxu0  ;;  %v12080_v49 = vadd.f32 %v12079_v18, %v12002_v41  ;;  %v20107_v35 = vsel %vm459_vm2, %v20102_v5, 0 }
 0x28a   : > { %26857 = vmatmul.mubr.f32.vlgmr.msra.gmra.mxu1 %v29157_v31  ;;  %19407 = vmatmul.mubr.f32.vlgmr.msra.gmra.mxu0 %v29295_v48  ;;  %v12152_v9 = vadd.f32 %v12151_v57, %v12078_v2  ;;  %v20109_v31 = vsel %vm459_vm2, %v20099_v14, 0  ;;  %v29412_v12 = vand.u32 4294901760, %v20107_v35 }
 0x28b   : > { %19295 = vmatpush1.msra.mxu1 %v19294_v30  ;;  %19526 = vmatpush1.msra.mxu0 %v19292_v36  ;;  %v12153_v29 = vpop.f32.mrf.mxu1  ;;  %v12378_v60 = vpop.f32.mrf.mxu0 }
 0x28c   : > { %19444 = vmatprep.subr.mxu1 %v29286_v52  ;;  %19328 = vmatprep.mubr.f32.mxu1 %v27181_v0  ;;  %v29388_v10 = vadd.f32 %v12152_v9, %v29276_v39  ;;  %v12154_v61 = vadd.f32 %v12153_v29, %v12080_v49  ;;  %v29398_v39 = vand.u32 4294901760, %v20109_v31  ;;  %v20098_v21 = vpop.permute.xlu1 %20097  ;;  %v29432_v43 = vsub.f32 %v20107_v35, %v29412_v12  ;;  %v413_v9 = vld [vmem:[%s30126_s3 + $0xb0] sm:$0xff] }
 0x28d   : > { %19559 = vmatprep.mubr.f32.mxu0 %v27181_v0  ;;  %26859 = vmatprep.subr.mxu0 %v27181_v0  ;;  %v12304_v20 = vpop.f32.mrf.mxu1  ;;  %v26633_v15 = vpop.f32.mrf.mxu0  ;;  %v20100_v26 = vsel %vm3246_vm6, %v29366_v63, %v20098_v21 }
 0x28e   : > { %19330 = vmatmul.mubr.f32.vlgmr.msra.gmra.mxu1 %v29269_v37  ;;  %19561 = vmatmul.mubr.f32.vlgmr.msra.gmra.mxu0 %v29269_v37  ;;  %v29396_v38 = vadd.f32 %v12154_v61, %v29284_v40  ;;  %v12305_v33 = vadd.f32 %v12304_v20, %v12228_v58  ;;  %v29407_v40 = vsub.f32 %v20104_v44, %v29381_v56  ;;  %v20229_v1 = vand.u32 4294901760, %v29432_v43 }
 0x28f   : > { %19446 = vmatpush1.msra.mxu1 %v29300_v23  ;;  %26860 = vmatpush3.msra.mxu0 %v29362_v17  ;;  %v26628_v16 = vpop.f32.mrf.mxu1  ;;  %v12526_v13 = vpop.f32.mrf.mxu0  ;;  %v29418_v62 = vsub.f32 %v20109_v31, %v29398_v39  ;;  %v20111_v2 = vsel %vm459_vm2, %v20100_v26, 0  ;;  %v21028_v20 = vsel %vm455_vm0, %v413_v9, 0 }
 0x290   : > { %19598 = vmatprep.subr.mxu1 %v29286_v52  ;;  %24763 = vrot.lane.b32.xlu0 %v28505_v59, %s30160_s12  ;;  %v12379_v50 = vadd.f32 %v12378_v60, %v12305_v33  ;;  %v19751_v52 = vsub.f32 %v29377_v8, %v19750_v47  ;;  %v29427_v11 = vand.u32 4294901760, %v29407_v40  ;;  %v29466_v14 = vand.u32 4294901760, %v20111_v2 }
 0x291   : > { %19479 = vmatprep.mubr.f32.mxu1 %v27181_v0  ;;  %26861 = vmatprep.mubr.msk.f32.mxu0 %vm27198_vm4, %v27181_v0  ;;  %v12452_v51 = vpop.f32.mrf.mxu1  ;;  %v26643_v32 = vpop.f32.mrf.mxu0  ;;  %v20223_v27 = vand.u32 4294901760, %v29418_v62  ;;  %v20230_v57 = vsub.f32 %v29432_v43, %v20229_v1  ;;  %v21032_v16 = vsel %vm459_vm2, %v28505_v59, 0 }
 0x292   : > { %26869 = vmatprep.subr.mxu0 %v27181_v0  ;;  %19483 = vmatmul.mubr.f32.vlgmr.msra.gmra.mxu1 %v29315_v19  ;;  %v12453_v36 = vadd.f32 %v12452_v51, %v12379_v50  ;;  %v20183_v42 = vsub.f32 %v29407_v40, %v29427_v11  ;;  %v29490_v51 = vand.u32 4294901760, %v21028_v20  ;;  %v29501_v59 = vand.u32 4294901760, %v21032_v16 }
 0x293   : > { %26862 = vmatmul.mubr.f32.vlgmr.msra.gmra.mxu0 %v29348_v3  ;;  %19600 = vmatpush1.msra.mxu1 %v29300_v23  ;;  %v26638_v53 = vpop.f32.mrf.mxu1  ;;  %v12687_v3 = vpop.f32.mrf.mxu0 }
 0x294   : > { %26870 = vmatpush3.msra.mxu0 %v29377_v8  ;;  %24765 = vrot.lane.b32.xlu1 %v29081_v4, %s30160_s12  ;;  %v12527_v55 = vadd.f32 %v12526_v13, %v12453_v36  ;;  %v19752_v4 = vand.u32 4294901760, %v19751_v52  ;;  %v29461_v58 = vand.u32 4294901760, %v20183_v42 }
 0x295   : > { %24761 = vrot.lane.b32.xlu0 %v29086_v45, %s30160_s12  ;;  %19633 = vmatprep.mubr.f32.mxu1 %v27181_v0  ;;  %v12598_v23 = vpop.f32.mrf.mxu1  ;;  %v12689_v34 = vpop.f32.mrf.mxu0  ;;  %s25930_s12 = sshll.u32 %s380_s9, 3 }
 0x296   : > { %26864 = vmatprep.subr.mxu1 %v27181_v0  ;;  %26871 = vmatprep.mubr.msk.f32.mxu0 %vm27198_vm4, %v27181_v0  ;;  %v12599_v24 = vadd.f32 %v12598_v23, %v12527_v55  ;;  %s30091_s16 = scalar_lea.vmem %s30128_s5, %s25930_s12 }
 0x297   : > { %26879 = vmatprep.subr.mxu0 %v27181_v0  ;;  %19635 = vmatmul.mubr.f32.vlgmr.msra.gmra.mxu1 %v29269_v37  ;;  %v26648_v28 = vpop.f32.mrf.mxu1  ;;  %v12846_v54 = vpop.f32.mrf.mxu0 }
 0x298   : > { %26872 = vmatmul.mubr.f32.vlgmr.msra.gmra.mxu0 %v29295_v48  ;;  %26865 = vmatpush3.msra.mxu1 %v19752_v4  ;;  %v29445_v18 = vadd.f32 %v12599_v24, %v29331_v46  ;;  %v20224_v46 = vsub.f32 %v29418_v62, %v20223_v27  ;;  %v29522_v4 = vsub.f32 %v21032_v16, %v29501_v59 }
 0x299   : > { %26880 = vmatpush3.msra.mxu0 %v19750_v47  ;;  %24770 = vrot.lane.b32.xlu1 %v29086_v45, %s30161_s13  ;;  %v12769_v48 = vpop.f32.mrf.mxu1  ;;  %v12848_v63 = vpop.f32.mrf.mxu0  ;;  %v29481_v47 = vsub.f32 %v20111_v2, %v29466_v14 }
 0x29a   : > { %20144 = vmatprep.subr.mxu0 %v29398_v39  ;;  %26866 = vmatprep.mubr.msk.f32.mxu1 %vm27198_vm4, %v27181_v0  ;;  %v12770_v25 = vadd.f32 %v12769_v48, %v12687_v3  ;;  %v20225_v29 = vand.u32 4294901760, %v20224_v46  ;;  %v29513_v3 = vsub.f32 %v21028_v20, %v29490_v51  ;;  %v21146_v48 = vand.u32 4294901760, %v29522_v4 }
 0x29b   : > { %26874 = vmatprep.subr.mxu1 %v27181_v0  ;;  %26881 = vmatprep.mubr.msk.f32.mxu0 %vm27198_vm4, %v27181_v0  ;;  %v12771_v6 = vpop.f32.mrf.mxu1  ;;  %v13000_v41 = vpop.f32.mrf.mxu0  ;;  %v20687_v32 = vand.u32 4294901760, %v29481_v47 }
 0x29c   : > { %26867 = vmatmul.mubr.f32.vlgmr.msra.gmra.mxu1 %v29269_v37  ;;  %26882 = vmatmul.mubr.f32.vlgmr.msra.gmra.mxu0 %v29269_v37  ;;  %v12847_v30 = vadd.f32 %v12846_v54, %v12770_v25  ;;  %v12772_v7 = vadd.f32 %v12771_v6, %v12689_v34 }
 0x29d   : > { %26875 = vmatpush3.msra.mxu1 %v29362_v17  ;;  %20146 = vmatpush1.msra.mxu0 %v29412_v12  ;;  %v12922_v44 = vpop.f32.mrf.mxu1  ;;  %v13002_v49 = vpop.f32.mrf.mxu0 }
 0x29e   : > { %26876 = vmatprep.mubr.msk.f32.mxu1 %vm27198_vm4, %v27181_v0  ;;  %20305 = vmatprep.subr.mxu0 %v29418_v62  ;;  %v12849_v22 = vadd.f32 %v12848_v63, %v12772_v7  ;;  %v12923_v8 = vadd.f32 %v12922_v44, %v12847_v30 }
 0x29f   : > { %26884 = vmatprep.subr.mxu1 %v27181_v0  ;;  %20179 = vmatprep.mubr.f32.mxu0 %v27181_v0  ;;  %v12924_v31 = vpop.f32.mrf.mxu1  ;;  %v13151_v60 = vpop.f32.mrf.mxu0 }
 0x2a0   : > { %26877 = vmatmul.mubr.f32.vlgmr.msra.gmra.mxu1 %v29315_v19  ;;  %20185 = vmatmul.mubr.f32.vlgmr.msra.gmra.mxu0 %v29461_v58  ;;  %v13001_v5 = vadd.f32 %v13000_v41, %v12923_v8  ;;  %v12925_v61 = vadd.f32 %v12924_v31, %v12849_v22  ;;  %v20231_v19 = vand.u32 4294901760, %v20230_v57  ;;  %v21147_v41 = vsub.f32 %v29522_v4, %v21146_v48 }
 0x2a1   : > { %26885 = vmatpush3.msra.mxu1 %v29362_v17  ;;  %20308 = vmatpush1.msra.mxu0 %v29432_v43  ;;  %v26653_v15 = vpop.f32.mrf.mxu0 }
 0x2a2   : > { %20226 = vmatprep.subr.mxu1 %v20225_v29  ;;  %20459 = vmatprep.subr.mxu0 %v20223_v27  ;;  %v13003_v33 = vadd.f32 %v13002_v49, %v12925_v61  ;;  %v29529_v27 = vand.u32 4294901760, %v29513_v3  ;;  %v21148_v61 = vand.u32 4294901760, %v21147_v41 }
 0x2a3   : > { %26886 = vmatprep.mubr.msk.f32.mxu1 %vm27198_vm4, %v27181_v0  ;;  %v13074_v17 = vpop.f32.mrf.mxu1  ;;  %20341 = vmatprep.mubr.f32.mxu0 %v27181_v0 }
 0x2a4   : > { %26887 = vmatmul.mubr.f32.vlgmr.msra.gmra.mxu1 %v29269_v37  ;;  %v13075_v35 = vadd.f32 %v13074_v17, %v13001_v5  ;;  %20344 = vmatmul.mubr.f32.vlgmr.msra.gmra.mxu0 %v29407_v40  ;;  %v13301_v13 = vpop.f32.mrf.mxu0  ;;  %v21030_v37 = vsel %vm459_vm2, %v29086_v45, 0  ;;  %v21106_v63 = vsub.f32 %v29513_v3, %v29529_v27  ;;  %v414_v5 = vld [vmem:[%s30126_s3 + $0xb8] sm:$0xff] }
 0x2a5   : > { %20232 = vmatpush1.msra.mxu1 %v20231_v19  ;;  %v13076_v50 = vpop.f32.mrf.mxu1  ;;  %20463 = vmatpush1.msra.mxu0 %v20229_v1  ;;  %v29510_v55 = vand.u32 4294901760, %v21030_v37  ;;  %v21964_v16 = vsel %vm455_vm0, %v414_v5, 0 }
 0x2a6   : > { %20381 = vmatprep.subr.mxu1 %v29398_v39  ;;  %v29494_v52 = vadd.f32 %v13075_v35, %v29388_v10  ;;  %v13077_v36 = vadd.f32 %v13076_v50, %v13003_v33  ;;  %20265 = vmatprep.mubr.f32.mxu1 %v27181_v0  ;;  %v26663_v62 = vpop.f32.mrf.mxu0  ;;  %v29563_v8 = vand.u32 4294901760, %v21106_v63 }
 0x2a7   : > { %20496 = vmatprep.mubr.f32.mxu0 %v27181_v0  ;;  %26889 = vmatprep.subr.mxu0 %v27181_v0  ;;  %v13227_v53 = vpop.f32.mrf.mxu1  ;;  %v29532_v28 = vsub.f32 %v21030_v37, %v29510_v55  ;;  %v29594_v62 = vand.u32 4294901760, %v21964_v16 }
 0x2a8   : > { %20267 = vmatmul.mubr.f32.vlgmr.msra.gmra.mxu1 %v29381_v56  ;;  %v29506_v10 = vadd.f32 %v13077_v36, %v29396_v38  ;;  %20498 = vmatmul.mubr.f32.vlgmr.msra.gmra.mxu0 %v29381_v56  ;;  %v13228_v45 = vadd.f32 %v13227_v53, %v13151_v60  ;;  %v13449_v21 = vpop.f32.mrf.mxu0  ;;  %v20688_v38 = vsub.f32 %v29481_v47, %v20687_v32 }
 0x2a9   : > { %20383 = vmatpush1.msra.mxu1 %v29412_v12  ;;  %26890 = vmatpush3.msra.mxu0 %v29466_v14  ;;  %v26658_v23 = vpop.f32.mrf.mxu1  ;;  %v21152_v46 = vand.u32 4294901760, %v29532_v28 }
 0x2aa   : > { %20535 = vmatprep.subr.mxu1 %v29398_v39  ;;  %20416 = vmatprep.mubr.f32.mxu1 %v27181_v0  ;;  %v13302_v43 = vadd.f32 %v13301_v13, %v13228_v45  ;;  %v26673_v24 = vpop.f32.mrf.mxu0 }
 0x2ab   : > { %26891 = vmatprep.mubr.msk.f32.mxu0 %vm27198_vm4, %v27181_v0  ;;  %26899 = vmatprep.subr.mxu0 %v27181_v0 }
 0x2ac   : > { %20420 = vmatmul.mubr.f32.vlgmr.msra.gmra.mxu1 %v29427_v11  ;;  %v13375_v34 = vpop.f32.mrf.mxu1  ;;  %26892 = vmatmul.mubr.f32.vlgmr.msra.gmra.mxu0 %v29461_v58  ;;  %v13624_v26 = vpop.f32.mrf.mxu0  ;;  %v27140_v58 = vld [vmem:[%s28474_s20 + $0x8] sm:$0xf]  ;;  %s25931_s20 = sshll.u32 %s30173_s22, 4 }
 0x2ad   : > { %20537 = vmatpush1.msra.mxu1 %v29412_v12  ;;  %v13376_v39 = vadd.f32 %v13375_v34, %v13302_v43  ;;  %26900 = vmatpush3.msra.mxu0 %v29481_v47  ;;  %v20689_v12 = vand.u32 4294901760, %v20688_v38  ;;  %v21034_v30 = vsel %vm459_vm2, %v27140_v58, 0  ;;  %s388_s29 = sadd.s32 %s25931_s20, %s30179_s21 }
 0x2ae   : > { %20570 = vmatprep.mubr.f32.mxu1 %v27181_v0  ;;  %v26668_v42 = vpop.f32.mrf.mxu1  ;;  %26894 = vmatprep.subr.mxu1 %v27181_v0  ;;  %v13626_v1 = vpop.f32.mrf.mxu0  ;;  %v29559_v22 = vand.u32 4294901760, %v21034_v30  ;;  %s25932_s10 = sshll.u32 %s388_s29, 3 }
 0x2af   : > { %26901 = vmatprep.mubr.msk.f32.mxu0 %vm27198_vm4, %v27181_v0  ;;  %v13450_v54 = vadd.f32 %v13449_v21, %v13376_v39  ;;  %26909 = vmatprep.subr.mxu0 %v27181_v0  ;;  %s390_s14 = scalar_lea.vmem %s30129_s6, %s25932_s10 }
 0x2b0   : > { %20572 = vmatmul.mubr.f32.vlgmr.msra.gmra.mxu1 %v29381_v56  ;;  %v13521_v25 = vpop.f32.mrf.mxu1  ;;  %26902 = vmatmul.mubr.f32.vlgmr.msra.gmra.mxu0 %v29407_v40  ;;  %v13783_v6 = vpop.f32.mrf.mxu0  ;;  %v29579_v19 = vsub.f32 %v21034_v30, %v29559_v22 }
 0x2b1   : > { %26895 = vmatpush3.msra.mxu1 %v20689_v12  ;;  %v13522_v2 = vadd.f32 %v13521_v25, %v13450_v54  ;;  %26910 = vmatpush3.msra.mxu0 %v20687_v32  ;;  %v29618_v54 = vsub.f32 %v21964_v16, %v29594_v62 }
 0x2b2   : > { %26896 = vmatprep.mubr.msk.f32.mxu1 %vm27198_vm4, %v27181_v0  ;;  %v26678_v7 = vpop.f32.mrf.mxu1  ;;  %26904 = vmatprep.subr.mxu1 %v27181_v0  ;;  %v13785_v44 = vpop.f32.mrf.mxu0  ;;  %v21610_v37 = vand.u32 4294901760, %v29579_v19 }
 0x2b3   : > { %26911 = vmatprep.mubr.msk.f32.mxu0 %vm27198_vm4, %v27181_v0  ;;  %v29554_v40 = vadd.f32 %v13522_v2, %v29445_v18  ;;  %21067 = vmatprep.subr.mxu0 %v29501_v59  ;;  %v21153_v18 = vsub.f32 %v29532_v28, %v21152_v46 }
 0x2b4   : > { %26897 = vmatmul.mubr.f32.vlgmr.msra.gmra.mxu1 %v29381_v56  ;;  %v13706_v57 = vpop.f32.mrf.mxu1  ;;  %26912 = vmatmul.mubr.f32.vlgmr.msra.gmra.mxu0 %v29381_v56  ;;  %v21953_v49 = vpop.permute.xlu0 %21952  ;;  %v21611_v39 = vsub.f32 %v29579_v19, %v21610_v37 }
 0x2b5   : > { %26905 = vmatpush3.msra.mxu1 %v29466_v14  ;;  %v13707_v9 = vadd.f32 %v13706_v57, %v13624_v26  ;;  %v13937_v29 = vpop.f32.mrf.mxu0  ;;  %26906 = vmatprep.mubr.msk.f32.mxu1 %vm27198_vm4, %v27181_v0  ;;  %v21154_v33 = vand.u32 4294901760, %v21153_v18 }
 0x2b6   : > { %26914 = vmatprep.subr.mxu1 %v27181_v0  ;;  %v13708_v31 = vpop.f32.mrf.mxu1  ;;  %21069 = vmatpush1.msra.mxu0 %v29510_v55 }
 0x2b7   : > { %21102 = vmatprep.mubr.f32.mxu0 %v27181_v0  ;;  %v13784_v60 = vadd.f32 %v13783_v6, %v13707_v9  ;;  %v13709_v20 = vadd.f32 %v13708_v31, %v13626_v1  ;;  %v13939_v47 = vpop.f32.mrf.mxu0  ;;  %21228 = vmatprep.subr.mxu0 %v29522_v4  ;;  %v21612_v6 = vand.u32 4294901760, %v21611_v39 }
 0x2b8   : > { %26907 = vmatmul.mubr.f32.vlgmr.msra.gmra.mxu1 %v29427_v11  ;;  %21108 = vmatmul.mubr.f32.vlgmr.msra.gmra.mxu0 %v29563_v8  ;;  %v29583_v17 = vpop.permute.xlu1 %21954  ;;  %v13859_v50 = vpop.f32.mrf.mxu1 }
 0x2b9   : > { %26915 = vmatpush3.msra.mxu1 %v29466_v14  ;;  %v21951_v15 = vpop.permute.xlu0 %21950  ;;  %v13786_v35 = vadd.f32 %v13785_v44, %v13709_v20  ;;  %26916 = vmatprep.mubr.msk.f32.mxu1 %vm27198_vm4, %v27181_v0  ;;  %v21957_v11 = vsel %vm5104_vm7, %v21953_v49, %v29583_v17  ;;  %v14088_v13 = vpop.f32.mrf.mxu0  ;;  %v13860_v14 = vadd.f32 %v13859_v50, %v13784_v60 }
 0x2ba   : > { %21231 = vmatpush1.msra.mxu0 %v29532_v28  ;;  %21264 = vmatprep.mubr.f32.mxu0 %v27181_v0  ;;  %v13861_v36 = vpop.f32.mrf.mxu1  ;;  %v21968_v53 = vsel %vm459_vm2, %v21957_v11, 0  ;;  %v21956_v45 = vsel %vm5104_vm7, %v21951_v15, %v21953_v49 }
 0x2bb   : > { %21149 = vmatprep.subr.mxu1 %v21148_v61  ;;  %21382 = vmatprep.subr.mxu0 %v21146_v48  ;;  %v26683_v32 = vpop.f32.mrf.mxu0  ;;  %v13938_v21 = vadd.f32 %v13937_v29, %v13860_v14  ;;  %v13862_v23 = vadd.f32 %v13861_v36, %v13786_v35  ;;  %v29604_v24 = vand.u32 4294901760, %v21968_v53  ;;  %v21966_v34 = vsel %vm459_vm2, %v21956_v45, 0 }
 0x2bc   : > { %26917 = vmatmul.mubr.f32.vlgmr.msra.gmra.mxu1 %v29381_v56  ;;  %21267 = vmatmul.mubr.f32.vlgmr.msra.gmra.mxu0 %v29513_v3  ;;  %v29622_v1 = vand.u32 4294901760, %v21966_v34 }
 0x2bd   : > { %21155 = vmatpush1.msra.mxu1 %v21154_v33  ;;  %21188 = vmatprep.mubr.f32.mxu1 %v27181_v0  ;;  %v14011_v56 = vpop.f32.mrf.mxu1  ;;  %v13940_v38 = vadd.f32 %v13939_v47, %v13862_v23  ;;  %v29631_v2 = vsub.f32 %v21968_v53, %v29604_v24  ;;  %v21960_v30 = vpop.permute.xlu1 %21959 }
 0x2be   : > { %21386 = vmatpush1.msra.mxu0 %v21152_v46  ;;  %21419 = vmatprep.mubr.f32.mxu0 %v27181_v0  ;;  %v14012_v43 = vadd.f32 %v14011_v56, %v13938_v21  ;;  %v14238_v4 = vpop.f32.mrf.mxu0  ;;  %v29643_v41 = vsub.f32 %v21966_v34, %v29622_v1  ;;  %v21962_v49 = vsel %vm5111_vm8, %v29583_v17, %v21960_v30 }
 0x2bf   : > { %21304 = vmatprep.subr.mxu1 %v29501_v59  ;;  %26919 = vmatprep.subr.mxu0 %v27181_v0  ;;  %v14013_v28 = vpop.f32.mrf.mxu1  ;;  %v22083_v57 = vand.u32 4294901760, %v29631_v2  ;;  %v21971_v60 = vsel %vm459_vm2, %v21962_v49, 0 }
 0x2c0   : > { %21190 = vmatmul.mubr.f32.vlgmr.msra.gmra.mxu1 %v29490_v51  ;;  %21421 = vmatmul.mubr.f32.vlgmr.msra.gmra.mxu0 %v29490_v51  ;;  %v29615_v26 = vadd.f32 %v14012_v43, %v29494_v52  ;;  %v14014_v42 = vadd.f32 %v14013_v28, %v13940_v38  ;;  %v26693_v12 = vpop.f32.mrf.mxu0  ;;  %v22089_v5 = vand.u32 4294901760, %v29643_v41  ;;  %v29678_v35 = vand.u32 4294901760, %v21971_v60 }
 0x2c1   : > { %21306 = vmatpush1.msra.mxu1 %v29510_v55  ;;  %21339 = vmatprep.mubr.f32.mxu1 %v27181_v0  ;;  %v22084_v20 = vsub.f32 %v29631_v2, %v22083_v57 }
 0x2c2   : > { %26920 = vmatpush3.msra.mxu0 %v29559_v22  ;;  %v14164_v48 = vpop.f32.mrf.mxu1  ;;  %26921 = vmatprep.mubr.msk.f32.mxu0 %vm27198_vm4, %v27181_v0  ;;  %v29628_v52 = vadd.f32 %v14014_v42, %v29506_v10  ;;  %v14386_v63 = vpop.f32.mrf.mxu0  ;;  %v22090_v11 = vsub.f32 %v29643_v41, %v22089_v5  ;;  %v29693_v21 = vsub.f32 %v21971_v60, %v29678_v35 }
 0x2c3   : > { %21458 = vmatprep.subr.mxu1 %v29501_v59  ;;  %v14165_v25 = vadd.f32 %v14164_v48, %v14088_v13  ;;  %26929 = vmatprep.subr.mxu0 %v27181_v0  ;;  %v29638_v59 = vand.u32 4294901760, %v29618_v54  ;;  %v22085_v14 = vand.u32 4294901760, %v22084_v20 }
 0x2c4   : > { %21343 = vmatmul.mubr.f32.vlgmr.msra.gmra.mxu1 %v29529_v27  ;;  %v26688_v46 = vpop.f32.mrf.mxu1  ;;  %26922 = vmatmul.mubr.f32.vlgmr.msra.gmra.mxu0 %v29563_v8  ;;  %v26703_v10 = vpop.f32.mrf.mxu0  ;;  %v22547_v48 = vand.u32 4294901760, %v29693_v21 }
 0x2c5   : > { %21460 = vmatpush1.msra.mxu1 %v29510_v55  ;;  %v14239_v58 = vadd.f32 %v14238_v4, %v14165_v25  ;;  %26930 = vmatpush3.msra.mxu0 %v29579_v19  ;;  %v22043_v18 = vsub.f32 %v29618_v54, %v29638_v59 }
 0x2c6   : > { %21493 = vmatprep.mubr.f32.mxu1 %v27181_v0  ;;  %v14312_v7 = vpop.f32.mrf.mxu1  ;;  %26931 = vmatprep.mubr.msk.f32.mxu0 %vm27198_vm4, %v27181_v0  ;;  %v14561_v44 = vpop.f32.mrf.mxu0 }
 0x2c7   : > { %26939 = vmatprep.subr.mxu0 %v27181_v0  ;;  %v14313_v55 = vadd.f32 %v14312_v7, %v14239_v58  ;;  %26924 = vmatprep.subr.mxu1 %v27181_v0  ;;  %v29670_v19 = vand.u32 4294901760, %v22043_v18 }
 0x2c8   : > { %21495 = vmatmul.mubr.f32.vlgmr.msra.gmra.mxu1 %v29490_v51  ;;  %v26698_v8 = vpop.f32.mrf.mxu1  ;;  %26932 = vmatmul.mubr.f32.vlgmr.msra.gmra.mxu0 %v29513_v3  ;;  %v14563_v29 = vpop.f32.mrf.mxu0 }
 0x2c9   : > { %26925 = vmatpush3.msra.mxu1 %v21612_v6  ;;  %v14387_v9 = vadd.f32 %v14386_v63, %v14313_v55  ;;  %26940 = vmatpush3.msra.mxu0 %v21610_v37 }
 0x2ca   : > { %26926 = vmatprep.mubr.msk.f32.mxu1 %vm27198_vm4, %v27181_v0  ;;  %v14458_v31 = vpop.f32.mrf.mxu1  ;;  %22004 = vmatprep.subr.mxu0 %v29604_v24  ;;  %v14720_v61 = vpop.f32.mrf.mxu0 }
 0x2cb   : > { %26941 = vmatprep.mubr.msk.f32.mxu0 %vm27198_vm4, %v27181_v0  ;;  %v14459_v3 = vadd.f32 %v14458_v31, %v14387_v9  ;;  %26934 = vmatprep.subr.mxu1 %v27181_v0 }
 0x2cc   : > { %26927 = vmatmul.mubr.f32.vlgmr.msra.gmra.mxu1 %v29490_v51  ;;  %v26708_v47 = vpop.f32.mrf.mxu1  ;;  %26942 = vmatmul.mubr.f32.vlgmr.msra.gmra.mxu0 %v29490_v51  ;;  %v14722_v17 = vpop.f32.mrf.mxu0 }
 0x2cd   : > { %26935 = vmatpush3.msra.mxu1 %v29559_v22  ;;  %v29673_v33 = vadd.f32 %v14459_v3, %v29554_v40  ;;  %22006 = vmatpush1.msra.mxu0 %v29622_v1  ;;  %v415_v40 = vld [vmem:[%s30126_s3 + $0xc0] sm:$0xff] }
 0x2ce   : > { %26936 = vmatprep.mubr.msk.f32.mxu1 %vm27198_vm4, %v27181_v0  ;;  %v14643_v15 = vpop.f32.mrf.mxu1  ;;  %22165 = vmatprep.subr.mxu0 %v29631_v2  ;;  %v22890_v16 = vpop.permute.xlu0 %22889  ;;  %v22901_v45 = vsel %vm455_vm0, %v415_v40, 0 }
 0x2cf   : > { %26944 = vmatprep.subr.mxu1 %v27181_v0  ;;  %v14644_v50 = vadd.f32 %v14643_v15, %v14561_v44  ;;  %v14874_v13 = vpop.f32.mrf.mxu0  ;;  %22039 = vmatprep.mubr.f32.mxu0 %v27181_v0  ;;  %v29706_v42 = vand.u32 4294901760, %v22901_v45 }
 0x2d0   : > { %26937 = vmatmul.mubr.f32.vlgmr.msra.gmra.mxu1 %v29529_v27  ;;  %v14645_v36 = vpop.f32.mrf.mxu1  ;;  %22045 = vmatmul.mubr.f32.vlgmr.msra.gmra.mxu0 %v29670_v19  ;;  %v22091_v27 = vand.u32 4294901760, %v22090_v11 }
 0x2d1   : > { %26945 = vmatpush3.msra.mxu1 %v29559_v22  ;;  %v14721_v37 = vadd.f32 %v14720_v61, %v14644_v50  ;;  %v14646_v32 = vadd.f32 %v14645_v36, %v14563_v29  ;;  %v14876_v53 = vpop.f32.mrf.mxu0  ;;  %22168 = vmatpush1.msra.mxu0 %v29643_v41  ;;  %v29720_v7 = vsub.f32 %v22901_v45, %v29706_v42 }
 0x2d2   : > { %22086 = vmatprep.subr.mxu1 %v22085_v14  ;;  %22319 = vmatprep.subr.mxu0 %v22083_v57  ;;  %v29697_v23 = vpop.permute.xlu1 %22891  ;;  %v14796_v43 = vpop.f32.mrf.mxu1  ;;  %v22548_v57 = vsub.f32 %v29693_v21, %v22547_v48 }
 0x2d3   : > { %26946 = vmatprep.mubr.msk.f32.mxu1 %vm27198_vm4, %v27181_v0  ;;  %v22888_v22 = vpop.permute.xlu0 %22887  ;;  %v14723_v56 = vadd.f32 %v14722_v17, %v14646_v32  ;;  %22201 = vmatprep.mubr.f32.mxu0 %v27181_v0  ;;  %v22894_v38 = vsel %vm6043_vm9, %v22890_v16, %v29697_v23  ;;  %v15025_v4 = vpop.f32.mrf.mxu0  ;;  %v14797_v28 = vadd.f32 %v14796_v43, %v14721_v37  ;;  %v29744_v29 = vand.u32 4294901760, %v29720_v7 }
 0x2d4   : > { %26947 = vmatmul.mubr.f32.vlgmr.msra.gmra.mxu1 %v29490_v51  ;;  %22204 = vmatmul.mubr.f32.vlgmr.msra.gmra.mxu0 %v29618_v54  ;;  %v22905_v34 = vsel %vm459_vm2, %v22894_v38, 0  ;;  %v22893_v39 = vsel %vm6043_vm9, %v22888_v22, %v22890_v16  ;;  %v14798_v12 = vpop.f32.mrf.mxu1 }
 0x2d5   : > { %22092 = vmatpush1.msra.mxu1 %v22091_v27  ;;  %22323 = vmatpush1.msra.mxu0 %v22089_v5  ;;  %v26713_v51 = vpop.f32.mrf.mxu0  ;;  %v14875_v25 = vadd.f32 %v14874_v13, %v14797_v28  ;;  %v14799_v63 = vadd.f32 %v14798_v12, %v14723_v56  ;;  %v29712_v2 = vand.u32 4294901760, %v22905_v34  ;;  %v22903_v46 = vsel %vm459_vm2, %v22893_v39, 0  ;;  %v416_v56 = vld [vmem:[%s30126_s3 + $0xc8] sm:$0xff] }
 0x2d6   : > { %22241 = vmatprep.subr.mxu1 %v29604_v24  ;;  %22125 = vmatprep.mubr.f32.mxu1 %v27181_v0  ;;  %v29724_v55 = vand.u32 4294901760, %v22903_v46  ;;  %v22980_v15 = vsub.f32 %v29720_v7, %v29744_v29  ;;  %v23838_v28 = vsel %vm455_vm0, %v416_v56, 0 }
 0x2d7   : > { %22356 = vmatprep.mubr.f32.mxu0 %v27181_v0  ;;  %26949 = vmatprep.subr.mxu0 %v27181_v0  ;;  %v14948_v6 = vpop.f32.mrf.mxu1  ;;  %v14877_v58 = vadd.f32 %v14876_v53, %v14799_v63  ;;  %v29734_v18 = vsub.f32 %v22905_v34, %v29712_v2  ;;  %v22897_v5 = vpop.permute.xlu1 %22896 }
 0x2d8   : > { %22127 = vmatmul.mubr.f32.vlgmr.msra.gmra.mxu1 %v29594_v62  ;;  %22358 = vmatmul.mubr.f32.vlgmr.msra.gmra.mxu0 %v29594_v62  ;;  %v14949_v10 = vadd.f32 %v14948_v6, %v14875_v25  ;;  %v15175_v30 = vpop.f32.mrf.mxu0  ;;  %v29749_v61 = vsub.f32 %v22903_v46, %v29724_v55  ;;  %v29774_v37 = vand.u32 4294901760, %v22980_v15 }
 0x2d9   : > { %22243 = vmatpush1.msra.mxu1 %v29622_v1  ;;  %26950 = vmatpush3.msra.mxu0 %v29678_v35  ;;  %v14950_v41 = vpop.f32.mrf.mxu1  ;;  %v23020_v47 = vand.u32 4294901760, %v29734_v18 }
 0x2da   : > { %22395 = vmatprep.subr.mxu1 %v29604_v24  ;;  %22276 = vmatprep.mubr.f32.mxu1 %v27181_v0  ;;  %v29730_v44 = vadd.f32 %v14949_v10, %v29615_v26  ;;  %v14951_v8 = vadd.f32 %v14950_v41, %v14877_v58  ;;  %v26723_v49 = vpop.f32.mrf.mxu0  ;;  %v23026_v50 = vand.u32 4294901760, %v29749_v61  ;;  %v29806_v10 = vand.u32 4294901760, %v23838_v28 }
 0x2db   : > { %26951 = vmatprep.mubr.msk.f32.mxu0 %vm27198_vm4, %v27181_v0  ;;  %26959 = vmatprep.subr.mxu0 %v27181_v0  ;;  %v23021_v14 = vsub.f32 %v29734_v18, %v23020_v47 }
 0x2dc   : > { %22280 = vmatmul.mubr.f32.vlgmr.msra.gmra.mxu1 %v29638_v59  ;;  %v15101_v24 = vpop.f32.mrf.mxu1  ;;  %26952 = vmatmul.mubr.f32.vlgmr.msra.gmra.mxu0 %v29670_v19  ;;  %v29741_v9 = vadd.f32 %v14951_v8, %v29628_v52  ;;  %v15323_v31 = vpop.f32.mrf.mxu0  ;;  %v22899_v19 = vsel %vm6050_vm10, %v29697_v23, %v22897_v5  ;;  %v23027_v23 = vsub.f32 %v29749_v61, %v23026_v50 }
 0x2dd   : > { %22397 = vmatpush1.msra.mxu1 %v29622_v1  ;;  %v15102_v26 = vadd.f32 %v15101_v24, %v15025_v4  ;;  %26960 = vmatpush3.msra.mxu0 %v29693_v21  ;;  %v22549_v1 = vand.u32 4294901760, %v22548_v57  ;;  %v23022_v38 = vand.u32 4294901760, %v23021_v14 }
 0x2de   : > { %22430 = vmatprep.mubr.f32.mxu1 %v27181_v0  ;;  %v26718_v3 = vpop.f32.mrf.mxu1  ;;  %26954 = vmatprep.subr.mxu1 %v27181_v0  ;;  %v26733_v60 = vpop.f32.mrf.mxu0 }
 0x2df   : > { %26961 = vmatprep.mubr.msk.f32.mxu0 %vm27198_vm4, %v27181_v0  ;;  %v15176_v52 = vadd.f32 %v15175_v30, %v15102_v26  ;;  %26969 = vmatprep.subr.mxu0 %v27181_v0 }
 0x2e0   : > { %22432 = vmatmul.mubr.f32.vlgmr.msra.gmra.mxu1 %v29594_v62  ;;  %v15249_v20 = vpop.f32.mrf.mxu1  ;;  %26962 = vmatmul.mubr.f32.vlgmr.msra.gmra.mxu0 %v29618_v54  ;;  %v15498_v16 = vpop.f32.mrf.mxu0  ;;  %v22908_v54 = vsel %vm459_vm2, %v22899_v19, 0 }
 0x2e1   : > { %26955 = vmatpush3.msra.mxu1 %v22549_v1  ;;  %v15250_v17 = vadd.f32 %v15249_v20, %v15176_v52  ;;  %26970 = vmatpush3.msra.mxu0 %v22547_v48  ;;  %v29779_v21 = vand.u32 4294901760, %v22908_v54  ;;  %v29824_v52 = vsub.f32 %v23838_v28, %v29806_v10 }
 0x2e2   : > { %26956 = vmatprep.mubr.msk.f32.mxu1 %vm27198_vm4, %v27181_v0  ;;  %v26728_v11 = vpop.f32.mrf.mxu1  ;;  %22941 = vmatprep.subr.mxu0 %v29712_v2  ;;  %v15500_v40 = vpop.f32.mrf.mxu0 }
 0x2e3   : > { %26964 = vmatprep.subr.mxu1 %v27181_v0  ;;  %v15324_v13 = vadd.f32 %v15323_v31, %v15250_v17  ;;  %26971 = vmatprep.mubr.msk.f32.mxu0 %vm27198_vm4, %v27181_v0  ;;  %v29797_v12 = vsub.f32 %v22908_v54, %v29779_v21 }
 0x2e4   : > { %26957 = vmatmul.mubr.f32.vlgmr.msra.gmra.mxu1 %v29594_v62  ;;  %v15395_v36 = vpop.f32.mrf.mxu1  ;;  %26972 = vmatmul.mubr.f32.vlgmr.msra.gmra.mxu0 %v29594_v62  ;;  %v15657_v53 = vpop.f32.mrf.mxu0 }
 0x2e5   : > { %26965 = vmatpush3.msra.mxu1 %v29678_v35  ;;  %v15396_v32 = vadd.f32 %v15395_v36, %v15324_v13  ;;  %22943 = vmatpush1.msra.mxu0 %v29724_v55  ;;  %v23484_v8 = vand.u32 4294901760, %v29797_v12  ;;  %v29848_v13 = vand.u32 4294901760, %v29824_v52 }
 0x2e6   : > { %26966 = vmatprep.mubr.msk.f32.mxu1 %vm27198_vm4, %v27181_v0  ;;  %v26738_v45 = vpop.f32.mrf.mxu1  ;;  %23102 = vmatprep.subr.mxu0 %v29734_v18  ;;  %v15659_v22 = vpop.f32.mrf.mxu0 }
 0x2e7   : > { %26974 = vmatprep.subr.mxu1 %v27181_v0  ;;  %v29784_v27 = vadd.f32 %v15396_v32, %v29673_v33  ;;  %22976 = vmatprep.mubr.f32.mxu0 %v27181_v0  ;;  %v23485_v19 = vsub.f32 %v29797_v12, %v23484_v8 }
 0x2e8   : > { %26967 = vmatmul.mubr.f32.vlgmr.msra.gmra.mxu1 %v29638_v59  ;;  %v15580_v43 = vpop.f32.mrf.mxu1  ;;  %22982 = vmatmul.mubr.f32.vlgmr.msra.gmra.mxu0 %v29774_v37  ;;  %v23827_v4 = vpop.permute.xlu0 %23826  ;;  %v23028_v59 = vand.u32 4294901760, %v23027_v23  ;;  %v23917_v23 = vsub.f32 %v29824_v52, %v29848_v13 }
 0x2e9   : > { %26975 = vmatpush3.msra.mxu1 %v29678_v35  ;;  %v15581_v33 = vadd.f32 %v15580_v43, %v15498_v16  ;;  %v15811_v34 = vpop.f32.mrf.mxu0  ;;  %23105 = vmatpush1.msra.mxu0 %v29749_v61 }
 0x2ea   : > { %23023 = vmatprep.subr.mxu1 %v23022_v38  ;;  %v15582_v39 = vpop.f32.mrf.mxu1  ;;  %23256 = vmatprep.subr.mxu0 %v23020_v47 }
 0x2eb   : > { %26976 = vmatprep.mubr.msk.f32.mxu1 %vm27198_vm4, %v27181_v0  ;;  %v15658_v35 = vadd.f32 %v15657_v53, %v15581_v33  ;;  %v15583_v51 = vadd.f32 %v15582_v39, %v15500_v40  ;;  %v15813_v48 = vpop.f32.mrf.mxu0  ;;  %23138 = vmatprep.mubr.f32.mxu0 %v27181_v0  ;;  %v29878_v39 = vand.u32 4294901760, %v23917_v23 }
 0x2ec   : > { %26977 = vmatmul.mubr.f32.vlgmr.msra.gmra.mxu1 %v29594_v62  ;;  %v15733_v25 = vpop.f32.mrf.mxu1  ;;  %23141 = vmatmul.mubr.f32.vlgmr.msra.gmra.mxu0 %v29720_v7  ;;  %v29804_v63 = vpop.permute.xlu1 %23828 }
 0x2ed   : > { %23029 = vmatpush1.msra.mxu1 %v23028_v59  ;;  %v23825_v46 = vpop.permute.xlu0 %23824  ;;  %v15660_v6 = vadd.f32 %v15659_v22, %v15583_v51  ;;  %v15734_v58 = vadd.f32 %v15733_v25, %v15658_v35  ;;  %23260 = vmatpush1.msra.mxu0 %v23026_v50  ;;  %v23831_v30 = vsel %vm6982_vm11, %v23827_v4, %v29804_v63  ;;  %v15962_v57 = vpop.f32.mrf.mxu0 }
 0x2ee   : > { %23178 = vmatprep.subr.mxu1 %v29712_v2  ;;  %v23830_v41 = vsel %vm6982_vm11, %v23825_v46, %v23827_v4  ;;  %v15735_v62 = vpop.f32.mrf.mxu1  ;;  %v23842_v49 = vsel %vm459_vm2, %v23831_v30, 0  ;;  %23062 = vmatprep.mubr.f32.mxu1 %v27181_v0 }
 0x2ef   : > { %23293 = vmatprep.mubr.f32.mxu0 %v27181_v0  ;;  %v15812_v18 = vadd.f32 %v15811_v34, %v15734_v58  ;;  %v15736_v24 = vadd.f32 %v15735_v62, %v15660_v6  ;;  %v29816_v26 = vand.u32 4294901760, %v23842_v49  ;;  %26979 = vmatprep.subr.mxu0 %v27181_v0  ;;  %v23840_v31 = vsel %vm459_vm2, %v23830_v41, 0  ;;  %v26743_v3 = vpop.f32.mrf.mxu0 }
 0x2f0   : > { %23064 = vmatmul.mubr.f32.vlgmr.msra.gmra.mxu1 %v29706_v42  ;;  %v15885_v5 = vpop.f32.mrf.mxu1  ;;  %23295 = vmatmul.mubr.f32.vlgmr.msra.gmra.mxu0 %v29706_v42  ;;  %v29828_v20 = vand.u32 4294901760, %v23840_v31 }
 0x2f1   : > { %23180 = vmatpush1.msra.mxu1 %v29724_v55  ;;  %v15814_v61 = vadd.f32 %v15813_v48, %v15736_v24  ;;  %v15886_v1 = vadd.f32 %v15885_v5, %v15812_v18  ;;  %26980 = vmatpush3.msra.mxu0 %v29779_v21  ;;  %v16112_v15 = vpop.f32.mrf.mxu0  ;;  %v29838_v16 = vsub.f32 %v23842_v49, %v29816_v26  ;;  %v23834_v40 = vpop.permute.xlu1 %23833 }
 0x2f2   : > { %23332 = vmatprep.subr.mxu1 %v29712_v2  ;;  %v15887_v60 = vpop.f32.mrf.mxu1  ;;  %23213 = vmatprep.mubr.f32.mxu1 %v27181_v0  ;;  %v29853_v14 = vsub.f32 %v23840_v31, %v29828_v20  ;;  %v23836_v53 = vsel %vm6989_vm12, %v29804_v63, %v23834_v40  ;;  %v417_v63 = vld [vmem:[%s30126_s3 + $0xd0] sm:$0xff] }
 0x2f3   : > { %26981 = vmatprep.mubr.msk.f32.mxu0 %vm27198_vm4, %v27181_v0  ;;  %v29834_v47 = vadd.f32 %v15886_v1, %v29730_v44  ;;  %v15888_v17 = vadd.f32 %v15887_v60, %v15814_v61  ;;  %26989 = vmatprep.subr.mxu0 %v27181_v0  ;;  %v26753_v50 = vpop.f32.mrf.mxu0  ;;  %v23957_v32 = vand.u32 4294901760, %v29838_v16  ;;  %v24775_v41 = vsel %vm455_vm0, %v417_v63, 0 }
 0x2f4   : > { %23217 = vmatmul.mubr.f32.vlgmr.msra.gmra.mxu1 %v29744_v29  ;;  %v16038_v2 = vpop.f32.mrf.mxu1  ;;  %26982 = vmatmul.mubr.f32.vlgmr.msra.gmra.mxu0 %v29774_v37  ;;  %v23963_v38 = vand.u32 4294901760, %v29853_v14  ;;  %v29908_v5 = vand.u32 4294901760, %v24775_v41  ;;  %vm25736_vm0 = vcmask 15360  }
 0x2f5   : > { %23334 = vmatpush1.msra.mxu1 %v29724_v55  ;;  %v29845_v11 = vadd.f32 %v15888_v17, %v29741_v9  ;;  %v16039_v44 = vadd.f32 %v16038_v2, %v15962_v57  ;;  %26990 = vmatpush3.msra.mxu0 %v29797_v12  ;;  %v23486_v55 = vand.u32 4294901760, %v23485_v19  ;;  %v16260_v36 = vpop.f32.mrf.mxu0  ;;  %v23958_v33 = vsub.f32 %v29838_v16, %v23957_v32 }
 0x2f6   : > { %23367 = vmatprep.mubr.f32.mxu1 %v27181_v0  ;;  %v26748_v54 = vpop.f32.mrf.mxu1  ;;  %26984 = vmatprep.subr.mxu1 %v27181_v0  ;;  %v23964_v48 = vsub.f32 %v29853_v14, %v23963_v38  ;;  %v29923_v40 = vsub.f32 %v24775_v41, %v29908_v5 }
 0x2f7   : > { %26991 = vmatprep.mubr.msk.f32.mxu0 %vm27198_vm4, %v27181_v0  ;;  %v16113_v9 = vadd.f32 %v16112_v15, %v16039_v44  ;;  %26999 = vmatprep.subr.mxu0 %v27181_v0  ;;  %v26763_v22 = vpop.f32.mrf.mxu0  ;;  %v23959_v46 = vand.u32 4294901760, %v23958_v33 }
 0x2f8   : > { %23369 = vmatmul.mubr.f32.vlgmr.msra.gmra.mxu1 %v29706_v42  ;;  %v16186_v37 = vpop.f32.mrf.mxu1  ;;  %26992 = vmatmul.mubr.f32.vlgmr.msra.gmra.mxu0 %v29720_v7  ;;  %v23845_v7 = vsel %vm459_vm2, %v23836_v53, 0  ;;  %v23965_v57 = vand.u32 4294901760, %v23964_v48 }
 0x2f9   : > { %26985 = vmatpush3.msra.mxu1 %v23486_v55  ;;  %v16187_v45 = vadd.f32 %v16186_v37, %v16113_v9  ;;  %27000 = vmatpush3.msra.mxu0 %v23484_v8  ;;  %v16435_v4 = vpop.f32.mrf.mxu0  ;;  %v29883_v35 = vand.u32 4294901760, %v23845_v7 }
 0x2fa   : > { %26986 = vmatprep.mubr.msk.f32.mxu1 %vm27198_vm4, %v27181_v0  ;;  %v26758_v56 = vpop.f32.mrf.mxu1  ;;  %23878 = vmatprep.subr.mxu0 %v29816_v26 }
 0x2fb   : > { %26994 = vmatprep.subr.mxu1 %v27181_v0  ;;  %v16261_v43 = vadd.f32 %v16260_v36, %v16187_v45  ;;  %27001 = vmatprep.mubr.msk.f32.mxu0 %vm27198_vm4, %v27181_v0  ;;  %v16437_v12 = vpop.f32.mrf.mxu0  ;;  %v29901_v62 = vsub.f32 %v23845_v7, %v29883_v35  ;;  %v29946_v56 = vand.u32 4294901760, %v29923_v40 }
 0x2fc   : > { %26987 = vmatmul.mubr.f32.vlgmr.msra.gmra.mxu1 %v29706_v42  ;;  %v16332_v34 = vpop.f32.mrf.mxu1  ;;  %27002 = vmatmul.mubr.f32.vlgmr.msra.gmra.mxu0 %v29706_v42 }
 0x2fd   : > { %26995 = vmatpush3.msra.mxu1 %v29779_v21  ;;  %v16333_v28 = vadd.f32 %v16332_v34, %v16261_v43  ;;  %23880 = vmatpush1.msra.mxu0 %v29828_v20  ;;  %v16594_v25 = vpop.f32.mrf.mxu0  ;;  %v24421_v61 = vand.u32 4294901760, %v29901_v62 }
 0x2fe   : > { %26996 = vmatprep.mubr.msk.f32.mxu1 %vm27198_vm4, %v27181_v0  ;;  %v26768_v59 = vpop.f32.mrf.mxu1  ;;  %24039 = vmatprep.subr.mxu0 %v29838_v16 }
 0x2ff   : > { %27004 = vmatprep.subr.mxu1 %v27181_v0  ;;  %v29888_v51 = vadd.f32 %v16333_v28, %v29784_v27  ;;  %23913 = vmatprep.mubr.f32.mxu0 %v27181_v0  ;;  %v16596_v27 = vpop.f32.mrf.mxu0  ;;  %v24854_v59 = vsub.f32 %v29923_v40, %v29946_v56 }
 0x300   : > { %26997 = vmatmul.mubr.f32.vlgmr.msra.gmra.mxu1 %v29744_v29  ;;  %v16517_v6 = vpop.f32.mrf.mxu1  ;;  %23919 = vmatmul.mubr.f32.vlgmr.msra.gmra.mxu0 %v29878_v39 }
 0x301   : > { %27005 = vmatpush3.msra.mxu1 %v29779_v21  ;;  %v16518_v58 = vadd.f32 %v16517_v6, %v16435_v4  ;;  %24042 = vmatpush1.msra.mxu0 %v29853_v14  ;;  %v16748_v49 = vpop.f32.mrf.mxu0 }
 0x302   : > { %23960 = vmatprep.subr.mxu1 %v23959_v46  ;;  %v16519_v30 = vpop.f32.mrf.mxu1  ;;  %24193 = vmatprep.subr.mxu0 %v23957_v32  ;;  %v24764_v29 = vpop.permute.xlu0 %24763  ;;  %v24422_v32 = vsub.f32 %v29901_v62, %v24421_v61 }
 0x303   : > { %27006 = vmatprep.mubr.msk.f32.mxu1 %vm27198_vm4, %v27181_v0  ;;  %v16595_v21 = vadd.f32 %v16594_v25, %v16518_v58  ;;  %v16520_v8 = vadd.f32 %v16519_v30, %v16437_v12  ;;  %24075 = vmatprep.mubr.f32.mxu0 %v27181_v0  ;;  %v16750_v31 = vpop.f32.mrf.mxu0 }
 0x304   : > { %27007 = vmatmul.mubr.f32.vlgmr.msra.gmra.mxu1 %v29706_v42  ;;  %24078 = vmatmul.mubr.f32.vlgmr.msra.gmra.mxu0 %v29824_v52  ;;  %v16670_v24 = vpop.f32.mrf.mxu1 }
 0x305   : > { %23966 = vmatpush1.msra.mxu1 %v23965_v57  ;;  %v16597_v18 = vadd.f32 %v16596_v27, %v16520_v8  ;;  %24197 = vmatpush1.msra.mxu0 %v23963_v38  ;;  %v16671_v3 = vadd.f32 %v16670_v24, %v16595_v21  ;;  %v16899_v16 = vpop.f32.mrf.mxu0  ;;  %v29978_v27 = vand.u32 4294901760, %v24854_v59 }
 0x306   : > { %24115 = vmatprep.subr.mxu1 %v29816_v26  ;;  %v24766_v1 = vpop.permute.xlu1 %24765  ;;  %23999 = vmatprep.mubr.f32.mxu1 %v27181_v0  ;;  %v16672_v15 = vpop.f32.mrf.mxu1 }
 0x307   : > { %24230 = vmatprep.mubr.f32.mxu0 %v27181_v0  ;;  %v24762_v42 = vpop.permute.xlu0 %24761  ;;  %v24768_v60 = vsel %vm7921_vm13, %v24764_v29, %v24766_v1  ;;  %27009 = vmatprep.subr.mxu0 %v27181_v0  ;;  %v16749_v17 = vadd.f32 %v16748_v49, %v16671_v3  ;;  %v16673_v50 = vadd.f32 %v16672_v15, %v16597_v18  ;;  %v26773_v55 = vpop.f32.mrf.mxu0 }
 0x308   : > { %v24767_v19 = vsel %vm7921_vm13, %v24762_v42, %v24764_v29  ;;  %24001 = vmatmul.mubr.f32.vlgmr.msra.gmra.mxu1 %v29806_v10  ;;  %v24779_v2 = vsel %vm459_vm2, %v24768_v60, 0  ;;  %24232 = vmatmul.mubr.f32.vlgmr.msra.gmra.mxu0 %v29806_v10 }
 0x309   : > { %v24777_v44 = vsel %vm459_vm2, %v24767_v19, 0  ;;  %24117 = vmatpush1.msra.mxu1 %v29828_v20  ;;  %v29925_v54 = vand.u32 4294901760, %v24779_v2  ;;  %27010 = vmatpush3.msra.mxu0 %v29883_v35  ;;  %v16822_v14 = vpop.f32.mrf.mxu1  ;;  %v16751_v36 = vadd.f32 %v16750_v31, %v16673_v50 }
 0x30a   : > { %24269 = vmatprep.subr.mxu1 %v29816_v26  ;;  %v29929_v9 = vand.u32 4294901760, %v24777_v44  ;;  %24150 = vmatprep.mubr.f32.mxu1 %v27181_v0  ;;  %v16823_v37 = vadd.f32 %v16822_v14, %v16749_v17  ;;  %v17049_v22 = vpop.f32.mrf.mxu0 }
 0x30b   : > { %27011 = vmatprep.mubr.msk.f32.mxu0 %vm27198_vm4, %v27181_v0  ;;  %v29936_v53 = vsub.f32 %v24779_v2, %v29925_v54  ;;  %27019 = vmatprep.subr.mxu0 %v27181_v0  ;;  %v16824_v26 = vpop.f32.mrf.mxu1  ;;  %v24771_v38 = vpop.permute.xlu1 %24770 }
 0x30c   : > { %24154 = vmatmul.mubr.f32.vlgmr.msra.gmra.mxu1 %v29848_v13  ;;  %27012 = vmatmul.mubr.f32.vlgmr.msra.gmra.mxu0 %v29878_v39  ;;  %v29943_v45 = vadd.f32 %v16823_v37, %v29834_v47  ;;  %v16825_v23 = vadd.f32 %v16824_v26, %v16751_v36  ;;  %v29951_v4 = vsub.f32 %v24777_v44, %v29929_v9  ;;  %v26783_v33 = vpop.f32.mrf.mxu0 }
 0x30d   : > { %24271 = vmatpush1.msra.mxu1 %v29828_v20  ;;  %27020 = vmatpush3.msra.mxu0 %v29901_v62  ;;  %v24423_v20 = vand.u32 4294901760, %v24422_v32  ;;  %v24894_v39 = vand.u32 4294901760, %v29936_v53  ;;  %v24773_v28 = vsel %vm7928_vm14, %v24766_v1, %v24771_v38 }
 0x30e   : > { %24304 = vmatprep.mubr.f32.mxu1 %v27181_v0  ;;  %v16975_v43 = vpop.f32.mrf.mxu1  ;;  %27014 = vmatprep.subr.mxu1 %v27181_v0  ;;  %v29957_v47 = vadd.f32 %v16825_v23, %v29845_v11  ;;  %v17197_v11 = vpop.f32.mrf.mxu0  ;;  %v24900_v25 = vand.u32 4294901760, %v29951_v4 }
 0x30f   : > { %27021 = vmatprep.mubr.msk.f32.mxu0 %vm27198_vm4, %v27181_v0  ;;  %v16976_v7 = vadd.f32 %v16975_v43, %v16899_v16  ;;  %27029 = vmatprep.subr.mxu0 %v27181_v0  ;;  %v24895_v6 = vsub.f32 %v29936_v53, %v24894_v39 }
 0x310   : > { %24306 = vmatmul.mubr.f32.vlgmr.msra.gmra.mxu1 %v29806_v10  ;;  %v26778_v34 = vpop.f32.mrf.mxu1  ;;  %27022 = vmatmul.mubr.f32.vlgmr.msra.gmra.mxu0 %v29824_v52  ;;  %v26793_v46 = vpop.f32.mrf.mxu0  ;;  %v24782_v52 = vsel %vm459_vm2, %v24773_v28, 0  ;;  %v24901_v21 = vsub.f32 %v29951_v4, %v24900_v25 }
 0x311   : > { %27015 = vmatpush3.msra.mxu1 %v24423_v20  ;;  %v17050_v12 = vadd.f32 %v17049_v22, %v16976_v7  ;;  %27030 = vmatpush3.msra.mxu0 %v24421_v61  ;;  %v29983_v29 = vand.u32 4294901760, %v24782_v52  ;;  %v24896_v49 = vand.u32 4294901760, %v24895_v6 }
 0x312   : > { %27016 = vmatprep.mubr.msk.f32.mxu1 %vm27198_vm4, %v27181_v0  ;;  %v17123_v48 = vpop.f32.mrf.mxu1  ;;  %24815 = vmatprep.subr.mxu0 %v29925_v54  ;;  %v17375_v41 = vpop.f32.mrf.mxu0 }
 0x313   : > { %27024 = vmatprep.subr.mxu1 %v27181_v0  ;;  %v17124_v63 = vadd.f32 %v17123_v48, %v17050_v12  ;;  %27031 = vmatprep.mubr.msk.f32.mxu0 %vm27198_vm4, %v27181_v0  ;;  %v25357_v61 = vsub.f32 %v24782_v52, %v29983_v29 }
 0x314   : > { %27017 = vmatmul.mubr.f32.vlgmr.msra.gmra.mxu1 %v29806_v10  ;;  %v26788_v58 = vpop.f32.mrf.mxu1  ;;  %27032 = vmatmul.mubr.f32.vlgmr.msra.gmra.mxu0 %v29806_v10  ;;  %v17377_v8 = vpop.f32.mrf.mxu0 }
 0x315   : > { %27025 = vmatpush3.msra.mxu1 %v29883_v35  ;;  %v17198_v30 = vadd.f32 %v17197_v11, %v17124_v63  ;;  %24817 = vmatpush1.msra.mxu0 %v29929_v9  ;;  %v25358_v17 = vand.u32 4294901760, %v25357_v61 }
 0x316   : > { %27026 = vmatprep.mubr.msk.f32.mxu1 %vm27198_vm4, %v27181_v0  ;;  %v17269_v62 = vpop.f32.mrf.mxu1  ;;  %24976 = vmatprep.subr.mxu0 %v29936_v53  ;;  %v17534_v31 = vpop.f32.mrf.mxu0 }
 0x317   : > { %27034 = vmatprep.subr.mxu1 %v27181_v0  ;;  %v17270_v57 = vadd.f32 %v17269_v62, %v17198_v30  ;;  %24850 = vmatprep.mubr.f32.mxu0 %v27181_v0  ;;  %v25359_v36 = vsub.f32 %v25357_v61, %v25358_v17 }
 0x318   : > { %27027 = vmatmul.mubr.f32.vlgmr.msra.gmra.mxu1 %v29848_v13  ;;  %v26798_v18 = vpop.f32.mrf.mxu1  ;;  %24856 = vmatmul.mubr.f32.vlgmr.msra.gmra.mxu0 %v29978_v27  ;;  %v24902_v13 = vand.u32 4294901760, %v24901_v21  ;;  %v17536_v42 = vpop.f32.mrf.mxu0 }
 0x319   : > { %27035 = vmatpush3.msra.mxu1 %v29883_v35  ;;  %v29993_v24 = vadd.f32 %v17270_v57, %v29888_v51  ;;  %24979 = vmatpush1.msra.mxu0 %v29951_v4  ;;  %v25360_v38 = vand.u32 4294901760, %v25359_v36 }
 0x31a   : > { %24897 = vmatprep.subr.mxu1 %v24896_v49  ;;  %v17457_v3 = vpop.f32.mrf.mxu1  ;;  %25130 = vmatprep.subr.mxu0 %v24894_v39  ;;  %v17688_v19 = vpop.f32.mrf.mxu0 }
 0x31b   : > { %27036 = vmatprep.mubr.msk.f32.mxu1 %vm27198_vm4, %v27181_v0  ;;  %v17458_v1 = vadd.f32 %v17457_v3, %v17375_v41  ;;  %25012 = vmatprep.mubr.f32.mxu0 %v27181_v0 }
 0x31c   : > { %27037 = vmatmul.mubr.f32.vlgmr.msra.gmra.mxu1 %v29806_v10  ;;  %v17459_v35 = vpop.f32.mrf.mxu1  ;;  %25015 = vmatmul.mubr.f32.vlgmr.msra.gmra.mxu0 %v29923_v40  ;;  %v17690_v2 = vpop.f32.mrf.mxu0 }
 0x31d   : > { %24903 = vmatpush1.msra.mxu1 %v24902_v13  ;;  %v17535_v51 = vadd.f32 %v17534_v31, %v17458_v1  ;;  %v17460_v60 = vadd.f32 %v17459_v35, %v17377_v8  ;;  %25134 = vmatpush1.msra.mxu0 %v24900_v25 }
 0x31e   : > { %25052 = vmatprep.subr.mxu1 %v29925_v54  ;;  %24936 = vmatprep.mubr.f32.mxu1 %v27181_v0  ;;  %v17610_v16 = vpop.f32.mrf.mxu1 }
 0x31f   : > { %25167 = vmatprep.mubr.f32.mxu0 %v27181_v0  ;;  %v17537_v15 = vadd.f32 %v17536_v42, %v17460_v60  ;;  %27039 = vmatprep.subr.mxu0 %v27181_v0  ;;  %v17611_v10 = vadd.f32 %v17610_v16, %v17535_v51  ;;  %v17839_v50 = vpop.f32.mrf.mxu0 }
 0x320   : > { %24938 = vmatmul.mubr.f32.vlgmr.msra.gmra.mxu1 %v29908_v5  ;;  %25169 = vmatmul.mubr.f32.vlgmr.msra.gmra.mxu0 %v29908_v5  ;;  %v17612_v44 = vpop.f32.mrf.mxu1 }
 0x321   : > { %25054 = vmatpush1.msra.mxu1 %v29929_v9  ;;  %27040 = vmatpush3.msra.mxu0 %v29983_v29  ;;  %v17689_v14 = vadd.f32 %v17688_v19, %v17611_v10  ;;  %v17613_v55 = vadd.f32 %v17612_v44, %v17537_v15  ;;  %v26803_v37 = vpop.f32.mrf.mxu0 }
 0x322   : > { %25206 = vmatprep.subr.mxu1 %v29925_v54  ;;  %25087 = vmatprep.mubr.f32.mxu1 %v27181_v0 }
 0x323   : > { %27041 = vmatprep.mubr.msk.f32.mxu0 %vm27198_vm4, %v27181_v0  ;;  %27049 = vmatprep.subr.mxu0 %v27181_v0  ;;  %v17691_v32 = vadd.f32 %v17690_v2, %v17613_v55  ;;  %v17762_v53 = vpop.f32.mrf.mxu1 }
 0x324   : > { %25091 = vmatmul.mubr.f32.vlgmr.msra.gmra.mxu1 %v29946_v56  ;;  %27042 = vmatmul.mubr.f32.vlgmr.msra.gmra.mxu0 %v29978_v27  ;;  %v17763_v54 = vadd.f32 %v17762_v53, %v17689_v14  ;;  %v17989_v26 = vpop.f32.mrf.mxu0 }
 0x325   : > { %25208 = vmatpush1.msra.mxu1 %v29929_v9  ;;  %27050 = vmatpush3.msra.mxu0 %v25357_v61  ;;  %v17764_v23 = vpop.f32.mrf.mxu1 }
 0x326   : > { %25241 = vmatprep.mubr.f32.mxu1 %v27181_v0  ;;  %27044 = vmatprep.subr.mxu1 %v27181_v0  ;;  %v18213_v22 = vadd.f32 %v17763_v54, %v29943_v45  ;;  %v17765_v43 = vadd.f32 %v17764_v23, %v17691_v32  ;;  %v26813_v4 = vpop.f32.mrf.mxu0 }
 0x327   : > { %27051 = vmatprep.mubr.msk.f32.mxu0 %vm27198_vm4, %v27181_v0  ;;  %27059 = vmatprep.subr.mxu0 %v27181_v0 }
 0x328   : > { %25243 = vmatmul.mubr.f32.vlgmr.msra.gmra.mxu1 %v29908_v5  ;;  %v17915_v9 = vpop.f32.mrf.mxu1  ;;  %27052 = vmatmul.mubr.f32.vlgmr.msra.gmra.mxu0 %v29923_v40  ;;  %v18214_v20 = vadd.f32 %v17765_v43, %v29957_v47  ;;  %v18137_v33 = vpop.f32.mrf.mxu0 }
 0x329   : > { %27045 = vmatpush3.msra.mxu1 %v25360_v38  ;;  %v17916_v7 = vadd.f32 %v17915_v9, %v17839_v50  ;;  %27060 = vmatpush3.msra.mxu0 %v25358_v17 }
 0x32a   : > { %27046 = vmatprep.mubr.msk.f32.mxu1 %vm27198_vm4, %v27181_v0  ;;  %v26808_v45 = vpop.f32.mrf.mxu1  ;;  %27054 = vmatprep.subr.mxu1 %v27181_v0  ;;  %v26823_v39 = vpop.f32.mrf.mxu0 }
 0x32b   : > { %v17990_v34 = vadd.f32 %v17989_v26, %v17916_v7  ;;  %27061 = vmatprep.mubr.msk.f32.mxu0 %vm27198_vm4, %v27181_v0 }
 0x32c   : > { %27047 = vmatmul.mubr.f32.vlgmr.msra.gmra.mxu1 %v29908_v5  ;;  %v18063_v28 = vpop.f32.mrf.mxu1  ;;  %v18312_v47 = vpop.f32.mrf.mxu0  ;;  %27062 = vmatmul.mubr.f32.vlgmr.msra.gmra.mxu0 %v29908_v5 }
 0x32d   : > { %27055 = vmatpush3.msra.mxu1 %v29983_v29  ;;  %27056 = vmatprep.mubr.msk.f32.mxu1 %vm27198_vm4, %v27181_v0  ;;  %v18064_v40 = vadd.f32 %v18063_v28, %v17990_v34 }
 0x32e   : > { %27064 = vmatprep.subr.mxu1 %v27181_v0  ;;  %v26818_v12 = vpop.f32.mrf.mxu1  ;;  %v18314_v11 = vpop.f32.mrf.mxu0 }
 0x32f   : > { %v18138_v59 = vadd.f32 %v18137_v33, %v18064_v40 }
 0x330   : > { %27057 = vmatmul.mubr.f32.vlgmr.msra.gmra.mxu1 %v29946_v56  ;;  %v18209_v48 = vpop.f32.mrf.mxu1  ;;  %v18471_v63 = vpop.f32.mrf.mxu0 }
 0x331   : > { %27065 = vmatpush3.msra.mxu1 %v29983_v29  ;;  %27066 = vmatprep.mubr.msk.f32.mxu1 %vm27198_vm4, %v27181_v0  ;;  %v18210_v25 = vadd.f32 %v18209_v48, %v18138_v59 }
 0x332   : > { %v26828_v46 = vpop.f32.mrf.mxu1  ;;  %v18473_v6 = vpop.f32.mrf.mxu0 }
 0x333   : > { %v18215_v52 = vadd.f32 %v18210_v25, %v29993_v24 }
 0x334   : > { %27067 = vmatmul.mubr.f32.vlgmr.msra.gmra.mxu1 %v29908_v5  ;;  %v18394_v58 = vpop.f32.mrf.mxu1  ;;  %v18625_v30 = vpop.f32.mrf.mxu0 }
 0x335   : > { %v18395_v27 = vadd.f32 %v18394_v58, %v18312_v47 }
 0x336   : > { %v18396_v41 = vpop.f32.mrf.mxu1  ;;  %v18627_v57 = vpop.f32.mrf.mxu0 }
 0x337   : > { %v18472_v62 = vadd.f32 %v18471_v63, %v18395_v27  ;;  %v18397_v56 = vadd.f32 %v18396_v41, %v18314_v11 }
 0x338   : > { %v18547_v29 = vpop.f32.mrf.mxu1 }
 0x339   : > { %v18474_v21 = vadd.f32 %v18473_v6, %v18397_v56  ;;  %v18776_v8 = vpop.f32.mrf.mxu0  ;;  %v18548_v49 = vadd.f32 %v18547_v29, %v18472_v62 }
 0x33a   : > { %v18549_v0 = vpop.f32.mrf.mxu1 }
 0x33b   : > { %v26833_v18 = vpop.f32.mrf.mxu0  ;;  %v18626_v31 = vadd.f32 %v18625_v30, %v18548_v49  ;;  %v18550_v3 = vadd.f32 %v18549_v0, %v18474_v21 }
 0x33d   : > { %v18628_v61 = vadd.f32 %v18627_v57, %v18550_v3  ;;  %v18699_v24 = vpop.f32.mrf.mxu1 }
 0x33e   : > { %v18926_v13 = vpop.f32.mrf.mxu0  ;;  %v18700_v1 = vadd.f32 %v18699_v24, %v18626_v31 }
 0x33f   : > { %v18701_v5 = vpop.f32.mrf.mxu1 }
 0x340   : > { %v26843_v42 = vpop.f32.mrf.mxu0  ;;  %v19150_v35 = vadd.f32 %v18700_v1, %v18213_v22  ;;  %v18702_v51 = vadd.f32 %v18701_v5, %v18628_v61 }
 0x342   : > { %v18852_v60 = vpop.f32.mrf.mxu1  ;;  %v19151_v19 = vadd.f32 %v18702_v51, %v18214_v20  ;;  %v19074_v15 = vpop.f32.mrf.mxu0 }
 0x343   : > { %v18853_v17 = vadd.f32 %v18852_v60, %v18776_v8 }
 0x344   : > { %v26838_v16 = vpop.f32.mrf.mxu1  ;;  %v26853_v10 = vpop.f32.mrf.mxu0 }
 0x345   : > { %v18927_v2 = vadd.f32 %v18926_v13, %v18853_v17 }
 0x346   : > { %v19000_v44 = vpop.f32.mrf.mxu1  ;;  %v19249_v14 = vpop.f32.mrf.mxu0 }
 0x347   : > { %v19001_v50 = vadd.f32 %v19000_v44, %v18927_v2 }
 0x348   : > { %v26848_v55 = vpop.f32.mrf.mxu1  ;;  %v19251_v37 = vpop.f32.mrf.mxu0 }
 0x349   : > { %v19075_v36 = vadd.f32 %v19074_v15, %v19001_v50 }
 0x34a   : > { %v19146_v32 = vpop.f32.mrf.mxu1  ;;  %v19408_v54 = vpop.f32.mrf.mxu0 }
 0x34b   : > { %v19147_v53 = vadd.f32 %v19146_v32, %v19075_v36 }
 0x34c   : > { %v26858_v26 = vpop.f32.mrf.mxu1  ;;  %v19410_v22 = vpop.f32.mrf.mxu0 }
 0x34d   : > { %v19152_v23 = vadd.f32 %v19147_v53, %v18215_v52 }
 0x34e   : > { %v19331_v38 = vpop.f32.mrf.mxu1  ;;  %v19562_v4 = vpop.f32.mrf.mxu0 }
 0x34f   : > { %v19332_v43 = vadd.f32 %v19331_v38, %v19249_v14 }
 0x350   : > { %v19333_v9 = vpop.f32.mrf.mxu1  ;;  %v19564_v33 = vpop.f32.mrf.mxu0 }
 0x351   : > { %v19409_v20 = vadd.f32 %v19408_v54, %v19332_v43  ;;  %v19334_v7 = vadd.f32 %v19333_v9, %v19251_v37 }
 0x352   : > { %v19484_v34 = vpop.f32.mrf.mxu1 }
 0x353   : > { %v19411_v45 = vadd.f32 %v19410_v22, %v19334_v7  ;;  %v19713_v39 = vpop.f32.mrf.mxu0  ;;  %v19485_v28 = vadd.f32 %v19484_v34, %v19409_v20 }
 0x354   : > { %v19486_v40 = vpop.f32.mrf.mxu1 }
 0x355   : > { %v26863_v47 = vpop.f32.mrf.mxu0  ;;  %v19563_v12 = vadd.f32 %v19562_v4, %v19485_v28  ;;  %v19487_v59 = vadd.f32 %v19486_v40, %v19411_v45 }
 0x357   : > { %v19565_v11 = vadd.f32 %v19564_v33, %v19487_v59  ;;  %v19636_v48 = vpop.f32.mrf.mxu1 }
 0x358   : > { %v19863_v25 = vpop.f32.mrf.mxu0  ;;  %v19637_v63 = vadd.f32 %v19636_v48, %v19563_v12 }
 0x359   : > { %v19638_v46 = vpop.f32.mrf.mxu1 }
 0x35a   : > { %v26873_v52 = vpop.f32.mrf.mxu0  ;;  %v20087_v6 = vadd.f32 %v19637_v63, %v19150_v35  ;;  %v19639_v58 = vadd.f32 %v19638_v46, %v19565_v11 }
 0x35c   : > { %v19789_v27 = vpop.f32.mrf.mxu1  ;;  %v20088_v30 = vadd.f32 %v19639_v58, %v19151_v19  ;;  %v20011_v62 = vpop.f32.mrf.mxu0 }
 0x35d   : > { %v19790_v41 = vadd.f32 %v19789_v27, %v19713_v39 }
 0x35e   : > { %v26868_v56 = vpop.f32.mrf.mxu1  ;;  %v26883_v21 = vpop.f32.mrf.mxu0 }
 0x35f   : > { %v19864_v57 = vadd.f32 %v19863_v25, %v19790_v41 }
 0x360   : > { %v19937_v29 = vpop.f32.mrf.mxu1  ;;  %v20186_v49 = vpop.f32.mrf.mxu0 }
 0x361   : > { %v19938_v8 = vadd.f32 %v19937_v29, %v19864_v57 }
 0x362   : > { %v26878_v0 = vpop.f32.mrf.mxu1  ;;  %v20188_v31 = vpop.f32.mrf.mxu0 }
 0x363   : > { %v20012_v18 = vadd.f32 %v20011_v62, %v19938_v8 }
 0x364   : > { %v20083_v3 = vpop.f32.mrf.mxu1  ;;  %v20345_v24 = vpop.f32.mrf.mxu0 }
 0x365   : > { %v20084_v61 = vadd.f32 %v20083_v3, %v20012_v18 }
 0x366   : > { %v26888_v13 = vpop.f32.mrf.mxu1  ;;  %v20347_v5 = vpop.f32.mrf.mxu0 }
 0x367   : > { %v20089_v1 = vadd.f32 %v20084_v61, %v19152_v23 }
 0x368   : > { %v20268_v42 = vpop.f32.mrf.mxu1  ;;  %v20499_v51 = vpop.f32.mrf.mxu0 }
 0x369   : > { %v20269_v35 = vadd.f32 %v20268_v42, %v20186_v49 }
 0x36a   : > { %v20270_v60 = vpop.f32.mrf.mxu1  ;;  %v20501_v15 = vpop.f32.mrf.mxu0 }
 0x36b   : > { %v20346_v19 = vadd.f32 %v20345_v24, %v20269_v35  ;;  %v20271_v17 = vadd.f32 %v20270_v60, %v20188_v31 }
 0x36c   : > { %v20421_v16 = vpop.f32.mrf.mxu1  ;;  %v20650_v44 = vpop.f32.mrf.mxu0 }
 0x36d   : > { %v20348_v2 = vadd.f32 %v20347_v5, %v20271_v17  ;;  %v20422_v10 = vadd.f32 %v20421_v16, %v20346_v19 }
 0x36e   : > { %v20423_v50 = vpop.f32.mrf.mxu1  ;;  %v26893_v36 = vpop.f32.mrf.mxu0 }
 0x36f   : > { %v20500_v14 = vadd.f32 %v20499_v51, %v20422_v10  ;;  %v20424_v55 = vadd.f32 %v20423_v50, %v20348_v2 }
 0x370   : > { %v20573_v37 = vpop.f32.mrf.mxu1  ;;  %v20800_v54 = vpop.f32.mrf.mxu0 }
 0x371   : > { %v20502_v32 = vadd.f32 %v20501_v15, %v20424_v55  ;;  %v20574_v53 = vadd.f32 %v20573_v37, %v20500_v14 }
 0x372   : > { %v20575_v26 = vpop.f32.mrf.mxu1  ;;  %v26903_v38 = vpop.f32.mrf.mxu0 }
 0x373   : > { %v21024_v23 = vadd.f32 %v20574_v53, %v20087_v6  ;;  %v20576_v22 = vadd.f32 %v20575_v26, %v20502_v32 }
 0x374   : > { %v20726_v43 = vpop.f32.mrf.mxu1  ;;  %v20948_v20 = vpop.f32.mrf.mxu0 }
 0x375   : > { %v21025_v4 = vadd.f32 %v20576_v22, %v20088_v30  ;;  %v20727_v9 = vadd.f32 %v20726_v43, %v20650_v44 }
 0x376   : > { %v26898_v7 = vpop.f32.mrf.mxu1  ;;  %v26913_v45 = vpop.f32.mrf.mxu0 }
 0x377   : > { %v20801_v33 = vadd.f32 %v20800_v54, %v20727_v9 }
 0x378   : > { %v20874_v34 = vpop.f32.mrf.mxu1  ;;  %v21109_v28 = vpop.f32.mrf.mxu0 }
 0x379   : > { %v20875_v39 = vadd.f32 %v20874_v34, %v20801_v33 }
 0x37a   : > { %v26908_v40 = vpop.f32.mrf.mxu1  ;;  %v21111_v12 = vpop.f32.mrf.mxu0 }
 0x37b   : > { %v20949_v47 = vadd.f32 %v20948_v20, %v20875_v39 }
 0x37c   : > { %v21020_v59 = vpop.f32.mrf.mxu1  ;;  %v21268_v48 = vpop.f32.mrf.mxu0 }
 0x37d   : > { %v21021_v11 = vadd.f32 %v21020_v59, %v20949_v47 }
 0x37e   : > { %v26918_v25 = vpop.f32.mrf.mxu1  ;;  %v21270_v46 = vpop.f32.mrf.mxu0 }
 0x37f   : > { %v21026_v63 = vadd.f32 %v21021_v11, %v20089_v1 }
 0x380   : > { %v21191_v52 = vpop.f32.mrf.mxu1  ;;  %v21422_v58 = vpop.f32.mrf.mxu0 }
 0x381   : > { %v21192_v6 = vadd.f32 %v21191_v52, %v21109_v28 }
 0x382   : > { %v21193_v27 = vpop.f32.mrf.mxu1  ;;  %v21424_v62 = vpop.f32.mrf.mxu0 }
 0x383   : > { %v21269_v30 = vadd.f32 %v21268_v48, %v21192_v6  ;;  %v21194_v41 = vadd.f32 %v21193_v27, %v21111_v12 }
 0x384   : > { %v21344_v56 = vpop.f32.mrf.mxu1  ;;  %v21573_v29 = vpop.f32.mrf.mxu0 }
 0x385   : > { %v21271_v57 = vadd.f32 %v21270_v46, %v21194_v41  ;;  %v21345_v21 = vadd.f32 %v21344_v56, %v21269_v30 }
 0x386   : > { %v21346_v8 = vpop.f32.mrf.mxu1  ;;  %v26923_v18 = vpop.f32.mrf.mxu0 }
 0x387   : > { %v21423_v49 = vadd.f32 %v21422_v58, %v21345_v21  ;;  %v21347_v0 = vadd.f32 %v21346_v8, %v21271_v57 }
 0x388   : > { %v21496_v31 = vpop.f32.mrf.mxu1  ;;  %v21723_v24 = vpop.f32.mrf.mxu0 }
 0x389   : > { %v21425_v3 = vadd.f32 %v21424_v62, %v21347_v0  ;;  %v21497_v61 = vadd.f32 %v21496_v31, %v21423_v49 }
 0x38a   : > { %v21498_v13 = vpop.f32.mrf.mxu1  ;;  %v26933_v42 = vpop.f32.mrf.mxu0 }
 0x38b   : > { %v21947_v1 = vadd.f32 %v21497_v61, %v21024_v23  ;;  %v21499_v5 = vadd.f32 %v21498_v13, %v21425_v3 }
 0x38c   : > { %v21649_v35 = vpop.f32.mrf.mxu1  ;;  %v21871_v19 = vpop.f32.mrf.mxu0 }
 0x38d   : > { %v21948_v51 = vadd.f32 %v21499_v5, %v21025_v4  ;;  %v21650_v60 = vadd.f32 %v21649_v35, %v21573_v29 }
 0x38e   : > { %v26928_v17 = vpop.f32.mrf.mxu1  ;;  %v26943_v16 = vpop.f32.mrf.mxu0 }
 0x38f   : > { %v21724_v15 = vadd.f32 %v21723_v24, %v21650_v60 }
 0x390   : > { %v21797_v2 = vpop.f32.mrf.mxu1  ;;  %v22046_v44 = vpop.f32.mrf.mxu0 }
 0x391   : > { %v21798_v10 = vadd.f32 %v21797_v2, %v21724_v15 }
 0x392   : > { %v26938_v50 = vpop.f32.mrf.mxu1  ;;  %v22048_v55 = vpop.f32.mrf.mxu0 }
 0x393   : > { %v21872_v14 = vadd.f32 %v21871_v19, %v21798_v10 }
 0x394   : > { %v21943_v36 = vpop.f32.mrf.mxu1  ;;  %v22205_v32 = vpop.f32.mrf.mxu0 }
 0x395   : > { %v21944_v37 = vadd.f32 %v21943_v36, %v21872_v14 }
 0x396   : > { %v26948_v53 = vpop.f32.mrf.mxu1  ;;  %v22207_v26 = vpop.f32.mrf.mxu0 }
 0x397   : > { %v21949_v54 = vadd.f32 %v21944_v37, %v21026_v63 }
 0x398   : > { %v22128_v23 = vpop.f32.mrf.mxu1  ;;  %v22359_v38 = vpop.f32.mrf.mxu0 }
 0x399   : > { %v22129_v22 = vadd.f32 %v22128_v23, %v22046_v44 }
 0x39a   : > { %v22130_v43 = vpop.f32.mrf.mxu1  ;;  %v22361_v20 = vpop.f32.mrf.mxu0 }
 0x39b   : > { %v22206_v4 = vadd.f32 %v22205_v32, %v22129_v22  ;;  %v22131_v9 = vadd.f32 %v22130_v43, %v22048_v55 }
 0x39c   : > { %v22281_v7 = vpop.f32.mrf.mxu1  ;;  %v22510_v34 = vpop.f32.mrf.mxu0 }
 0x39d   : > { %v22208_v33 = vadd.f32 %v22207_v26, %v22131_v9  ;;  %v22282_v45 = vadd.f32 %v22281_v7, %v22206_v4 }
 0x39e   : > { %v22283_v39 = vpop.f32.mrf.mxu1  ;;  %v26953_v47 = vpop.f32.mrf.mxu0 }
 0x39f   : > { %v22360_v28 = vadd.f32 %v22359_v38, %v22282_v45  ;;  %v22284_v40 = vadd.f32 %v22283_v39, %v22208_v33 }
 0x3a0   : > { %v22433_v12 = vpop.f32.mrf.mxu1  ;;  %v22660_v48 = vpop.f32.mrf.mxu0 }
 0x3a1   : > { %v22362_v59 = vadd.f32 %v22361_v20, %v22284_v40  ;;  %v22434_v11 = vadd.f32 %v22433_v12, %v22360_v28 }
 0x3a2   : > { %v22435_v25 = vpop.f32.mrf.mxu1  ;;  %v26963_v52 = vpop.f32.mrf.mxu0 }
 0x3a3   : > { %v30044_v63 = vadd.f32 %v22434_v11, %v21947_v1  ;;  %v22436_v46 = vadd.f32 %v22435_v25, %v22362_v59 }
 0x3a4   : > { %v22586_v6 = vpop.f32.mrf.mxu1  ;;  %v22808_v30 = vpop.f32.mrf.mxu0 }
 0x3a5   : > { %v30046_v58 = vadd.f32 %v22436_v46, %v21948_v51  ;;  %v22587_v27 = vadd.f32 %v22586_v6, %v22510_v34 }
 0x3a6   : > { %v26958_v41 = vpop.f32.mrf.mxu1  ;;  %v26973_v56 = vpop.f32.mrf.mxu0 }
 0x3a7   : > { %v22661_v62 = vadd.f32 %v22660_v48, %v22587_v27 }
 0x3a8   : > { %v22734_v57 = vpop.f32.mrf.mxu1  ;;  %v22983_v29 = vpop.f32.mrf.mxu0 }
 0x3a9   : > { %v22735_v21 = vadd.f32 %v22734_v57, %v22661_v62 }
 0x3aa   : > { %v26968_v8 = vpop.f32.mrf.mxu1  ;;  %v22985_v0 = vpop.f32.mrf.mxu0 }
 0x3ab   : > { %v22809_v49 = vadd.f32 %v22808_v30, %v22735_v21 }
 0x3ac   : > { %v22880_v18 = vpop.f32.mrf.mxu1  ;;  %v23142_v3 = vpop.f32.mrf.mxu0 }
 0x3ad   : > { %v22881_v31 = vadd.f32 %v22880_v18, %v22809_v49  ;;  %v25704_v49 = vlaneseq }
 0x3ae   : > { %v26978_v61 = vpop.f32.mrf.mxu1  ;;  %v23144_v13 = vpop.f32.mrf.mxu0 }
 0x3af   : > { %v30048_v24 = vadd.f32 %v22881_v31, %v21949_v54 }
 0x3b0   : > { %v23065_v1 = vpop.f32.mrf.mxu1  ;;  %v23296_v5 = vpop.f32.mrf.mxu0 }
 0x3b1   : > { %v23066_v28 = vadd.f32 %v23065_v1, %v22983_v29 }
 0x3b2   : > { %v23067_v42 = vpop.f32.mrf.mxu1  ;;  %v30050_v35 = vpop.f32.mrf.mxu0 }
 0x3b3   : > { %v23068_v59 = vadd.f32 %v23067_v42, %v22985_v0  ;;  %v23143_v25 = vadd.f32 %v23142_v3, %v23066_v28 }
 0x3b4   : > { %v23218_v51 = vpop.f32.mrf.mxu1  ;;  %v23447_v60 = vpop.f32.mrf.mxu0 }
 0x3b5   : > { %v23145_v30 = vadd.f32 %v23144_v13, %v23068_v59  ;;  %v23219_v56 = vadd.f32 %v23218_v51, %v23143_v25 }
 0x3b6   : > { %v23220_v19 = vpop.f32.mrf.mxu1  ;;  %v26983_v17 = vpop.f32.mrf.mxu0 }
 0x3b7   : > { %v23221_v0 = vadd.f32 %v23220_v19, %v23145_v30  ;;  %v23297_v3 = vadd.f32 %v23296_v5, %v23219_v56 }
 0x3b8   : > { %v30052_v15 = vpop.f32.mrf.mxu1  ;;  %v30054_v16 = vpop.f32.mrf.mxu0 }
 0x3b9   : > { %v23371_v19 = vadd.f32 %v30052_v15, %v23297_v3  ;;  %v25702_v15 = vld [vmem:[%s30127_s4] sm:$0x7] }
 0x3ba   : > { %v30056_v2 = vpop.f32.mrf.mxu1  ;;  %v26993_v10 = vpop.f32.mrf.mxu0 }
 0x3bb   : > { %v30074_v10 = vshrl.u32 %v25704_v49, 7 }
 0x3bc   : > { %v23523_v44 = vpop.f32.mrf.mxu1  ;;  %v30058_v50 = vpop.f32.mrf.mxu0 }
 0x3bd   : > { %v23524_v1 = vadd.f32 %v23523_v44, %v23447_v60 }
 0x3be   : > { %v26988_v14 = vpop.f32.mrf.mxu1  ;;  %v27003_v55 = vpop.f32.mrf.mxu0 }
 0x3bf   : > { %v23299_v14 = vadd.f32 %v30050_v35, %v23221_v0  ;;  %v23598_v5 = vadd.f32 %v30054_v16, %v23524_v1  ;;  %v23821_v16 = vadd.f32 %v23371_v19, %v30044_v63 }
 0x3c0   : > { %v30060_v36 = vpop.f32.mrf.mxu1  ;;  %v23920_v37 = vpop.f32.mrf.mxu0 }
 0x3c2   : > { %v26998_v32 = vpop.f32.mrf.mxu1  ;;  %v23922_v53 = vpop.f32.mrf.mxu0 }
 0x3c4   : > { %v30062_v54 = vpop.f32.mrf.mxu1  ;;  %v24079_v26 = vpop.f32.mrf.mxu0 }
 0x3c6   : > { %v27008_v23 = vpop.f32.mrf.mxu1  ;;  %v24081_v22 = vpop.f32.mrf.mxu0 }
 0x3c8   : > { %v24002_v38 = vpop.f32.mrf.mxu1  ;;  %v24233_v43 = vpop.f32.mrf.mxu0 }
 0x3c9   : > { %v24003_v11 = vadd.f32 %v24002_v38, %v23920_v37 }
 0x3ca   : > { %v24004_v4 = vpop.f32.mrf.mxu1  ;;  %v24235_v9 = vpop.f32.mrf.mxu0 }
 0x3cb   : > { %v24005_v52 = vadd.f32 %v24004_v4, %v23922_v53  ;;  %v24080_v41 = vadd.f32 %v24079_v26, %v24003_v11  ;;  %v25706_v4 = vsub.s32 0, %v30074_v10 }
 0x3cc   : > { %v24155_v20 = vpop.f32.mrf.mxu1  ;;  %v24384_v7 = vpop.f32.mrf.mxu0 }
 0x3cd   : > { %v24082_v21 = vadd.f32 %v24081_v22, %v24005_v52  ;;  %v24156_v18 = vadd.f32 %v24155_v20, %v24080_v41  ;;  %v23373_v20 = vadd.f32 %v30056_v2, %v23299_v14  ;;  %v25707_v11 = vrot.slane %v25702_v15, %v25706_v4 }
 0x3ce   : > { %v24157_v33 = vpop.f32.mrf.mxu1  ;;  %v27013_v45 = vpop.f32.mrf.mxu0 }
 0x3cf   : > { %v24158_v13 = vadd.f32 %v24157_v33, %v24082_v21  ;;  %v24234_v55 = vadd.f32 %v24233_v43, %v24156_v18  ;;  %v25710_v45 = vsub.s32 1, %v30074_v10  ;;  %v23822_v25 = vadd.f32 %v23373_v20, %v30046_v58 }
 0x3d0   : > { %v24307_v34 = vpop.f32.mrf.mxu1  ;;  %v24534_v39 = vpop.f32.mrf.mxu0 }
 0x3d1   : > { %v24236_v26 = vadd.f32 %v24235_v9, %v24158_v13  ;;  %v24308_v35 = vadd.f32 %v24307_v34, %v24234_v55 }
 0x3d2   : > { %v24309_v40 = vpop.f32.mrf.mxu1  ;;  %v27023_v47 = vpop.f32.mrf.mxu0 }
 0x3d3   : > { %v24310_v28 = vadd.f32 %v24309_v40, %v24236_v26 }
 0x3d4   : > { %v24460_v12 = vpop.f32.mrf.mxu1  ;;  %v30064_v48 = vpop.f32.mrf.mxu0 }
 0x3d5   : > { %v24461_v17 = vadd.f32 %v24460_v12, %v24384_v7 }
 0x3d6   : > { %v27018_v46 = vpop.f32.mrf.mxu1  ;;  %v27033_v6 = vpop.f32.mrf.mxu0 }
 0x3d7   : > { %v24535_v22 = vadd.f32 %v24534_v39, %v24461_v17  ;;  %v23672_v39 = vadd.f32 %v30060_v36, %v23598_v5  ;;  %v24758_v46 = vadd.f32 %v24308_v35, %v23821_v16  ;;  %v25711_v36 = vrot.slane %v25702_v15, %v25710_v45 }
 0x3d8   : > { %v24608_v27 = vpop.f32.mrf.mxu1  ;;  %v24857_v62 = vpop.f32.mrf.mxu0 }
 0x3d9   : > { %v24609_v34 = vadd.f32 %v24608_v27, %v24535_v22  ;;  %v23746_v40 = vadd.f32 %v30058_v50, %v23672_v39  ;;  %v24759_v27 = vadd.f32 %v24310_v28, %v23822_v25 }
 0x3da   : > { %v27028_v57 = vpop.f32.mrf.mxu1  ;;  %v24859_v29 = vpop.f32.mrf.mxu0 }
 0x3db   : > { %v24683_v58 = vadd.f32 %v30064_v48, %v24609_v34 }
 0x3dc   : > { %v30067_v8 = vpop.f32.mrf.mxu1  ;;  %v25016_v31 = vpop.f32.mrf.mxu0 }
 0x3dd   : > { %v24755_v50 = vadd.f32 %v30067_v8, %v24683_v58 }
 0x3de   : > { %v27038_v61 = vpop.f32.mrf.mxu1  ;;  %v25018_v42 = vpop.f32.mrf.mxu0 }
 0x3e0   : > { %v24939_v51 = vpop.f32.mrf.mxu1  ;;  %v25170_v32 = vpop.f32.mrf.mxu0 }
 0x3e1   : > { %v24940_v37 = vadd.f32 %v24939_v51, %v24857_v62 }
 0x3e2   : > { %v24941_v53 = vpop.f32.mrf.mxu1  ;;  %v25172_v23 = vpop.f32.mrf.mxu0 }
 0x3e3   : > { %v25017_v60 = vadd.f32 %v25016_v31, %v24940_v37  ;;  %v24942_v44 = vadd.f32 %v24941_v53, %v24859_v29  ;;  %v23818_v31 = vadd.f32 %v30062_v54, %v23746_v40 }
 0x3e4   : > { %v25092_v38 = vpop.f32.mrf.mxu1  ;;  %v25321_v33 = vpop.f32.mrf.mxu0 }
 0x3e5   : > { %v25019_v43 = vadd.f32 %v25018_v42, %v24942_v44  ;;  %v25093_v7 = vadd.f32 %v25092_v38, %v25017_v60  ;;  %v25714_v42 = vsub.s32 2, %v30074_v10  ;;  %v23823_v37 = vadd.f32 %v23818_v31, %v30048_v24 }
 0x3e6   : > { %v25094_v9 = vpop.f32.mrf.mxu1  ;;  %v27043_v2 = vpop.f32.mrf.mxu0 }
 0x3e7   : > { %v25171_v47 = vadd.f32 %v25170_v32, %v25093_v7  ;;  %v25095_v12 = vadd.f32 %v25094_v9, %v25019_v43  ;;  %v24760_v53 = vadd.f32 %v24755_v50, %v23823_v37  ;;  %v25715_v8 = vrot.slane %v25702_v15, %v25714_v42 }
 0x3e8   : > { %v25244_v59 = vpop.f32.mrf.mxu1  ;;  %v25471_v30 = vpop.f32.mrf.mxu0 }
 0x3e9   : > { %v25173_v52 = vadd.f32 %v25172_v23, %v25095_v12  ;;  %v25245_v6 = vadd.f32 %v25244_v59, %v25171_v47 }
 0x3ea   : > { %v25246_v63 = vpop.f32.mrf.mxu1  ;;  %v27053_v56 = vpop.f32.mrf.mxu0 }
 0x3eb   : > { %v25695_v41 = vadd.f32 %v25245_v6, %v24758_v46  ;;  %v25247_v62 = vadd.f32 %v25246_v63, %v25173_v52 }
 0x3ec   : > { %v25397_v57 = vpop.f32.mrf.mxu1  ;;  %v25619_v18 = vpop.f32.mrf.mxu0 }
 0x3ed   : > { %25698 = vst [vmem:[%s30091_s16] sm:$0xff] %v25695_v41  ;;  %v25696_v21 = vadd.f32 %v25247_v62, %v24759_v27  ;;  %v25398_v29 = vadd.f32 %v25397_v57, %v25321_v33  ;;  %v25719_v49 = vmul.f32 %v25707_v11, %v25695_v41 }
 0x3ee   : > { %v27048_v0 = vpop.f32.mrf.mxu1  ;;  %v27063_v13 = vpop.f32.mrf.mxu0 }
 0x3ef   : > { %25699 = vst [vmem:[%s30091_s16 + $0x8] sm:$0xff] %v25696_v21  ;;  %v25472_v3 = vadd.f32 %v25471_v30, %v25398_v29  ;;  %v25720_v61 = vmul.f32 %v25711_v36, %v25696_v21  ;;  %v25727_v51 = vmul.f32 %v25719_v49, %v25695_v41 }
 0x3f0   : > { %v25545_v1 = vpop.f32.mrf.mxu1 }
 0x3f1   : > { %v25546_v48 = vadd.f32 %v25545_v1, %v25472_v3  ;;  %v25722_v17 = vadd.f32 %v25720_v61, %v25719_v49  ;;  %v25728_v14 = vmul.f32 %v25720_v61, %v25696_v21 }
 0x3f2   : > { %v27058_v55 = vpop.f32.mrf.mxu1 }
 0x3f3   : > { %v25620_v32 = vadd.f32 %v25619_v18, %v25546_v48  ;;  %v25730_v19 = vadd.f32 %v25728_v14, %v25727_v51 }
 0x3f4   : > { %v25691_v54 = vpop.f32.mrf.mxu1 }
 0x3f5   : > { %v25692_v5 = vadd.f32 %v25691_v54, %v25620_v32 }
 0x3f6   : > { %v27068_v26 = vpop.f32.mrf.mxu1 }
 0x3f7   : > { %v25697_v60 = vadd.f32 %v25692_v5, %v24760_v53 }
 0x3f9   : > { %25701 = vst.msk [vmem:[%s30091_s16 + $0x10] sm:$0xff] %vm25700_vm15, %v25697_v60  ;;  %v25721_v10 = vmul.f32 %v25715_v8, %v25697_v60 }
 0x3fb   : > { %v25723_v44 = vsel %vm25700_vm15, %v25721_v10, 0.0  ;;  %v25729_v23 = vmul.f32 %v25721_v10, %v25697_v60 }
 0x3fc   : > { %v25724_v22 = vadd.f32 %v25723_v44, %v25722_v17 }
 0x3fd   : > { %v25731_v38 = vsel %vm25700_vm15, %v25729_v23, 0.0 }
 0x3fe   : > { %25725 = vadd.xlane.f32.xlu0 %v25724_v22  ;;  %v25732_v4 = vadd.f32 %v25731_v38, %v25730_v19 }
 0x400   : > { %25733 = vadd.xlane.f32.xlu1 %v25732_v4 }
 0x487   : > { %v25726_v24 = vpop.xlane.xlu0 %25725 }
 0x489   : > { %v25734_v20 = vpop.xlane.xlu1 %25733 }
 0x48a   : > { %v25735_v35 = vsel %vm3246_vm6, %v25726_v24, %v25734_v20 }
 0x48b   : > { %25737 = vst.msk [vmem:[%s390_s14] sm:$0xff] %vm25736_vm0, %v25735_v35 }
 0x48c PF: > { %s17_s25 = sadd.s32 1, %s27179_s25   ;;  %s30162_s21 = smov %s27171_s23 }
 0x48d   : > { %p14_p10 = scmp.ge.s32.totalorder %s17_s25, 34   ;;  %s30163_s22 = smov %s27175_s24 }
 0x48e   : > { %s30164_s23 = smov %s30167_s26  ;;  %s30165_s24 = smov %s30171_s27 }
 0x48f   :  { %16 = sbr.rel (!%p14_p10) target bundleno = 3 (0x3), region = 88 }

</bundles_post_ra>
